<compile_context>
chip_gen: v6e
topology: v6e:2x2x1
jax: 0.10.0
libtpu: 0.0.40
codegen_flags: <defaults>
</compile_context>

<pallas_src>
import functools
import math

import jax
import jax.numpy as jnp
from jax.experimental import pallas as pl
from jax.experimental.pallas import tpu as pltpu

# Module defaults from TransformerEncoder.__init__
N_LAYERS = 2
N_HEADS = 2
HIDDEN = 64
INNER = 256
EPS = 1e-12
HEAD_DIM = HIDDEN // N_HEADS

_N_VEC = 7  # packed vector rows per layer: [bo, g1, be1, b1, b2, g2, be2]


def _erf(x):
    # Abramowitz & Stegun 7.1.26 polynomial approximation (|err| < 1.5e-7);
    # keeps the exact-erf GELU semantics of FeedForward.gelu without relying on
    # a Mosaic lowering for lax.erf.
    a1, a2, a3, a4, a5 = 0.254829592, -0.284496736, 1.421413741, -1.453152027, 1.061405429
    p = 0.3275911
    ax = jnp.abs(x)
    t = 1.0 / (1.0 + p * ax)
    poly = ((((a5 * t + a4) * t + a3) * t + a2) * t + a1) * t
    y = 1.0 - poly * jnp.exp(-ax * ax)
    return jnp.where(x >= 0, y, -y)


def _gelu(x):
    # erf-based gelu, matching FeedForward.gelu (hidden_act='gelu').
    # TODO(synk): a tanh-approx gelu would move more work onto the EUP but
    # changes numerics (~1e-3); the exact-erf form of the reference is kept.
    return x * 0.5 * (1.0 + _erf(x * (1.0 / math.sqrt(2.0))))


def _layer_norm(x, gamma, beta, eps):
    mu = jnp.mean(x, axis=-1, keepdims=True)
    d = x - mu
    var = jnp.mean(d * d, axis=-1, keepdims=True)
    return d * jax.lax.rsqrt(var + eps) * gamma + beta


def encoder_kernel(x_ref, mask_ref, wqkv_ref, bqkv_ref, wo_ref, w1_ref,
                   w2_ref, vec_ref, o_ref, *, n_layers, n_heads):
    bb, S, H = x_ref.shape                      # batch block, sequence, hidden
    inner = w1_ref.shape[-1]
    BN = bb * n_heads                           # fused (batch, head) axis
    M = bb * S                                  # fused (batch, seq) rows

    # Additive attention mask (bb, 1, Mq, S) with Mq in {1, S}; broadcast over
    # heads (and query positions when Mq == 1), as in `scores + attention_mask`.
    # Hoisted out of the layer loop (JAX does not CSE broadcast_in_dim).
    m = mask_ref[...][:, 0]                                       # (bb, Mq, S)
    Mq = m.shape[1]
    mask_bh = jnp.broadcast_to(m[:, None], (bb, n_heads, Mq, S)).reshape(BN, Mq, S)

    # Activation stays VMEM-resident across all layers.
    h2d = x_ref[...].reshape(M, H).astype(jnp.float32)

    for l in range(n_layers):                   # static unrolled layer loop
        # ---- per-layer parameters (static leading-axis indexing) ----
        wq = wqkv_ref[3 * l + 0]                # (NH, H, HD); 1/sqrt(HD) pre-folded
        wk = wqkv_ref[3 * l + 1]
        wv = wqkv_ref[3 * l + 2]
        bq = bqkv_ref[3 * l + 0]                # (NH, 1, HD); 1/sqrt(HD) pre-folded
        bk = bqkv_ref[3 * l + 1]
        bv = bqkv_ref[3 * l + 2]
        wo = wo_ref[l]                          # (NH, HD, H)
        w1 = w1_ref[l]                          # (H, INNER)
        w2 = w2_ref[l]                          # (INNER, H)
        vecs = vec_ref[l]                       # (7, INNER), rows zero-padded
        bo, g1, be1 = vecs[0:1, :H], vecs[1:2, :H], vecs[2:3, :H]
        b1 = vecs[3:4, :inner]
        b2, g2, be2 = vecs[4:5, :H], vecs[5:6, :H], vecs[6:7, :H]

        def bh(w):
            # tile a per-head tensor across the batch -> leading dim BN
            return jnp.broadcast_to(w[None], (bb,) + w.shape).reshape((BN,) + w.shape[1:])

        # ---- MultiHeadAttention: all (batch, head) slots in batched einsums ----
        x3 = h2d.reshape(bb, S, H)
        xb = jnp.broadcast_to(x3[:, None], (bb, n_heads, S, H)).reshape(BN, S, H)

        q = jnp.einsum('ash,ahd->asd', xb, bh(wq),
                       preferred_element_type=jnp.float32) + bh(bq)
        k = jnp.einsum('ash,ahd->asd', xb, bh(wk),
                       preferred_element_type=jnp.float32) + bh(bk)
        v = jnp.einsum('ash,ahd->asd', xb, bh(wv),
                       preferred_element_type=jnp.float32) + bh(bv)

        # scores: contract last dims directly (no explicit K transpose);
        # the 1/sqrt(head_dim) scale is already baked into q.
        s = jnp.einsum('aqd,akd->aqk', q, k,
                       preferred_element_type=jnp.float32)
        s = s + mask_bh
        s = s - jnp.max(s, axis=-1, keepdims=True)
        p = jnp.exp(s)
        p = p * pl.reciprocal(jnp.sum(p, axis=-1, keepdims=True), approx=True)

        ctx = jnp.einsum('aqk,akd->aqd', p, v,
                         preferred_element_type=jnp.float32)     # (BN, S, HD)

        # Head recombination folded into the output projection: per-head partial
        # projections, summed over the (leading) head axis -> no lane concat.
        proj = jnp.einsum('asd,adh->ash', ctx, bh(wo),
                          preferred_element_type=jnp.float32)    # (BN, S, H)
        attn = jnp.sum(proj.reshape(bb, n_heads, S, H), axis=1).reshape(M, H) + bo
        attn = _layer_norm(attn + h2d, g1, be1, EPS)

        # ---- FeedForward (all B*S rows in one matmul) ----
        f = jnp.dot(attn, w1, preferred_element_type=jnp.float32) + b1
        f = _gelu(f)
        f = jnp.dot(f, w2, preferred_element_type=jnp.float32) + b2
        h2d = _layer_norm(f + attn, g2, be2, EPS)

        o_ref[l] = h2d.reshape(bb, S, H).astype(o_ref.dtype)


def _pack_params(layer_params_list, n_heads):
    """layer_params_list: list (len = n_layers) of 16-tuples
       (wq, bq, wk, bk, wv, bv, wo, bo, g1, be1, w1, b1, w2, b2, g2, be2)
       with linear weights stored as (in, out) so y = x @ W + b (== x @ W.T + b
       for the PyTorch (out, in) weights).  Returns the stacked / head-split /
       packed arrays consumed by the fused kernel.  The attention score scale
       1/sqrt(head_dim) is folded into the Q weights and biases here."""
    H = layer_params_list[0][0].shape[0]
    inner = layer_params_list[0][10].shape[1]
    HD = H // n_heads
    vec_w = max(H, inner)
    q_scale = 1.0 / math.sqrt(HD)

    def split_in(w):      # (H, H) -> (NH, H, HD): output column n*HD+d -> head n
        return jnp.transpose(w.reshape(H, n_heads, HD), (1, 0, 2))

    def split_bias(b):    # (1, H) -> (NH, 1, HD)
        return jnp.reshape(b, (n_heads, HD))[:, None, :]

    def split_out(w):     # (H, H) -> (NH, HD, H): input row n*HD+d -> head n
        return w.reshape(n_heads, HD, H)

    def padded_row(v):
        flat = jnp.reshape(v, (-1,)).astype(jnp.float32)
        return jnp.pad(flat, (0, vec_w - flat.shape[0]))

    wqkv, bqkv, wo_l, w1_l, w2_l, vec_l = [], [], [], [], [], []
    for (wq, bq, wk, bk, wv, bv, wo, bo, g1, be1,
         w1, b1, w2, b2, g2, be2) in layer_params_list:
        wqkv += [split_in(wq) * q_scale, split_in(wk), split_in(wv)]
        bqkv += [split_bias(bq) * q_scale, split_bias(bk), split_bias(bv)]
        wo_l.append(split_out(wo))
        w1_l.append(w1)
        w2_l.append(w2)
        vec_l.append(jnp.stack([padded_row(s)
                                for s in (bo, g1, be1, b1, b2, g2, be2)]))
    return (jnp.stack(wqkv), jnp.stack(bqkv), jnp.stack(wo_l),
            jnp.stack(w1_l), jnp.stack(w2_l), jnp.stack(vec_l))


def _encoder_pallas(x, attn_mask, packed, *, n_layers, n_heads, b_block):
    B, S, H = x.shape
    wqkv, bqkv, wo, w1, w2, vecs = packed
    Mq = attn_mask.shape[2]          # 1 (key-padding mask) or S (full mask)
    nb = B // b_block

    def wspec(shape):
        nd = len(shape)
        return pl.BlockSpec(shape, lambda i, nd=nd: (0,) * nd)

    kernel = functools.partial(encoder_kernel, n_layers=n_layers, n_heads=n_heads)
    return pl.pallas_call(
        kernel,
        out_shape=jax.ShapeDtypeStruct((n_layers, B, S, H), x.dtype),
        grid=(nb,),
        in_specs=[
            pl.BlockSpec((b_block, S, H), lambda i: (i, 0, 0)),
            pl.BlockSpec((b_block, 1, Mq, S), lambda i: (i, 0, 0, 0)),
            wspec(wqkv.shape), wspec(bqkv.shape), wspec(wo.shape),
            wspec(w1.shape), wspec(w2.shape), wspec(vecs.shape),
        ],
        out_specs=pl.BlockSpec((n_layers, b_block, S, H), lambda i: (0, i, 0, 0)),
        compiler_params=pltpu.CompilerParams(
            dimension_semantics=("parallel",)),
    )(x, attn_mask, wqkv, bqkv, wo, w1, w2, vecs)


def transformer_encoder(x, attn_mask, layer_params_list,
                        output_all_encode_layers=True, b_block=None):
    """x: (B, S, H) f32; attn_mask: (B, 1, 1, S) or (B, 1, S, S) additive mask."""
    B, S, H = x.shape
    n_layers = len(layer_params_list)
    packed = _pack_params(layer_params_list, N_HEADS)
    if b_block is None:
        b_block = B          # one fused block; use B//2 on v7x to feed both TCs
    assert B % b_block == 0
    out = _encoder_pallas(x, attn_mask, packed,
                          n_layers=n_layers, n_heads=N_HEADS, b_block=b_block)
    if output_all_encode_layers:
        return [out[l] for l in range(n_layers)]
    return [out[-1]]


def init_layer_params(key):
    """Deterministic synthetic weights; linear weights pre-transposed to (in, out)."""
    ks = jax.random.split(key, 12)

    def lin(kw, kb, din, dout):
        w = jax.random.normal(kw, (din, dout), jnp.float32) * 0.02
        b = jax.random.normal(kb, (1, dout), jnp.float32) * 0.02
        return w, b

    wq, bq = lin(ks[0], ks[1], HIDDEN, HIDDEN)
    wk, bk = lin(ks[2], ks[3], HIDDEN, HIDDEN)
    wv, bv = lin(ks[4], ks[5], HIDDEN, HIDDEN)
    wo, bo = lin(ks[6], ks[7], HIDDEN, HIDDEN)
    g1, be1 = jnp.ones((1, HIDDEN), jnp.float32), jnp.zeros((1, HIDDEN), jnp.float32)
    w1, b1 = lin(ks[8], ks[9], HIDDEN, INNER)
    w2, b2 = lin(ks[10], ks[11], INNER, HIDDEN)
    g2, be2 = jnp.ones((1, HIDDEN), jnp.float32), jnp.zeros((1, HIDDEN), jnp.float32)
    return (wq, bq, wk, bk, wv, bv, wo, bo, g1, be1, w1, b1, w2, b2, g2, be2)


def _reference_encoder(x, attn_mask, layer_params_list):
    """Pure-JAX reference mirroring the PyTorch module (eval mode)."""
    B, S, H = x.shape
    HD = H // N_HEADS

    def ln(v, g, b):
        mu = jnp.mean(v, axis=-1, keepdims=True)
        var = jnp.mean((v - mu) ** 2, axis=-1, keepdims=True)
        return (v - mu) * jax.lax.rsqrt(var + EPS) * g + b

    outs, h = [], x
    for (wq, bq, wk, bk, wv, bv, wo, bo, g1, be1,
         w1, b1, w2, b2, g2, be2) in layer_params_list:
        q, k, v = h @ wq + bq, h @ wk + bk, h @ wv + bv

        def heads(t):
            return jnp.transpose(t.reshape(B, S, N_HEADS, HD), (0, 2, 1, 3))

        qh, kh, vh = heads(q), heads(k), heads(v)
        s = jnp.einsum('bnqd,bnkd->bnqk', qh, kh) / math.sqrt(HD) + attn_mask
        p = jax.nn.softmax(s, axis=-1)
        ctx = jnp.einsum('bnqk,bnkd->bnqd', p, vh)
        ctx = jnp.transpose(ctx, (0, 2, 1, 3)).reshape(B, S, H)
        attn = ln(ctx @ wo + bo + h, g1, be1)
        f = jax.nn.gelu(attn @ w1 + b1, approximate=False)
        h = ln(f @ w2 + b2 + attn, g2, be2)
        outs.append(h)
    return outs


if __name__ == "__main__":
    B, S = 2, 8

    key = jax.random.PRNGKey(0)
    kx, km, kp = jax.random.split(key, 3)

    x = jax.random.normal(kx, (B, S, HIDDEN), jnp.float32)

    # Additive attention mask, BERT-style: 0.0 for attended key positions,
    # -10000.0 for masked ones; broadcast over heads and query positions.
    keep = jax.random.bernoulli(km, 0.8, (B, 1, 1, S))
    attn_mask = jnp.where(keep, 0.0, -10000.0).astype(jnp.float32)

    # TransformerEncoder deepcopies one initialized layer -> identical weights.
    shared_params = init_layer_params(kp)
    layer_params_list = [shared_params for _ in range(N_LAYERS)]

    outs = transformer_encoder(x, attn_mask, layer_params_list,
                               output_all_encode_layers=True)
    for o in outs:
        jax.block_until_ready(o)

    assert len(outs) == N_LAYERS
    assert outs[0].shape == (B, S, HIDDEN)

    # Numerical check against the pure-JAX reference (loose tolerance covers the
    # approx EUP reciprocal in the softmax and the erf polynomial).
    refs = _reference_encoder(x, attn_mask, layer_params_list)
    for o, r in zip(outs, refs):
        max_diff = float(jnp.max(jnp.abs(o - r)))
        assert max_diff < 3e-2, f"mismatch vs reference: {max_diff}"

    print("KERNEL_OK")
</pallas_src>

<mosaic_0001>
module attributes {stable_mosaic.version = 11 : i64} {
  func.func @encoder_kernel(%arg0: i32, %arg1: memref<2x8x64xf32, #tpu.memory_space<vmem>>, %arg2: memref<2x1x1x8xf32, #tpu.memory_space<vmem>>, %arg3: memref<6x2x64x32xf32, #tpu.memory_space<vmem>>, %arg4: memref<6x2x1x32xf32, #tpu.memory_space<vmem>>, %arg5: memref<2x2x32x64xf32, #tpu.memory_space<vmem>>, %arg6: memref<2x64x256xf32, #tpu.memory_space<vmem>>, %arg7: memref<2x256x64xf32, #tpu.memory_space<vmem>>, %arg8: memref<2x7x256xf32, #tpu.memory_space<vmem>>, %arg9: memref<2x2x8x64xf32, #tpu.memory_space<vmem>>) attributes {dimension_semantics = [#tpu.dimension_semantics<parallel>], iteration_bounds = array<i64: 1>, scalar_prefetch = 0 : i64, scratch_operands = 0 : i64, tpu.core_type = #tpu.core_type<tc>, window_params = [{transform_indices = @transform_0, window_bounds = array<i64: 2, 8, 64>}, {transform_indices = @transform_1, window_bounds = array<i64: 2, 1, 1, 8>}, {pipeline_mode = #tpu.pipeline_mode<synchronous>, transform_indices = @transform_2, window_bounds = array<i64: 6, 2, 64, 32>}, {pipeline_mode = #tpu.pipeline_mode<synchronous>, transform_indices = @transform_3, window_bounds = array<i64: 6, 2, 1, 32>}, {pipeline_mode = #tpu.pipeline_mode<synchronous>, transform_indices = @transform_4, window_bounds = array<i64: 2, 2, 32, 64>}, {pipeline_mode = #tpu.pipeline_mode<synchronous>, transform_indices = @transform_5, window_bounds = array<i64: 2, 64, 256>}, {pipeline_mode = #tpu.pipeline_mode<synchronous>, transform_indices = @transform_6, window_bounds = array<i64: 2, 256, 64>}, {pipeline_mode = #tpu.pipeline_mode<synchronous>, transform_indices = @transform_7, window_bounds = array<i64: 2, 7, 256>}, {transform_indices = @transform_8, window_bounds = array<i64: 2, 2, 8, 64>}]} {
    %c0 = arith.constant 0 : index
    %c0_0 = arith.constant 0 : index
    %c0_1 = arith.constant 0 : index
    %c0_2 = arith.constant 0 : index
    %0 = vector.load %arg2[%c0, %c0_0, %c0_1, %c0_2] : memref<2x1x1x8xf32, #tpu.memory_space<vmem>>, vector<2x1x1x8xf32>
    %1 = vector.shape_cast %0 : vector<2x1x1x8xf32> to vector<2x1x8xf32>
    %2 = vector.shape_cast %1 : vector<2x1x8xf32> to vector<2x1x1x8xf32>
    %3 = vector.shape_cast %2 : vector<2x1x1x8xf32> to vector<2x1x1x8xf32>
    %4 = vector.broadcast %3 : vector<2x1x1x8xf32> to vector<2x2x1x8xf32>
    %5 = vector.shape_cast %4 : vector<2x2x1x8xf32> to vector<4x1x8xf32>
    %c0_3 = arith.constant 0 : index
    %c0_4 = arith.constant 0 : index
    %c0_5 = arith.constant 0 : index
    %6 = vector.load %arg1[%c0_3, %c0_4, %c0_5] : memref<2x8x64xf32, #tpu.memory_space<vmem>>, vector<2x8x64xf32>
    %7 = vector.shape_cast %6 : vector<2x8x64xf32> to vector<16x64xf32>
    %c0_6 = arith.constant 0 : index
    %c0_7 = arith.constant 0 : index
    %c0_8 = arith.constant 0 : index
    %c0_9 = arith.constant 0 : index
    %8 = vector.load %arg3[%c0_6, %c0_7, %c0_8, %c0_9] : memref<6x2x64x32xf32, #tpu.memory_space<vmem>>, vector<1x2x64x32xf32>
    %9 = vector.shape_cast %8 : vector<1x2x64x32xf32> to vector<2x64x32xf32>
    %c1 = arith.constant 1 : index
    %c0_10 = arith.constant 0 : index
    %c0_11 = arith.constant 0 : index
    %c0_12 = arith.constant 0 : index
    %10 = vector.load %arg3[%c1, %c0_10, %c0_11, %c0_12] : memref<6x2x64x32xf32, #tpu.memory_space<vmem>>, vector<1x2x64x32xf32>
    %11 = vector.shape_cast %10 : vector<1x2x64x32xf32> to vector<2x64x32xf32>
    %c2 = arith.constant 2 : index
    %c0_13 = arith.constant 0 : index
    %c0_14 = arith.constant 0 : index
    %c0_15 = arith.constant 0 : index
    %12 = vector.load %arg3[%c2, %c0_13, %c0_14, %c0_15] : memref<6x2x64x32xf32, #tpu.memory_space<vmem>>, vector<1x2x64x32xf32>
    %13 = vector.shape_cast %12 : vector<1x2x64x32xf32> to vector<2x64x32xf32>
    %c0_16 = arith.constant 0 : index
    %c0_17 = arith.constant 0 : index
    %c0_18 = arith.constant 0 : index
    %c0_19 = arith.constant 0 : index
    %14 = vector.load %arg4[%c0_16, %c0_17, %c0_18, %c0_19] : memref<6x2x1x32xf32, #tpu.memory_space<vmem>>, vector<1x2x1x32xf32>
    %15 = vector.shape_cast %14 : vector<1x2x1x32xf32> to vector<2x1x32xf32>
    %c1_20 = arith.constant 1 : index
    %c0_21 = arith.constant 0 : index
    %c0_22 = arith.constant 0 : index
    %c0_23 = arith.constant 0 : index
    %16 = vector.load %arg4[%c1_20, %c0_21, %c0_22, %c0_23] : memref<6x2x1x32xf32, #tpu.memory_space<vmem>>, vector<1x2x1x32xf32>
    %17 = vector.shape_cast %16 : vector<1x2x1x32xf32> to vector<2x1x32xf32>
    %c2_24 = arith.constant 2 : index
    %c0_25 = arith.constant 0 : index
    %c0_26 = arith.constant 0 : index
    %c0_27 = arith.constant 0 : index
    %18 = vector.load %arg4[%c2_24, %c0_25, %c0_26, %c0_27] : memref<6x2x1x32xf32, #tpu.memory_space<vmem>>, vector<1x2x1x32xf32>
    %19 = vector.shape_cast %18 : vector<1x2x1x32xf32> to vector<2x1x32xf32>
    %c0_28 = arith.constant 0 : index
    %c0_29 = arith.constant 0 : index
    %c0_30 = arith.constant 0 : index
    %c0_31 = arith.constant 0 : index
    %20 = vector.load %arg5[%c0_28, %c0_29, %c0_30, %c0_31] : memref<2x2x32x64xf32, #tpu.memory_space<vmem>>, vector<1x2x32x64xf32>
    %21 = vector.shape_cast %20 : vector<1x2x32x64xf32> to vector<2x32x64xf32>
    %c0_32 = arith.constant 0 : index
    %c0_33 = arith.constant 0 : index
    %c0_34 = arith.constant 0 : index
    %22 = vector.load %arg6[%c0_32, %c0_33, %c0_34] : memref<2x64x256xf32, #tpu.memory_space<vmem>>, vector<1x64x256xf32>
    %23 = vector.shape_cast %22 : vector<1x64x256xf32> to vector<64x256xf32>
    %c0_35 = arith.constant 0 : index
    %c0_36 = arith.constant 0 : index
    %c0_37 = arith.constant 0 : index
    %24 = vector.load %arg7[%c0_35, %c0_36, %c0_37] : memref<2x256x64xf32, #tpu.memory_space<vmem>>, vector<1x256x64xf32>
    %25 = vector.shape_cast %24 : vector<1x256x64xf32> to vector<256x64xf32>
    %c0_38 = arith.constant 0 : index
    %c0_39 = arith.constant 0 : index
    %c0_40 = arith.constant 0 : index
    %26 = vector.load %arg8[%c0_38, %c0_39, %c0_40] : memref<2x7x256xf32, #tpu.memory_space<vmem>>, vector<1x7x256xf32>
    %27 = vector.shape_cast %26 : vector<1x7x256xf32> to vector<7x256xf32>
    %28 = vector.extract_strided_slice %27 {offsets = [0, 0], sizes = [1, 64], strides = [1, 1]} : vector<7x256xf32> to vector<1x64xf32>
    %29 = vector.extract_strided_slice %27 {offsets = [1, 0], sizes = [1, 64], strides = [1, 1]} : vector<7x256xf32> to vector<1x64xf32>
    %30 = vector.extract_strided_slice %27 {offsets = [2, 0], sizes = [1, 64], strides = [1, 1]} : vector<7x256xf32> to vector<1x64xf32>
    %31 = vector.extract_strided_slice %27 {offsets = [3, 0], sizes = [1, 256], strides = [1, 1]} : vector<7x256xf32> to vector<1x256xf32>
    %32 = vector.extract_strided_slice %27 {offsets = [4, 0], sizes = [1, 64], strides = [1, 1]} : vector<7x256xf32> to vector<1x64xf32>
    %33 = vector.extract_strided_slice %27 {offsets = [5, 0], sizes = [1, 64], strides = [1, 1]} : vector<7x256xf32> to vector<1x64xf32>
    %34 = vector.extract_strided_slice %27 {offsets = [6, 0], sizes = [1, 64], strides = [1, 1]} : vector<7x256xf32> to vector<1x64xf32>
    %35 = vector.shape_cast %7 : vector<16x64xf32> to vector<2x8x64xf32>
    %36 = vector.shape_cast %35 : vector<2x8x64xf32> to vector<2x1x8x64xf32>
    %37 = vector.shape_cast %36 : vector<2x1x8x64xf32> to vector<2x1x8x64xf32>
    %38 = vector.broadcast %37 : vector<2x1x8x64xf32> to vector<2x2x8x64xf32>
    %39 = vector.shape_cast %38 : vector<2x2x8x64xf32> to vector<4x8x64xf32>
    %40 = vector.shape_cast %9 : vector<2x64x32xf32> to vector<1x2x64x32xf32>
    %41 = vector.shape_cast %40 : vector<1x2x64x32xf32> to vector<1x2x64x32xf32>
    %42 = vector.broadcast %41 : vector<1x2x64x32xf32> to vector<2x2x64x32xf32>
    %43 = vector.shape_cast %42 : vector<2x2x64x32xf32> to vector<4x64x32xf32>
    "tpu.trace_start"() <{level = 10 : i32, message = "ash,ahd->asd"}> : () -> ()
    %cst = arith.constant dense<0.000000e+00> : vector<4x8x32xf32>
    %44 = tpu.matmul %39, %43, %cst {dimension_numbers = #tpu.dot_dimension_numbers<[2], [1], [1], [2], [0, 0, 0, 1, 1, 2], [0], [0]>} : vector<4x8x64xf32>, vector<4x64x32xf32>, vector<4x8x32xf32> -> vector<4x8x32xf32>
    "tpu.trace_stop"() : () -> ()
    %45 = vector.shape_cast %15 : vector<2x1x32xf32> to vector<1x2x1x32xf32>
    %46 = vector.shape_cast %45 : vector<1x2x1x32xf32> to vector<1x2x1x32xf32>
    %47 = vector.broadcast %46 : vector<1x2x1x32xf32> to vector<2x2x1x32xf32>
    %48 = vector.shape_cast %47 : vector<2x2x1x32xf32> to vector<4x1x32xf32>
    %49 = vector.broadcast %48 : vector<4x1x32xf32> to vector<4x8x32xf32>
    %50 = arith.addf %44, %49 : vector<4x8x32xf32>
    %51 = vector.shape_cast %11 : vector<2x64x32xf32> to vector<1x2x64x32xf32>
    %52 = vector.shape_cast %51 : vector<1x2x64x32xf32> to vector<1x2x64x32xf32>
    %53 = vector.broadcast %52 : vector<1x2x64x32xf32> to vector<2x2x64x32xf32>
    %54 = vector.shape_cast %53 : vector<2x2x64x32xf32> to vector<4x64x32xf32>
    "tpu.trace_start"() <{level = 10 : i32, message = "ash,ahd->asd"}> : () -> ()
    %cst_41 = arith.constant dense<0.000000e+00> : vector<4x8x32xf32>
    %55 = tpu.matmul %39, %54, %cst_41 {dimension_numbers = #tpu.dot_dimension_numbers<[2], [1], [1], [2], [0, 0, 0, 1, 1, 2], [0], [0]>} : vector<4x8x64xf32>, vector<4x64x32xf32>, vector<4x8x32xf32> -> vector<4x8x32xf32>
    "tpu.trace_stop"() : () -> ()
    %56 = vector.shape_cast %17 : vector<2x1x32xf32> to vector<1x2x1x32xf32>
    %57 = vector.shape_cast %56 : vector<1x2x1x32xf32> to vector<1x2x1x32xf32>
    %58 = vector.broadcast %57 : vector<1x2x1x32xf32> to vector<2x2x1x32xf32>
    %59 = vector.shape_cast %58 : vector<2x2x1x32xf32> to vector<4x1x32xf32>
    %60 = vector.broadcast %59 : vector<4x1x32xf32> to vector<4x8x32xf32>
    %61 = arith.addf %55, %60 : vector<4x8x32xf32>
    %62 = vector.shape_cast %13 : vector<2x64x32xf32> to vector<1x2x64x32xf32>
    %63 = vector.shape_cast %62 : vector<1x2x64x32xf32> to vector<1x2x64x32xf32>
    %64 = vector.broadcast %63 : vector<1x2x64x32xf32> to vector<2x2x64x32xf32>
    %65 = vector.shape_cast %64 : vector<2x2x64x32xf32> to vector<4x64x32xf32>
    "tpu.trace_start"() <{level = 10 : i32, message = "ash,ahd->asd"}> : () -> ()
    %cst_42 = arith.constant dense<0.000000e+00> : vector<4x8x32xf32>
    %66 = tpu.matmul %39, %65, %cst_42 {dimension_numbers = #tpu.dot_dimension_numbers<[2], [1], [1], [2], [0, 0, 0, 1, 1, 2], [0], [0]>} : vector<4x8x64xf32>, vector<4x64x32xf32>, vector<4x8x32xf32> -> vector<4x8x32xf32>
    "tpu.trace_stop"() : () -> ()
    %67 = vector.shape_cast %19 : vector<2x1x32xf32> to vector<1x2x1x32xf32>
    %68 = vector.shape_cast %67 : vector<1x2x1x32xf32> to vector<1x2x1x32xf32>
    %69 = vector.broadcast %68 : vector<1x2x1x32xf32> to vector<2x2x1x32xf32>
    %70 = vector.shape_cast %69 : vector<2x2x1x32xf32> to vector<4x1x32xf32>
    %71 = vector.broadcast %70 : vector<4x1x32xf32> to vector<4x8x32xf32>
    %72 = arith.addf %66, %71 : vector<4x8x32xf32>
    "tpu.trace_start"() <{level = 10 : i32, message = "aqd,akd->aqk"}> : () -> ()
    %cst_43 = arith.constant dense<0.000000e+00> : vector<4x8x8xf32>
    %73 = tpu.matmul %50, %61, %cst_43 {dimension_numbers = #tpu.dot_dimension_numbers<[2], [2], [1], [1], [0, 0, 0, 1, 1, 1], [0], [0]>} : vector<4x8x32xf32>, vector<4x8x32xf32>, vector<4x8x8xf32> -> vector<4x8x8xf32>
    "tpu.trace_stop"() : () -> ()
    %74 = vector.broadcast %5 : vector<4x1x8xf32> to vector<4x8x8xf32>
    %75 = arith.addf %73, %74 : vector<4x8x8xf32>
    %cst_44 = arith.constant dense<0xFF800000> : vector<4x8xf32>
    %76 = vector.multi_reduction <maximumf>, %75, %cst_44 [2] : vector<4x8x8xf32> to vector<4x8xf32>
    %77 = vector.shape_cast %76 : vector<4x8xf32> to vector<4x8x1xf32>
    %78 = vector.broadcast %77 : vector<4x8x1xf32> to vector<4x8x8xf32>
    %79 = arith.subf %75, %78 : vector<4x8x8xf32>
    %80 = math.exp %79 : vector<4x8x8xf32>
    %cst_45 = arith.constant dense<0.000000e+00> : vector<4x8xf32>
    %81 = vector.multi_reduction <add>, %80, %cst_45 [2] : vector<4x8x8xf32> to vector<4x8xf32>
    %82 = vector.shape_cast %81 : vector<4x8xf32> to vector<4x8x1xf32>
    %83 = tpu.reciprocal %82 {approx = true} : vector<4x8x1xf32> -> vector<4x8x1xf32>
    %84 = vector.broadcast %83 : vector<4x8x1xf32> to vector<4x8x8xf32>
    %85 = arith.mulf %80, %84 : vector<4x8x8xf32>
    "tpu.trace_start"() <{level = 10 : i32, message = "aqk,akd->aqd"}> : () -> ()
    %cst_46 = arith.constant dense<0.000000e+00> : vector<4x8x32xf32>
    %86 = tpu.matmul %85, %72, %cst_46 {dimension_numbers = #tpu.dot_dimension_numbers<[2], [1], [1], [2], [0, 0, 0, 1, 1, 2], [0], [0]>} : vector<4x8x8xf32>, vector<4x8x32xf32>, vector<4x8x32xf32> -> vector<4x8x32xf32>
    "tpu.trace_stop"() : () -> ()
    %87 = vector.shape_cast %21 : vector<2x32x64xf32> to vector<1x2x32x64xf32>
    %88 = vector.shape_cast %87 : vector<1x2x32x64xf32> to vector<1x2x32x64xf32>
    %89 = vector.broadcast %88 : vector<1x2x32x64xf32> to vector<2x2x32x64xf32>
    %90 = vector.shape_cast %89 : vector<2x2x32x64xf32> to vector<4x32x64xf32>
    "tpu.trace_start"() <{level = 10 : i32, message = "asd,adh->ash"}> : () -> ()
    %cst_47 = arith.constant dense<0.000000e+00> : vector<4x8x64xf32>
    %91 = tpu.matmul %86, %90, %cst_47 {dimension_numbers = #tpu.dot_dimension_numbers<[2], [1], [1], [2], [0, 0, 0, 1, 1, 2], [0], [0]>} : vector<4x8x32xf32>, vector<4x32x64xf32>, vector<4x8x64xf32> -> vector<4x8x64xf32>
    "tpu.trace_stop"() : () -> ()
    %92 = vector.shape_cast %91 : vector<4x8x64xf32> to vector<2x2x8x64xf32>
    %cst_48 = arith.constant dense<0.000000e+00> : vector<2x8x64xf32>
    %93 = vector.multi_reduction <add>, %92, %cst_48 [1] : vector<2x2x8x64xf32> to vector<2x8x64xf32>
    %94 = vector.shape_cast %93 : vector<2x8x64xf32> to vector<16x64xf32>
    %95 = vector.broadcast %28 : vector<1x64xf32> to vector<16x64xf32>
    %96 = arith.addf %94, %95 : vector<16x64xf32>
    %97 = arith.addf %96, %7 : vector<16x64xf32>
    %cst_49 = arith.constant dense<0.000000e+00> : vector<16xf32>
    %98 = vector.multi_reduction <add>, %97, %cst_49 [1] : vector<16x64xf32> to vector<16xf32>
    %99 = vector.shape_cast %98 : vector<16xf32> to vector<16x1xf32>
    %cst_50 = arith.constant 6.400000e+01 : f32
    %100 = vector.broadcast %cst_50 : f32 to vector<16x1xf32>
    %101 = arith.divf %99, %100 : vector<16x1xf32>
    %102 = vector.broadcast %101 : vector<16x1xf32> to vector<16x64xf32>
    %103 = arith.subf %97, %102 : vector<16x64xf32>
    %104 = arith.mulf %103, %103 : vector<16x64xf32>
    %cst_51 = arith.constant dense<0.000000e+00> : vector<16xf32>
    %105 = vector.multi_reduction <add>, %104, %cst_51 [1] : vector<16x64xf32> to vector<16xf32>
    %106 = vector.shape_cast %105 : vector<16xf32> to vector<16x1xf32>
    %cst_52 = arith.constant 6.400000e+01 : f32
    %107 = vector.broadcast %cst_52 : f32 to vector<16x1xf32>
    %108 = arith.divf %106, %107 : vector<16x1xf32>
    %cst_53 = arith.constant 9.99999996E-13 : f32
    %109 = vector.broadcast %cst_53 : f32 to vector<16x1xf32>
    %110 = arith.addf %108, %109 : vector<16x1xf32>
    %111 = math.rsqrt %110 : vector<16x1xf32>
    %112 = vector.broadcast %111 : vector<16x1xf32> to vector<16x64xf32>
    %113 = arith.mulf %103, %112 : vector<16x64xf32>
    %114 = vector.broadcast %29 : vector<1x64xf32> to vector<16x64xf32>
    %115 = arith.mulf %113, %114 : vector<16x64xf32>
    %116 = vector.broadcast %30 : vector<1x64xf32> to vector<16x64xf32>
    %117 = arith.addf %115, %116 : vector<16x64xf32>
    %cst_54 = arith.constant dense<0.000000e+00> : vector<16x256xf32>
    %118 = tpu.matmul %117, %23, %cst_54 {dimension_numbers = #tpu.dot_dimension_numbers<[1], [0], [0], [1], [0, 0, 1, 1], [], []>} : vector<16x64xf32>, vector<64x256xf32>, vector<16x256xf32> -> vector<16x256xf32>
    %119 = vector.broadcast %31 : vector<1x256xf32> to vector<16x256xf32>
    %120 = arith.addf %118, %119 : vector<16x256xf32>
    %cst_55 = arith.constant 5.000000e-01 : f32
    %121 = vector.broadcast %cst_55 : f32 to vector<16x256xf32>
    %122 = arith.mulf %120, %121 : vector<16x256xf32>
    %cst_56 = arith.constant 0.707106769 : f32
    %123 = vector.broadcast %cst_56 : f32 to vector<16x256xf32>
    %124 = arith.mulf %120, %123 : vector<16x256xf32>
    %125 = math.absf %124 : vector<16x256xf32>
    %cst_57 = arith.constant 0.327591091 : f32
    %126 = vector.broadcast %cst_57 : f32 to vector<16x256xf32>
    %127 = arith.mulf %126, %125 : vector<16x256xf32>
    %cst_58 = arith.constant 1.000000e+00 : f32
    %128 = vector.broadcast %cst_58 : f32 to vector<16x256xf32>
    %129 = arith.addf %128, %127 : vector<16x256xf32>
    %cst_59 = arith.constant 1.000000e+00 : f32
    %130 = vector.broadcast %cst_59 : f32 to vector<16x256xf32>
    %131 = arith.divf %130, %129 : vector<16x256xf32>
    %cst_60 = arith.constant 1.06140542 : f32
    %132 = vector.broadcast %cst_60 : f32 to vector<16x256xf32>
    %133 = arith.mulf %132, %131 : vector<16x256xf32>
    %cst_61 = arith.constant -1.45315206 : f32
    %134 = vector.broadcast %cst_61 : f32 to vector<16x256xf32>
    %135 = arith.addf %133, %134 : vector<16x256xf32>
    %136 = arith.mulf %135, %131 : vector<16x256xf32>
    %cst_62 = arith.constant 1.42141378 : f32
    %137 = vector.broadcast %cst_62 : f32 to vector<16x256xf32>
    %138 = arith.addf %136, %137 : vector<16x256xf32>
    %139 = arith.mulf %138, %131 : vector<16x256xf32>
    %cst_63 = arith.constant -0.284496725 : f32
    %140 = vector.broadcast %cst_63 : f32 to vector<16x256xf32>
    %141 = arith.addf %139, %140 : vector<16x256xf32>
    %142 = arith.mulf %141, %131 : vector<16x256xf32>
    %cst_64 = arith.constant 0.254829586 : f32
    %143 = vector.broadcast %cst_64 : f32 to vector<16x256xf32>
    %144 = arith.addf %142, %143 : vector<16x256xf32>
    %145 = arith.mulf %144, %131 : vector<16x256xf32>
    %cst_65 = arith.constant 0.000000e+00 : f32
    %146 = vector.broadcast %cst_65 : f32 to vector<16x256xf32>
    %147 = arith.subf %146, %125 : vector<16x256xf32>
    %148 = arith.mulf %147, %125 : vector<16x256xf32>
    %149 = math.exp %148 : vector<16x256xf32>
    %150 = arith.mulf %145, %149 : vector<16x256xf32>
    %cst_66 = arith.constant 1.000000e+00 : f32
    %151 = vector.broadcast %cst_66 : f32 to vector<16x256xf32>
    %152 = arith.subf %151, %150 : vector<16x256xf32>
    %cst_67 = arith.constant 0.000000e+00 : f32
    %153 = vector.broadcast %cst_67 : f32 to vector<16x256xf32>
    %154 = arith.cmpf oge, %124, %153 : vector<16x256xf32>
    %cst_68 = arith.constant 0.000000e+00 : f32
    %155 = vector.broadcast %cst_68 : f32 to vector<16x256xf32>
    %156 = arith.subf %155, %152 : vector<16x256xf32>
    %157 = arith.select %154, %152, %156 : vector<16x256xi1>, vector<16x256xf32>
    %cst_69 = arith.constant 1.000000e+00 : f32
    %158 = vector.broadcast %cst_69 : f32 to vector<16x256xf32>
    %159 = arith.addf %158, %157 : vector<16x256xf32>
    %160 = arith.mulf %122, %159 : vector<16x256xf32>
    %cst_70 = arith.constant dense<0.000000e+00> : vector<16x64xf32>
    %161 = tpu.matmul %160, %25, %cst_70 {dimension_numbers = #tpu.dot_dimension_numbers<[1], [0], [0], [1], [0, 0, 1, 1], [], []>} : vector<16x256xf32>, vector<256x64xf32>, vector<16x64xf32> -> vector<16x64xf32>
    %162 = vector.broadcast %32 : vector<1x64xf32> to vector<16x64xf32>
    %163 = arith.addf %161, %162 : vector<16x64xf32>
    %164 = arith.addf %163, %117 : vector<16x64xf32>
    %cst_71 = arith.constant dense<0.000000e+00> : vector<16xf32>
    %165 = vector.multi_reduction <add>, %164, %cst_71 [1] : vector<16x64xf32> to vector<16xf32>
    %166 = vector.shape_cast %165 : vector<16xf32> to vector<16x1xf32>
    %cst_72 = arith.constant 6.400000e+01 : f32
    %167 = vector.broadcast %cst_72 : f32 to vector<16x1xf32>
    %168 = arith.divf %166, %167 : vector<16x1xf32>
    %169 = vector.broadcast %168 : vector<16x1xf32> to vector<16x64xf32>
    %170 = arith.subf %164, %169 : vector<16x64xf32>
    %171 = arith.mulf %170, %170 : vector<16x64xf32>
    %cst_73 = arith.constant dense<0.000000e+00> : vector<16xf32>
    %172 = vector.multi_reduction <add>, %171, %cst_73 [1] : vector<16x64xf32> to vector<16xf32>
    %173 = vector.shape_cast %172 : vector<16xf32> to vector<16x1xf32>
    %cst_74 = arith.constant 6.400000e+01 : f32
    %174 = vector.broadcast %cst_74 : f32 to vector<16x1xf32>
    %175 = arith.divf %173, %174 : vector<16x1xf32>
    %cst_75 = arith.constant 9.99999996E-13 : f32
    %176 = vector.broadcast %cst_75 : f32 to vector<16x1xf32>
    %177 = arith.addf %175, %176 : vector<16x1xf32>
    %178 = math.rsqrt %177 : vector<16x1xf32>
    %179 = vector.broadcast %178 : vector<16x1xf32> to vector<16x64xf32>
    %180 = arith.mulf %170, %179 : vector<16x64xf32>
    %181 = vector.broadcast %33 : vector<1x64xf32> to vector<16x64xf32>
    %182 = arith.mulf %180, %181 : vector<16x64xf32>
    %183 = vector.broadcast %34 : vector<1x64xf32> to vector<16x64xf32>
    %184 = arith.addf %182, %183 : vector<16x64xf32>
    %185 = vector.shape_cast %184 : vector<16x64xf32> to vector<2x8x64xf32>
    %c0_76 = arith.constant 0 : index
    %c0_77 = arith.constant 0 : index
    %c0_78 = arith.constant 0 : index
    %c0_79 = arith.constant 0 : index
    %186 = vector.load %arg9[%c0_76, %c0_77, %c0_78, %c0_79] : memref<2x2x8x64xf32, #tpu.memory_space<vmem>>, vector<1x2x8x64xf32>
    %187 = vector.shape_cast %186 : vector<1x2x8x64xf32> to vector<2x8x64xf32>
    %188 = vector.shape_cast %185 : vector<2x8x64xf32> to vector<1x2x8x64xf32>
    tpu.vector_store %arg9[%c0_76, %c0_77, %c0_78, %c0_79], %188 {strides = array<i32>} : memref<2x2x8x64xf32, #tpu.memory_space<vmem>>, vector<1x2x8x64xf32>,
    %c3 = arith.constant 3 : index
    %c0_80 = arith.constant 0 : index
    %c0_81 = arith.constant 0 : index
    %c0_82 = arith.constant 0 : index
    %189 = vector.load %arg3[%c3, %c0_80, %c0_81, %c0_82] : memref<6x2x64x32xf32, #tpu.memory_space<vmem>>, vector<1x2x64x32xf32>
    %190 = vector.shape_cast %189 : vector<1x2x64x32xf32> to vector<2x64x32xf32>
    %c4 = arith.constant 4 : index
    %c0_83 = arith.constant 0 : index
    %c0_84 = arith.constant 0 : index
    %c0_85 = arith.constant 0 : index
    %191 = vector.load %arg3[%c4, %c0_83, %c0_84, %c0_85] : memref<6x2x64x32xf32, #tpu.memory_space<vmem>>, vector<1x2x64x32xf32>
    %192 = vector.shape_cast %191 : vector<1x2x64x32xf32> to vector<2x64x32xf32>
    %c5 = arith.constant 5 : index
    %c0_86 = arith.constant 0 : index
    %c0_87 = arith.constant 0 : index
    %c0_88 = arith.constant 0 : index
    %193 = vector.load %arg3[%c5, %c0_86, %c0_87, %c0_88] : memref<6x2x64x32xf32, #tpu.memory_space<vmem>>, vector<1x2x64x32xf32>
    %194 = vector.shape_cast %193 : vector<1x2x64x32xf32> to vector<2x64x32xf32>
    %c3_89 = arith.constant 3 : index
    %c0_90 = arith.constant 0 : index
    %c0_91 = arith.constant 0 : index
    %c0_92 = arith.constant 0 : index
    %195 = vector.load %arg4[%c3_89, %c0_90, %c0_91, %c0_92] : memref<6x2x1x32xf32, #tpu.memory_space<vmem>>, vector<1x2x1x32xf32>
    %196 = vector.shape_cast %195 : vector<1x2x1x32xf32> to vector<2x1x32xf32>
    %c4_93 = arith.constant 4 : index
    %c0_94 = arith.constant 0 : index
    %c0_95 = arith.constant 0 : index
    %c0_96 = arith.constant 0 : index
    %197 = vector.load %arg4[%c4_93, %c0_94, %c0_95, %c0_96] : memref<6x2x1x32xf32, #tpu.memory_space<vmem>>, vector<1x2x1x32xf32>
    %198 = vector.shape_cast %197 : vector<1x2x1x32xf32> to vector<2x1x32xf32>
    %c5_97 = arith.constant 5 : index
    %c0_98 = arith.constant 0 : index
    %c0_99 = arith.constant 0 : index
    %c0_100 = arith.constant 0 : index
    %199 = vector.load %arg4[%c5_97, %c0_98, %c0_99, %c0_100] : memref<6x2x1x32xf32, #tpu.memory_space<vmem>>, vector<1x2x1x32xf32>
    %200 = vector.shape_cast %199 : vector<1x2x1x32xf32> to vector<2x1x32xf32>
    %c1_101 = arith.constant 1 : index
    %c0_102 = arith.constant 0 : index
    %c0_103 = arith.constant 0 : index
    %c0_104 = arith.constant 0 : index
    %201 = vector.load %arg5[%c1_101, %c0_102, %c0_103, %c0_104] : memref<2x2x32x64xf32, #tpu.memory_space<vmem>>, vector<1x2x32x64xf32>
    %202 = vector.shape_cast %201 : vector<1x2x32x64xf32> to vector<2x32x64xf32>
    %c1_105 = arith.constant 1 : index
    %c0_106 = arith.constant 0 : index
    %c0_107 = arith.constant 0 : index
    %203 = vector.load %arg6[%c1_105, %c0_106, %c0_107] : memref<2x64x256xf32, #tpu.memory_space<vmem>>, vector<1x64x256xf32>
    %204 = vector.shape_cast %203 : vector<1x64x256xf32> to vector<64x256xf32>
    %c1_108 = arith.constant 1 : index
    %c0_109 = arith.constant 0 : index
    %c0_110 = arith.constant 0 : index
    %205 = vector.load %arg7[%c1_108, %c0_109, %c0_110] : memref<2x256x64xf32, #tpu.memory_space<vmem>>, vector<1x256x64xf32>
    %206 = vector.shape_cast %205 : vector<1x256x64xf32> to vector<256x64xf32>
    %c1_111 = arith.constant 1 : index
    %c0_112 = arith.constant 0 : index
    %c0_113 = arith.constant 0 : index
    %207 = vector.load %arg8[%c1_111, %c0_112, %c0_113] : memref<2x7x256xf32, #tpu.memory_space<vmem>>, vector<1x7x256xf32>
    %208 = vector.shape_cast %207 : vector<1x7x256xf32> to vector<7x256xf32>
    %209 = vector.extract_strided_slice %208 {offsets = [0, 0], sizes = [1, 64], strides = [1, 1]} : vector<7x256xf32> to vector<1x64xf32>
    %210 = vector.extract_strided_slice %208 {offsets = [1, 0], sizes = [1, 64], strides = [1, 1]} : vector<7x256xf32> to vector<1x64xf32>
    %211 = vector.extract_strided_slice %208 {offsets = [2, 0], sizes = [1, 64], strides = [1, 1]} : vector<7x256xf32> to vector<1x64xf32>
    %212 = vector.extract_strided_slice %208 {offsets = [3, 0], sizes = [1, 256], strides = [1, 1]} : vector<7x256xf32> to vector<1x256xf32>
    %213 = vector.extract_strided_slice %208 {offsets = [4, 0], sizes = [1, 64], strides = [1, 1]} : vector<7x256xf32> to vector<1x64xf32>
    %214 = vector.extract_strided_slice %208 {offsets = [5, 0], sizes = [1, 64], strides = [1, 1]} : vector<7x256xf32> to vector<1x64xf32>
    %215 = vector.extract_strided_slice %208 {offsets = [6, 0], sizes = [1, 64], strides = [1, 1]} : vector<7x256xf32> to vector<1x64xf32>
    %216 = vector.shape_cast %184 : vector<16x64xf32> to vector<2x8x64xf32>
    %217 = vector.shape_cast %216 : vector<2x8x64xf32> to vector<2x1x8x64xf32>
    %218 = vector.shape_cast %217 : vector<2x1x8x64xf32> to vector<2x1x8x64xf32>
    %219 = vector.broadcast %218 : vector<2x1x8x64xf32> to vector<2x2x8x64xf32>
    %220 = vector.shape_cast %219 : vector<2x2x8x64xf32> to vector<4x8x64xf32>
    %221 = vector.shape_cast %190 : vector<2x64x32xf32> to vector<1x2x64x32xf32>
    %222 = vector.shape_cast %221 : vector<1x2x64x32xf32> to vector<1x2x64x32xf32>
    %223 = vector.broadcast %222 : vector<1x2x64x32xf32> to vector<2x2x64x32xf32>
    %224 = vector.shape_cast %223 : vector<2x2x64x32xf32> to vector<4x64x32xf32>
    "tpu.trace_start"() <{level = 10 : i32, message = "ash,ahd->asd"}> : () -> ()
    %cst_114 = arith.constant dense<0.000000e+00> : vector<4x8x32xf32>
    %225 = tpu.matmul %220, %224, %cst_114 {dimension_numbers = #tpu.dot_dimension_numbers<[2], [1], [1], [2], [0, 0, 0, 1, 1, 2], [0], [0]>} : vector<4x8x64xf32>, vector<4x64x32xf32>, vector<4x8x32xf32> -> vector<4x8x32xf32>
    "tpu.trace_stop"() : () -> ()
    %226 = vector.shape_cast %196 : vector<2x1x32xf32> to vector<1x2x1x32xf32>
    %227 = vector.shape_cast %226 : vector<1x2x1x32xf32> to vector<1x2x1x32xf32>
    %228 = vector.broadcast %227 : vector<1x2x1x32xf32> to vector<2x2x1x32xf32>
    %229 = vector.shape_cast %228 : vector<2x2x1x32xf32> to vector<4x1x32xf32>
    %230 = vector.broadcast %229 : vector<4x1x32xf32> to vector<4x8x32xf32>
    %231 = arith.addf %225, %230 : vector<4x8x32xf32>
    %232 = vector.shape_cast %192 : vector<2x64x32xf32> to vector<1x2x64x32xf32>
    %233 = vector.shape_cast %232 : vector<1x2x64x32xf32> to vector<1x2x64x32xf32>
    %234 = vector.broadcast %233 : vector<1x2x64x32xf32> to vector<2x2x64x32xf32>
    %235 = vector.shape_cast %234 : vector<2x2x64x32xf32> to vector<4x64x32xf32>
    "tpu.trace_start"() <{level = 10 : i32, message = "ash,ahd->asd"}> : () -> ()
    %cst_115 = arith.constant dense<0.000000e+00> : vector<4x8x32xf32>
    %236 = tpu.matmul %220, %235, %cst_115 {dimension_numbers = #tpu.dot_dimension_numbers<[2], [1], [1], [2], [0, 0, 0, 1, 1, 2], [0], [0]>} : vector<4x8x64xf32>, vector<4x64x32xf32>, vector<4x8x32xf32> -> vector<4x8x32xf32>
    "tpu.trace_stop"() : () -> ()
    %237 = vector.shape_cast %198 : vector<2x1x32xf32> to vector<1x2x1x32xf32>
    %238 = vector.shape_cast %237 : vector<1x2x1x32xf32> to vector<1x2x1x32xf32>
    %239 = vector.broadcast %238 : vector<1x2x1x32xf32> to vector<2x2x1x32xf32>
    %240 = vector.shape_cast %239 : vector<2x2x1x32xf32> to vector<4x1x32xf32>
    %241 = vector.broadcast %240 : vector<4x1x32xf32> to vector<4x8x32xf32>
    %242 = arith.addf %236, %241 : vector<4x8x32xf32>
    %243 = vector.shape_cast %194 : vector<2x64x32xf32> to vector<1x2x64x32xf32>
    %244 = vector.shape_cast %243 : vector<1x2x64x32xf32> to vector<1x2x64x32xf32>
    %245 = vector.broadcast %244 : vector<1x2x64x32xf32> to vector<2x2x64x32xf32>
    %246 = vector.shape_cast %245 : vector<2x2x64x32xf32> to vector<4x64x32xf32>
    "tpu.trace_start"() <{level = 10 : i32, message = "ash,ahd->asd"}> : () -> ()
    %cst_116 = arith.constant dense<0.000000e+00> : vector<4x8x32xf32>
    %247 = tpu.matmul %220, %246, %cst_116 {dimension_numbers = #tpu.dot_dimension_numbers<[2], [1], [1], [2], [0, 0, 0, 1, 1, 2], [0], [0]>} : vector<4x8x64xf32>, vector<4x64x32xf32>, vector<4x8x32xf32> -> vector<4x8x32xf32>
    "tpu.trace_stop"() : () -> ()
    %248 = vector.shape_cast %200 : vector<2x1x32xf32> to vector<1x2x1x32xf32>
    %249 = vector.shape_cast %248 : vector<1x2x1x32xf32> to vector<1x2x1x32xf32>
    %250 = vector.broadcast %249 : vector<1x2x1x32xf32> to vector<2x2x1x32xf32>
    %251 = vector.shape_cast %250 : vector<2x2x1x32xf32> to vector<4x1x32xf32>
    %252 = vector.broadcast %251 : vector<4x1x32xf32> to vector<4x8x32xf32>
    %253 = arith.addf %247, %252 : vector<4x8x32xf32>
    "tpu.trace_start"() <{level = 10 : i32, message = "aqd,akd->aqk"}> : () -> ()
    %cst_117 = arith.constant dense<0.000000e+00> : vector<4x8x8xf32>
    %254 = tpu.matmul %231, %242, %cst_117 {dimension_numbers = #tpu.dot_dimension_numbers<[2], [2], [1], [1], [0, 0, 0, 1, 1, 1], [0], [0]>} : vector<4x8x32xf32>, vector<4x8x32xf32>, vector<4x8x8xf32> -> vector<4x8x8xf32>
    "tpu.trace_stop"() : () -> ()
    %255 = vector.broadcast %5 : vector<4x1x8xf32> to vector<4x8x8xf32>
    %256 = arith.addf %254, %255 : vector<4x8x8xf32>
    %cst_118 = arith.constant dense<0xFF800000> : vector<4x8xf32>
    %257 = vector.multi_reduction <maximumf>, %256, %cst_118 [2] : vector<4x8x8xf32> to vector<4x8xf32>
    %258 = vector.shape_cast %257 : vector<4x8xf32> to vector<4x8x1xf32>
    %259 = vector.broadcast %258 : vector<4x8x1xf32> to vector<4x8x8xf32>
    %260 = arith.subf %256, %259 : vector<4x8x8xf32>
    %261 = math.exp %260 : vector<4x8x8xf32>
    %cst_119 = arith.constant dense<0.000000e+00> : vector<4x8xf32>
    %262 = vector.multi_reduction <add>, %261, %cst_119 [2] : vector<4x8x8xf32> to vector<4x8xf32>
    %263 = vector.shape_cast %262 : vector<4x8xf32> to vector<4x8x1xf32>
    %264 = tpu.reciprocal %263 {approx = true} : vector<4x8x1xf32> -> vector<4x8x1xf32>
    %265 = vector.broadcast %264 : vector<4x8x1xf32> to vector<4x8x8xf32>
    %266 = arith.mulf %261, %265 : vector<4x8x8xf32>
    "tpu.trace_start"() <{level = 10 : i32, message = "aqk,akd->aqd"}> : () -> ()
    %cst_120 = arith.constant dense<0.000000e+00> : vector<4x8x32xf32>
    %267 = tpu.matmul %266, %253, %cst_120 {dimension_numbers = #tpu.dot_dimension_numbers<[2], [1], [1], [2], [0, 0, 0, 1, 1, 2], [0], [0]>} : vector<4x8x8xf32>, vector<4x8x32xf32>, vector<4x8x32xf32> -> vector<4x8x32xf32>
    "tpu.trace_stop"() : () -> ()
    %268 = vector.shape_cast %202 : vector<2x32x64xf32> to vector<1x2x32x64xf32>
    %269 = vector.shape_cast %268 : vector<1x2x32x64xf32> to vector<1x2x32x64xf32>
    %270 = vector.broadcast %269 : vector<1x2x32x64xf32> to vector<2x2x32x64xf32>
    %271 = vector.shape_cast %270 : vector<2x2x32x64xf32> to vector<4x32x64xf32>
    "tpu.trace_start"() <{level = 10 : i32, message = "asd,adh->ash"}> : () -> ()
    %cst_121 = arith.constant dense<0.000000e+00> : vector<4x8x64xf32>
    %272 = tpu.matmul %267, %271, %cst_121 {dimension_numbers = #tpu.dot_dimension_numbers<[2], [1], [1], [2], [0, 0, 0, 1, 1, 2], [0], [0]>} : vector<4x8x32xf32>, vector<4x32x64xf32>, vector<4x8x64xf32> -> vector<4x8x64xf32>
    "tpu.trace_stop"() : () -> ()
    %273 = vector.shape_cast %272 : vector<4x8x64xf32> to vector<2x2x8x64xf32>
    %cst_122 = arith.constant dense<0.000000e+00> : vector<2x8x64xf32>
    %274 = vector.multi_reduction <add>, %273, %cst_122 [1] : vector<2x2x8x64xf32> to vector<2x8x64xf32>
    %275 = vector.shape_cast %274 : vector<2x8x64xf32> to vector<16x64xf32>
    %276 = vector.broadcast %209 : vector<1x64xf32> to vector<16x64xf32>
    %277 = arith.addf %275, %276 : vector<16x64xf32>
    %278 = arith.addf %277, %184 : vector<16x64xf32>
    %cst_123 = arith.constant dense<0.000000e+00> : vector<16xf32>
    %279 = vector.multi_reduction <add>, %278, %cst_123 [1] : vector<16x64xf32> to vector<16xf32>
    %280 = vector.shape_cast %279 : vector<16xf32> to vector<16x1xf32>
    %cst_124 = arith.constant 6.400000e+01 : f32
    %281 = vector.broadcast %cst_124 : f32 to vector<16x1xf32>
    %282 = arith.divf %280, %281 : vector<16x1xf32>
    %283 = vector.broadcast %282 : vector<16x1xf32> to vector<16x64xf32>
    %284 = arith.subf %278, %283 : vector<16x64xf32>
    %285 = arith.mulf %284, %284 : vector<16x64xf32>
    %cst_125 = arith.constant dense<0.000000e+00> : vector<16xf32>
    %286 = vector.multi_reduction <add>, %285, %cst_125 [1] : vector<16x64xf32> to vector<16xf32>
    %287 = vector.shape_cast %286 : vector<16xf32> to vector<16x1xf32>
    %cst_126 = arith.constant 6.400000e+01 : f32
    %288 = vector.broadcast %cst_126 : f32 to vector<16x1xf32>
    %289 = arith.divf %287, %288 : vector<16x1xf32>
    %cst_127 = arith.constant 9.99999996E-13 : f32
    %290 = vector.broadcast %cst_127 : f32 to vector<16x1xf32>
    %291 = arith.addf %289, %290 : vector<16x1xf32>
    %292 = math.rsqrt %291 : vector<16x1xf32>
    %293 = vector.broadcast %292 : vector<16x1xf32> to vector<16x64xf32>
    %294 = arith.mulf %284, %293 : vector<16x64xf32>
    %295 = vector.broadcast %210 : vector<1x64xf32> to vector<16x64xf32>
    %296 = arith.mulf %294, %295 : vector<16x64xf32>
    %297 = vector.broadcast %211 : vector<1x64xf32> to vector<16x64xf32>
    %298 = arith.addf %296, %297 : vector<16x64xf32>
    %cst_128 = arith.constant dense<0.000000e+00> : vector<16x256xf32>
    %299 = tpu.matmul %298, %204, %cst_128 {dimension_numbers = #tpu.dot_dimension_numbers<[1], [0], [0], [1], [0, 0, 1, 1], [], []>} : vector<16x64xf32>, vector<64x256xf32>, vector<16x256xf32> -> vector<16x256xf32>
    %300 = vector.broadcast %212 : vector<1x256xf32> to vector<16x256xf32>
    %301 = arith.addf %299, %300 : vector<16x256xf32>
    %cst_129 = arith.constant 5.000000e-01 : f32
    %302 = vector.broadcast %cst_129 : f32 to vector<16x256xf32>
    %303 = arith.mulf %301, %302 : vector<16x256xf32>
    %cst_130 = arith.constant 0.707106769 : f32
    %304 = vector.broadcast %cst_130 : f32 to vector<16x256xf32>
    %305 = arith.mulf %301, %304 : vector<16x256xf32>
    %306 = math.absf %305 : vector<16x256xf32>
    %cst_131 = arith.constant 0.327591091 : f32
    %307 = vector.broadcast %cst_131 : f32 to vector<16x256xf32>
    %308 = arith.mulf %307, %306 : vector<16x256xf32>
    %cst_132 = arith.constant 1.000000e+00 : f32
    %309 = vector.broadcast %cst_132 : f32 to vector<16x256xf32>
    %310 = arith.addf %309, %308 : vector<16x256xf32>
    %cst_133 = arith.constant 1.000000e+00 : f32
    %311 = vector.broadcast %cst_133 : f32 to vector<16x256xf32>
    %312 = arith.divf %311, %310 : vector<16x256xf32>
    %cst_134 = arith.constant 1.06140542 : f32
    %313 = vector.broadcast %cst_134 : f32 to vector<16x256xf32>
    %314 = arith.mulf %313, %312 : vector<16x256xf32>
    %cst_135 = arith.constant -1.45315206 : f32
    %315 = vector.broadcast %cst_135 : f32 to vector<16x256xf32>
    %316 = arith.addf %314, %315 : vector<16x256xf32>
    %317 = arith.mulf %316, %312 : vector<16x256xf32>
    %cst_136 = arith.constant 1.42141378 : f32
    %318 = vector.broadcast %cst_136 : f32 to vector<16x256xf32>
    %319 = arith.addf %317, %318 : vector<16x256xf32>
    %320 = arith.mulf %319, %312 : vector<16x256xf32>
    %cst_137 = arith.constant -0.284496725 : f32
    %321 = vector.broadcast %cst_137 : f32 to vector<16x256xf32>
    %322 = arith.addf %320, %321 : vector<16x256xf32>
    %323 = arith.mulf %322, %312 : vector<16x256xf32>
    %cst_138 = arith.constant 0.254829586 : f32
    %324 = vector.broadcast %cst_138 : f32 to vector<16x256xf32>
    %325 = arith.addf %323, %324 : vector<16x256xf32>
    %326 = arith.mulf %325, %312 : vector<16x256xf32>
    %cst_139 = arith.constant 0.000000e+00 : f32
    %327 = vector.broadcast %cst_139 : f32 to vector<16x256xf32>
    %328 = arith.subf %327, %306 : vector<16x256xf32>
    %329 = arith.mulf %328, %306 : vector<16x256xf32>
    %330 = math.exp %329 : vector<16x256xf32>
    %331 = arith.mulf %326, %330 : vector<16x256xf32>
    %cst_140 = arith.constant 1.000000e+00 : f32
    %332 = vector.broadcast %cst_140 : f32 to vector<16x256xf32>
    %333 = arith.subf %332, %331 : vector<16x256xf32>
    %cst_141 = arith.constant 0.000000e+00 : f32
    %334 = vector.broadcast %cst_141 : f32 to vector<16x256xf32>
    %335 = arith.cmpf oge, %305, %334 : vector<16x256xf32>
    %cst_142 = arith.constant 0.000000e+00 : f32
    %336 = vector.broadcast %cst_142 : f32 to vector<16x256xf32>
    %337 = arith.subf %336, %333 : vector<16x256xf32>
    %338 = arith.select %335, %333, %337 : vector<16x256xi1>, vector<16x256xf32>
    %cst_143 = arith.constant 1.000000e+00 : f32
    %339 = vector.broadcast %cst_143 : f32 to vector<16x256xf32>
    %340 = arith.addf %339, %338 : vector<16x256xf32>
    %341 = arith.mulf %303, %340 : vector<16x256xf32>
    %cst_144 = arith.constant dense<0.000000e+00> : vector<16x64xf32>
    %342 = tpu.matmul %341, %206, %cst_144 {dimension_numbers = #tpu.dot_dimension_numbers<[1], [0], [0], [1], [0, 0, 1, 1], [], []>} : vector<16x256xf32>, vector<256x64xf32>, vector<16x64xf32> -> vector<16x64xf32>
    %343 = vector.broadcast %213 : vector<1x64xf32> to vector<16x64xf32>
    %344 = arith.addf %342, %343 : vector<16x64xf32>
    %345 = arith.addf %344, %298 : vector<16x64xf32>
    %cst_145 = arith.constant dense<0.000000e+00> : vector<16xf32>
    %346 = vector.multi_reduction <add>, %345, %cst_145 [1] : vector<16x64xf32> to vector<16xf32>
    %347 = vector.shape_cast %346 : vector<16xf32> to vector<16x1xf32>
    %cst_146 = arith.constant 6.400000e+01 : f32
    %348 = vector.broadcast %cst_146 : f32 to vector<16x1xf32>
    %349 = arith.divf %347, %348 : vector<16x1xf32>
    %350 = vector.broadcast %349 : vector<16x1xf32> to vector<16x64xf32>
    %351 = arith.subf %345, %350 : vector<16x64xf32>
    %352 = arith.mulf %351, %351 : vector<16x64xf32>
    %cst_147 = arith.constant dense<0.000000e+00> : vector<16xf32>
    %353 = vector.multi_reduction <add>, %352, %cst_147 [1] : vector<16x64xf32> to vector<16xf32>
    %354 = vector.shape_cast %353 : vector<16xf32> to vector<16x1xf32>
    %cst_148 = arith.constant 6.400000e+01 : f32
    %355 = vector.broadcast %cst_148 : f32 to vector<16x1xf32>
    %356 = arith.divf %354, %355 : vector<16x1xf32>
    %cst_149 = arith.constant 9.99999996E-13 : f32
    %357 = vector.broadcast %cst_149 : f32 to vector<16x1xf32>
    %358 = arith.addf %356, %357 : vector<16x1xf32>
    %359 = math.rsqrt %358 : vector<16x1xf32>
    %360 = vector.broadcast %359 : vector<16x1xf32> to vector<16x64xf32>
    %361 = arith.mulf %351, %360 : vector<16x64xf32>
    %362 = vector.broadcast %214 : vector<1x64xf32> to vector<16x64xf32>
    %363 = arith.mulf %361, %362 : vector<16x64xf32>
    %364 = vector.broadcast %215 : vector<1x64xf32> to vector<16x64xf32>
    %365 = arith.addf %363, %364 : vector<16x64xf32>
    %366 = vector.shape_cast %365 : vector<16x64xf32> to vector<2x8x64xf32>
    %c1_150 = arith.constant 1 : index
    %c0_151 = arith.constant 0 : index
    %c0_152 = arith.constant 0 : index
    %c0_153 = arith.constant 0 : index
    %367 = vector.load %arg9[%c1_150, %c0_151, %c0_152, %c0_153] : memref<2x2x8x64xf32, #tpu.memory_space<vmem>>, vector<1x2x8x64xf32>
    %368 = vector.shape_cast %367 : vector<1x2x8x64xf32> to vector<2x8x64xf32>
    %369 = vector.shape_cast %366 : vector<2x8x64xf32> to vector<1x2x8x64xf32>
    tpu.vector_store %arg9[%c1_150, %c0_151, %c0_152, %c0_153], %369 {strides = array<i32>} : memref<2x2x8x64xf32, #tpu.memory_space<vmem>>, vector<1x2x8x64xf32>,
    return
  }
  func.func @transform_0(%arg0: i32) -> (i32, i32, i32) {
    %c0_i32 = arith.constant 0 : i32
    %c0_i32_0 = arith.constant 0 : i32
    %c0_i32_1 = arith.constant 0 : i32
    return %arg0, %c0_i32, %c0_i32_0 : i32, i32, i32
  }
  func.func @transform_1(%arg0: i32) -> (i32, i32, i32, i32) {
    %c0_i32 = arith.constant 0 : i32
    %c0_i32_0 = arith.constant 0 : i32
    %c0_i32_1 = arith.constant 0 : i32
    %c0_i32_2 = arith.constant 0 : i32
    return %arg0, %c0_i32, %c0_i32_0, %c0_i32_1 : i32, i32, i32, i32
  }
  func.func @transform_2(%arg0: i32) -> (i32, i32, i32, i32) {
    %c0_i32 = arith.constant 0 : i32
    %c0_i32_0 = arith.constant 0 : i32
    %c0_i32_1 = arith.constant 0 : i32
    %c0_i32_2 = arith.constant 0 : i32
    %c0_i32_3 = arith.constant 0 : i32
    return %c0_i32, %c0_i32_0, %c0_i32_1, %c0_i32_2 : i32, i32, i32, i32
  }
  func.func @transform_3(%arg0: i32) -> (i32, i32, i32, i32) {
    %c0_i32 = arith.constant 0 : i32
    %c0_i32_0 = arith.constant 0 : i32
    %c0_i32_1 = arith.constant 0 : i32
    %c0_i32_2 = arith.constant 0 : i32
    %c0_i32_3 = arith.constant 0 : i32
    return %c0_i32, %c0_i32_0, %c0_i32_1, %c0_i32_2 : i32, i32, i32, i32
  }
  func.func @transform_4(%arg0: i32) -> (i32, i32, i32, i32) {
    %c0_i32 = arith.constant 0 : i32
    %c0_i32_0 = arith.constant 0 : i32
    %c0_i32_1 = arith.constant 0 : i32
    %c0_i32_2 = arith.constant 0 : i32
    %c0_i32_3 = arith.constant 0 : i32
    return %c0_i32, %c0_i32_0, %c0_i32_1, %c0_i32_2 : i32, i32, i32, i32
  }
  func.func @transform_5(%arg0: i32) -> (i32, i32, i32) {
    %c0_i32 = arith.constant 0 : i32
    %c0_i32_0 = arith.constant 0 : i32
    %c0_i32_1 = arith.constant 0 : i32
    %c0_i32_2 = arith.constant 0 : i32
    return %c0_i32, %c0_i32_0, %c0_i32_1 : i32, i32, i32
  }
  func.func @transform_6(%arg0: i32) -> (i32, i32, i32) {
    %c0_i32 = arith.constant 0 : i32
    %c0_i32_0 = arith.constant 0 : i32
    %c0_i32_1 = arith.constant 0 : i32
    %c0_i32_2 = arith.constant 0 : i32
    return %c0_i32, %c0_i32_0, %c0_i32_1 : i32, i32, i32
  }
  func.func @transform_7(%arg0: i32) -> (i32, i32, i32) {
    %c0_i32 = arith.constant 0 : i32
    %c0_i32_0 = arith.constant 0 : i32
    %c0_i32_1 = arith.constant 0 : i32
    %c0_i32_2 = arith.constant 0 : i32
    return %c0_i32, %c0_i32_0, %c0_i32_1 : i32, i32, i32
  }
  func.func @transform_8(%arg0: i32) -> (i32, i32, i32, i32) {
    %c0_i32 = arith.constant 0 : i32
    %c0_i32_0 = arith.constant 0 : i32
    %c0_i32_1 = arith.constant 0 : i32
    %c0_i32_2 = arith.constant 0 : i32
    return %c0_i32, %arg0, %c0_i32_0, %c0_i32_1 : i32, i32, i32, i32
  }
}

</mosaic_0001>

<bundles_post_ra>
// kernel: tpu_custom_call.1
= control target key start
LH: loop header
LB: loop body
LE: loop exit
PB: predicated region body
PF: predicated region fallthrough
CT: control target
= control target key end

     0   :  { %v5996_v2 = vmov 0.0   ;;  %s7375_s0 = inlined_call_operand.vmem [shape: f32[2,8,64], index: 0, kind: input, shape index: {}]   ;;  %s7376_s1 = inlined_call_operand.vmem [shape: f32[2,1,1,8], index: 1, kind: input, shape index: {}]   ;;  %s7377_s2 = inlined_call_operand.vmem [shape: f32[6,2,64,32], index: 2, kind: input, shape index: {}]   ;;  %s7378_s3 = inlined_call_operand.vmem [shape: f32[6,2,1,32], index: 3, kind: input, shape index: {}]   ;;  %s7379_s4 = inlined_call_operand.vmem [shape: f32[2,2,32,64], index: 4, kind: input, shape index: {}]   ;;  %s7380_s5 = inlined_call_operand.vmem [shape: f32[2,64,256], index: 5, kind: input, shape index: {}]   ;;  %s7381_s6 = inlined_call_operand.vmem [shape: f32[2,256,64], index: 6, kind: input, shape index: {}]   ;;  %s7382_s7 = inlined_call_operand.vmem [shape: f32[2,7,256], index: 7, kind: input, shape index: {}]   ;;  %s7383_s8 = inlined_call_operand.hbm [shape: f32[2,2,8,64], index: 8, kind: output, shape index: {}]  }
   0x1   :  { %v41_v0 = vld [vmem:[%s7377_s2 + $0x38] sm:$0xff]  ;;  %5263 = vmatprep.subr.mxu0 %v5996_v2  ;;  %5282 = vmatprep.subr.mxu1 %v5996_v2  ;;  %v40_v3 = vld [vmem:[%s7377_s2 + $0x30] sm:$0xff]  ;;  %v39_v5 = vld [vmem:[%s7377_s2 + $0x28] sm:$0xff] }
   0x2   :  { %v49_v1 = vld [vmem:[%s7377_s2 + $0x78] sm:$0xff]  ;;  %v48_v4 = vld [vmem:[%s7377_s2 + $0x70] sm:$0xff]  ;;  %5264 = vmatpush3.msra.mxu0 %v41_v0  ;;  %v47_v6 = vld [vmem:[%s7377_s2 + $0x68] sm:$0xff] }
   0x3   :  { %5283 = vmatpush3.msra.mxu1 %v49_v1  ;;  %5265 = vmatprep.subr.mxu0 %v5996_v2  ;;  %v38_v7 = vld [vmem:[%s7377_s2 + $0x20] sm:$0xff]  ;;  %v37_v9 = vld [vmem:[%s7377_s2 + $0x18] sm:$0xff]  ;;  %v36_v11 = vld [vmem:[%s7377_s2 + $0x10] sm:$0xff] }
   0x4   :  { %5284 = vmatprep.subr.mxu1 %v5996_v2  ;;  %5266 = vmatpush3.msra.mxu0 %v40_v3  ;;  %v46_v8 = vld [vmem:[%s7377_s2 + $0x60] sm:$0xff]  ;;  %v45_v10 = vld [vmem:[%s7377_s2 + $0x58] sm:$0xff]  ;;  %v44_v12 = vld [vmem:[%s7377_s2 + $0x50] sm:$0xff] }
   0x5   :  { %5285 = vmatpush3.msra.mxu1 %v48_v4  ;;  %5267 = vmatprep.subr.mxu0 %v5996_v2  ;;  %v35_v13 = vld [vmem:[%s7377_s2 + $0x8] sm:$0xff] }
   0x6   :  { %5286 = vmatprep.subr.mxu1 %v5996_v2  ;;  %5268 = vmatpush3.msra.mxu0 %v39_v5  ;;  %v43_v14 = vld [vmem:[%s7377_s2 + $0x48] sm:$0xff] }
   0x7   :  { %5287 = vmatpush3.msra.mxu1 %v47_v6  ;;  %5269 = vmatprep.subr.mxu0 %v5996_v2 }
   0x8   :  { %5288 = vmatprep.subr.mxu1 %v5996_v2  ;;  %5270 = vmatpush3.msra.mxu0 %v38_v7 }
   0x9   :  { %5289 = vmatpush3.msra.mxu1 %v46_v8  ;;  %5271 = vmatprep.subr.mxu0 %v5996_v2 }
   0xa   :  { %5290 = vmatprep.subr.mxu1 %v5996_v2  ;;  %5272 = vmatpush3.msra.mxu0 %v37_v9 }
   0xb   :  { %5291 = vmatpush3.msra.mxu1 %v45_v10  ;;  %5273 = vmatprep.subr.mxu0 %v5996_v2 }
   0xc   :  { %5292 = vmatprep.subr.mxu1 %v5996_v2 }
   0xd   :  { %13 = vsyncpa [#allocation3], 0  ;;  %5274 = vmatpush3.msra.mxu0 %v36_v11  ;;  %5293 = vmatpush3.msra.mxu1 %v44_v12  ;;  %v34_v15 = vld [vmem:[%s7377_s2] sm:$0xff]  ;;  %vm162_vm0 = vcmask 523264   ;;  %vm5997_vm1 = vmmov 0   ;;  %v6140_v18 = vld [vmem:[%s7375_s0 + $0x8] sm:$0xff] }
   0xe   :  { %5275 = vmatprep.subr.mxu0 %v5996_v2  ;;  %5294 = vmatprep.subr.mxu1 %v5996_v2  ;;  %v42_v16 = vld [vmem:[%s7377_s2 + $0x40] sm:$0xff]  ;;  %v4684_v19 = vld [vmem:[%s7377_s2 + $0xb8] sm:$0xff]  ;;  %v4683_v21 = vld [vmem:[%s7377_s2 + $0xb0] sm:$0xff]  ;;  %vm1045_vm2 = vcmask 261120   ;;  %vm1350_vm3 = vcmask 64512  }
   0xf   :  { %5276 = vmatpush3.msra.mxu0 %v35_v13  ;;  %5295 = vmatpush3.msra.mxu1 %v43_v14  ;;  %v6111_v17 = vld [vmem:[%s7375_s0] sm:$0xff]  ;;  %v4692_v20 = vld [vmem:[%s7377_s2 + $0xf8] sm:$0xff]  ;;  %v4691_v22 = vld [vmem:[%s7377_s2 + $0xf0] sm:$0xff] }
  0x10   :  { %5277 = vmatprep.subr.mxu0 %v5996_v2  ;;  %5296 = vmatprep.subr.mxu1 %v5996_v2  ;;  %v4682_v23 = vld [vmem:[%s7377_s2 + $0xa8] sm:$0xff]  ;;  %v4681_v25 = vld [vmem:[%s7377_s2 + $0xa0] sm:$0xff]  ;;  %v4680_v27 = vld [vmem:[%s7377_s2 + $0x98] sm:$0xff] }
  0x11   :  { %5278 = vmatpush3.msra.mxu0 %v34_v15  ;;  %5279 = vmatprep.mubr.msk.f32.mxu0 %vm5997_vm1, %v5996_v2  ;;  %v4690_v24 = vld [vmem:[%s7377_s2 + $0xe8] sm:$0xff]  ;;  %v4689_v26 = vld [vmem:[%s7377_s2 + $0xe0] sm:$0xff]  ;;  %v4688_v28 = vld [vmem:[%s7377_s2 + $0xd8] sm:$0xff] }
  0x12   :  { %5297 = vmatpush3.msra.mxu1 %v42_v16  ;;  %5280 = vmatmul.mubr.msk.f32.vlgmr.msra.gmra.mxu0 %vm162_vm0, %v6111_v17  ;;  %v4679_v29 = vld [vmem:[%s7377_s2 + $0x90] sm:$0xff]  ;;  %v4678_v31 = vld [vmem:[%s7377_s2 + $0x88] sm:$0xff]  ;;  %v4677_v33 = vld [vmem:[%s7377_s2 + $0x80] sm:$0xff] }
  0x13   :  { %5298 = vmatprep.mubr.msk.f32.mxu1 %vm5997_vm1, %v5996_v2  ;;  %5301 = vmatprep.subr.mxu0 %v5996_v2  ;;  %v4687_v30 = vld [vmem:[%s7377_s2 + $0xd0] sm:$0xff]  ;;  %v4686_v32 = vld [vmem:[%s7377_s2 + $0xc8] sm:$0xff]  ;;  %v4685_v34 = vld [vmem:[%s7377_s2 + $0xc0] sm:$0xff] }
  0x14   :  { %5320 = vmatprep.subr.mxu1 %v5996_v2  ;;  %5299 = vmatmul.mubr.msk.f32.vlgmr.msra.gmra.mxu1 %vm162_vm0, %v6111_v17  ;;  %v4700_v35 = vld [vmem:[%s7377_s2 + $0x138] sm:$0xff]  ;;  %v4699_v36 = vld [vmem:[%s7377_s2 + $0x130] sm:$0xff]  ;;  %v4698_v38 = vld [vmem:[%s7377_s2 + $0x128] sm:$0xff] }
  0x15   :  { %5302 = vmatpush3.msra.mxu0 %v41_v0  ;;  %5321 = vmatpush3.msra.mxu1 %v49_v1  ;;  %v4708_v37 = vld [vmem:[%s7377_s2 + $0x178] sm:$0xff]  ;;  %v4707_v39 = vld [vmem:[%s7377_s2 + $0x170] sm:$0xff]  ;;  %v4706_v40 = vld [vmem:[%s7377_s2 + $0x168] sm:$0xff] }
  0x16   :  { %5303 = vmatprep.subr.mxu0 %v5996_v2  ;;  %5322 = vmatprep.subr.mxu1 %v5996_v2  ;;  %v4697_v41 = vld [vmem:[%s7377_s2 + $0x120] sm:$0xff]  ;;  %v4696_v43 = vld [vmem:[%s7377_s2 + $0x118] sm:$0xff]  ;;  %v4695_v45 = vld [vmem:[%s7377_s2 + $0x110] sm:$0xff] }
  0x17   :  { %5304 = vmatpush3.msra.mxu0 %v40_v3  ;;  %5323 = vmatpush3.msra.mxu1 %v48_v4  ;;  %v4705_v42 = vld [vmem:[%s7377_s2 + $0x160] sm:$0xff]  ;;  %v4704_v44 = vld [vmem:[%s7377_s2 + $0x158] sm:$0xff]  ;;  %v4703_v46 = vld [vmem:[%s7377_s2 + $0x150] sm:$0xff] }
  0x18   :  { %5305 = vmatprep.subr.mxu0 %v5996_v2  ;;  %5324 = vmatprep.subr.mxu1 %v5996_v2  ;;  %v4694_v47 = vld [vmem:[%s7377_s2 + $0x108] sm:$0xff]  ;;  %v4693_v49 = vld [vmem:[%s7377_s2 + $0x100] sm:$0xff] }
  0x19   :  { %5306 = vmatpush3.msra.mxu0 %v39_v5  ;;  %5325 = vmatpush3.msra.mxu1 %v47_v6  ;;  %v4702_v48 = vld [vmem:[%s7377_s2 + $0x148] sm:$0xff]  ;;  %v4701_v50 = vld [vmem:[%s7377_s2 + $0x140] sm:$0xff] }
  0x1a   :  { %5307 = vmatprep.subr.mxu0 %v5996_v2  ;;  %5326 = vmatprep.subr.mxu1 %v5996_v2  ;;  %v4719_v59 = vld [vmem:[%s7378_s3 + $0x2] ss:$0 sm:$0xff]  ;;  %v4720_v60 = vld [vmem:[%s7378_s3 + $0x3] ss:$0 sm:$0xff]  ;;  %v4713_v63 = vld [vmem:[%s7378_s3] ss:$0 sm:$0xff] }
  0x1b   :  { %5308 = vmatpush3.msra.mxu0 %v38_v7  ;;  %5327 = vmatpush3.msra.mxu1 %v46_v8  ;;  %v4714_v0 = vld [vmem:[%s7378_s3 + $0x1] ss:$0 sm:$0xff] }
  0x1c   :  { %5309 = vmatprep.subr.mxu0 %v5996_v2  ;;  %5328 = vmatprep.subr.mxu1 %v5996_v2 }
  0x1d   :  { %5310 = vmatpush3.msra.mxu0 %v37_v9  ;;  %5329 = vmatpush3.msra.mxu1 %v45_v10 }
  0x1e   :  { %5311 = vmatprep.subr.mxu0 %v5996_v2  ;;  %5330 = vmatprep.subr.mxu1 %v5996_v2 }
  0x1f   :  { %5312 = vmatpush3.msra.mxu0 %v36_v11  ;;  %5331 = vmatpush3.msra.mxu1 %v44_v12 }
  0x20   :  { %5313 = vmatprep.subr.mxu0 %v5996_v2  ;;  %5332 = vmatprep.subr.mxu1 %v5996_v2 }
  0x21   :  { %5314 = vmatpush3.msra.mxu0 %v35_v13  ;;  %5333 = vmatpush3.msra.mxu1 %v43_v14 }
  0x22   :  { %5315 = vmatprep.subr.mxu0 %v5996_v2  ;;  %5334 = vmatprep.subr.mxu1 %v5996_v2 }
  0x23   :  { %5316 = vmatpush3.msra.mxu0 %v34_v15  ;;  %5317 = vmatprep.mubr.msk.f32.mxu0 %vm5997_vm1, %v5996_v2 }
  0x24   :  { %5335 = vmatpush3.msra.mxu1 %v42_v16  ;;  %5318 = vmatmul.mubr.msk.f32.vlgmr.msra.gmra.mxu0 %vm162_vm0, %v6140_v18  ;;  %v4725_v16 = vld [vmem:[%s7378_s3 + $0x4] ss:$0 sm:$0xff] }
  0x25   :  { %5336 = vmatprep.mubr.msk.f32.mxu1 %vm5997_vm1, %v5996_v2  ;;  %5339 = vmatprep.subr.mxu0 %v5996_v2 }
  0x26   :  { %5358 = vmatprep.subr.mxu1 %v5996_v2  ;;  %5337 = vmatmul.mubr.msk.f32.vlgmr.msra.gmra.mxu1 %vm162_vm0, %v6140_v18 }
  0x27   :  { %5340 = vmatpush3.msra.mxu0 %v4684_v19  ;;  %5359 = vmatpush3.msra.mxu1 %v4692_v20 }
  0x28   :  { %5341 = vmatprep.subr.mxu0 %v5996_v2  ;;  %5360 = vmatprep.subr.mxu1 %v5996_v2 }
  0x29   :  { %5342 = vmatpush3.msra.mxu0 %v4683_v21  ;;  %5361 = vmatpush3.msra.mxu1 %v4691_v22 }
  0x2a   :  { %5343 = vmatprep.subr.mxu0 %v5996_v2  ;;  %5362 = vmatprep.subr.mxu1 %v5996_v2 }
  0x2b   :  { %5344 = vmatpush3.msra.mxu0 %v4682_v23  ;;  %5363 = vmatpush3.msra.mxu1 %v4690_v24 }
  0x2c   :  { %5345 = vmatprep.subr.mxu0 %v5996_v2  ;;  %5364 = vmatprep.subr.mxu1 %v5996_v2 }
  0x2d   :  { %5346 = vmatpush3.msra.mxu0 %v4681_v25  ;;  %5365 = vmatpush3.msra.mxu1 %v4689_v26 }
  0x2e   :  { %5347 = vmatprep.subr.mxu0 %v5996_v2  ;;  %5366 = vmatprep.subr.mxu1 %v5996_v2 }
  0x2f   :  { %5348 = vmatpush3.msra.mxu0 %v4680_v27  ;;  %5367 = vmatpush3.msra.mxu1 %v4688_v28 }
  0x30   :  { %5349 = vmatprep.subr.mxu0 %v5996_v2  ;;  %5368 = vmatprep.subr.mxu1 %v5996_v2 }
  0x31   :  { %5350 = vmatpush3.msra.mxu0 %v4679_v29  ;;  %5369 = vmatpush3.msra.mxu1 %v4687_v30 }
  0x32   :  { %5351 = vmatprep.subr.mxu0 %v5996_v2  ;;  %5370 = vmatprep.subr.mxu1 %v5996_v2 }
  0x33   :  { %5352 = vmatpush3.msra.mxu0 %v4678_v31  ;;  %5371 = vmatpush3.msra.mxu1 %v4686_v32 }
  0x34   :  { %5353 = vmatprep.subr.mxu0 %v5996_v2  ;;  %5372 = vmatprep.subr.mxu1 %v5996_v2 }
  0x35   :  { %5354 = vmatpush3.msra.mxu0 %v4677_v33  ;;  %5355 = vmatprep.mubr.msk.f32.mxu0 %vm5997_vm1, %v5996_v2 }
  0x36   :  { %5373 = vmatpush3.msra.mxu1 %v4685_v34  ;;  %5374 = vmatprep.mubr.msk.f32.mxu1 %vm5997_vm1, %v5996_v2 }
  0x37   :  { %5356 = vmatmul.mubr.msk.f32.vlgmr.msra.gmra.mxu0 %vm162_vm0, %v6111_v17  ;;  %5375 = vmatmul.mubr.msk.f32.vlgmr.msra.gmra.mxu1 %vm162_vm0, %v6111_v17 }
  0x38   :  { %5377 = vmatprep.subr.mxu0 %v5996_v2  ;;  %5396 = vmatprep.subr.mxu1 %v5996_v2 }
  0x39   :  { %5378 = vmatpush3.msra.mxu0 %v4684_v19  ;;  %5397 = vmatpush3.msra.mxu1 %v4692_v20 }
  0x3a   :  { %5379 = vmatprep.subr.mxu0 %v5996_v2  ;;  %5398 = vmatprep.subr.mxu1 %v5996_v2 }
  0x3b   :  { %5380 = vmatpush3.msra.mxu0 %v4683_v21  ;;  %5399 = vmatpush3.msra.mxu1 %v4691_v22  ;;  %v4726_v22 = vld [vmem:[%s7378_s3 + $0x5] ss:$0 sm:$0xff] }
  0x3c   :  { %5381 = vmatprep.subr.mxu0 %v5996_v2  ;;  %5400 = vmatprep.subr.mxu1 %v5996_v2 }
  0x3d   :  { %5382 = vmatpush3.msra.mxu0 %v4682_v23  ;;  %5401 = vmatpush3.msra.mxu1 %v4690_v24 }
  0x3e   :  { %5383 = vmatprep.subr.mxu0 %v5996_v2  ;;  %5402 = vmatprep.subr.mxu1 %v5996_v2 }
  0x3f   :  { %5384 = vmatpush3.msra.mxu0 %v4681_v25  ;;  %5403 = vmatpush3.msra.mxu1 %v4689_v26 }
  0x40   :  { %5385 = vmatprep.subr.mxu0 %v5996_v2  ;;  %5404 = vmatprep.subr.mxu1 %v5996_v2 }
  0x41   :  { %5386 = vmatpush3.msra.mxu0 %v4680_v27  ;;  %5405 = vmatpush3.msra.mxu1 %v4688_v28 }
  0x42   :  { %5387 = vmatprep.subr.mxu0 %v5996_v2  ;;  %5406 = vmatprep.subr.mxu1 %v5996_v2 }
  0x43   :  { %5388 = vmatpush3.msra.mxu0 %v4679_v29  ;;  %5407 = vmatpush3.msra.mxu1 %v4687_v30 }
  0x44   :  { %5389 = vmatprep.subr.mxu0 %v5996_v2  ;;  %5408 = vmatprep.subr.mxu1 %v5996_v2 }
  0x45   :  { %5390 = vmatpush3.msra.mxu0 %v4678_v31  ;;  %5409 = vmatpush3.msra.mxu1 %v4686_v32  ;;  %v4731_v32 = vld [vmem:[%s7376_s1] ss:$0 sm:$0xff] }
  0x46   :  { %5391 = vmatprep.subr.mxu0 %v5996_v2  ;;  %5410 = vmatprep.subr.mxu1 %v5996_v2 }
  0x47   :  { %5392 = vmatpush3.msra.mxu0 %v4677_v33  ;;  %5393 = vmatprep.mubr.msk.f32.mxu0 %vm5997_vm1, %v5996_v2 }
  0x48   :  { %5411 = vmatpush3.msra.mxu1 %v4685_v34  ;;  %5412 = vmatprep.mubr.msk.f32.mxu1 %vm5997_vm1, %v5996_v2 }
  0x49   :  { %5394 = vmatmul.mubr.msk.f32.vlgmr.msra.gmra.mxu0 %vm162_vm0, %v6140_v18  ;;  %5413 = vmatmul.mubr.msk.f32.vlgmr.msra.gmra.mxu1 %vm162_vm0, %v6140_v18 }
  0x4a   :  { %5415 = vmatprep.subr.mxu0 %v5996_v2  ;;  %5434 = vmatprep.subr.mxu1 %v5996_v2 }
  0x4b   :  { %5431 = vmatprep.mubr.msk.f32.mxu0 %vm5997_vm1, %v5996_v2  ;;  %5450 = vmatprep.mubr.msk.f32.mxu1 %vm5997_vm1, %v5996_v2 }
  0x4c   :  { %5416 = vmatpush3.msra.mxu0 %v4700_v35  ;;  %5435 = vmatpush3.msra.mxu1 %v4708_v37 }
  0x4d   :  { %5417 = vmatprep.subr.mxu0 %v5996_v2  ;;  %5436 = vmatprep.subr.mxu1 %v5996_v2 }
  0x4e   :  { %5418 = vmatpush3.msra.mxu0 %v4699_v36  ;;  %5437 = vmatpush3.msra.mxu1 %v4707_v39 }
  0x4f   :  { %5419 = vmatprep.subr.mxu0 %v5996_v2  ;;  %5438 = vmatprep.subr.mxu1 %v5996_v2 }
  0x50   :  { %5420 = vmatpush3.msra.mxu0 %v4698_v38  ;;  %5439 = vmatpush3.msra.mxu1 %v4706_v40 }
  0x51   :  { %5421 = vmatprep.subr.mxu0 %v5996_v2  ;;  %5440 = vmatprep.subr.mxu1 %v5996_v2 }
  0x52   :  { %5422 = vmatpush3.msra.mxu0 %v4697_v41  ;;  %5441 = vmatpush3.msra.mxu1 %v4705_v42 }
  0x53   :  { %5423 = vmatprep.subr.mxu0 %v5996_v2  ;;  %5442 = vmatprep.subr.mxu1 %v5996_v2 }
  0x54   :  { %5424 = vmatpush3.msra.mxu0 %v4696_v43  ;;  %5443 = vmatpush3.msra.mxu1 %v4704_v44 }
  0x55   :  { %5425 = vmatprep.subr.mxu0 %v5996_v2  ;;  %5444 = vmatprep.subr.mxu1 %v5996_v2 }
  0x56   :  { %5426 = vmatpush3.msra.mxu0 %v4695_v45  ;;  %5445 = vmatpush3.msra.mxu1 %v4703_v46 }
  0x57   :  { %5427 = vmatprep.subr.mxu0 %v5996_v2  ;;  %5446 = vmatprep.subr.mxu1 %v5996_v2 }
  0x58   :  { %5428 = vmatpush3.msra.mxu0 %v4694_v47  ;;  %5447 = vmatpush3.msra.mxu1 %v4702_v48 }
  0x59   :  { %5429 = vmatprep.subr.mxu0 %v5996_v2  ;;  %5448 = vmatprep.subr.mxu1 %v5996_v2 }
  0x5a   :  { %5430 = vmatpush3.msra.mxu0 %v4693_v49  ;;  %5449 = vmatpush3.msra.mxu1 %v4701_v50 }
  0x5b   :  { %5453 = vmatprep.subr.mxu0 %v5996_v2  ;;  %5432 = vmatmul.mubr.msk.f32.vlgmr.msra.gmra.mxu0 %vm162_vm0, %v6111_v17 }
  0x5c   :  { %5454 = vmatpush3.msra.mxu0 %v4700_v35  ;;  %5469 = vmatprep.mubr.msk.f32.mxu0 %vm5997_vm1, %v5996_v2 }
  0x5d   :  { %5455 = vmatprep.subr.mxu0 %v5996_v2  ;;  %5472 = vmatprep.subr.mxu1 %v5996_v2 }
  0x5e   :  { %5456 = vmatpush3.msra.mxu0 %v4699_v36  ;;  %5451 = vmatmul.mubr.msk.f32.vlgmr.msra.gmra.mxu1 %vm162_vm0, %v6111_v17 }
  0x5f   :  { %5473 = vmatpush3.msra.mxu1 %v4708_v37  ;;  %5457 = vmatprep.subr.mxu0 %v5996_v2 }
  0x60   :  { %5474 = vmatprep.subr.mxu1 %v5996_v2  ;;  %5458 = vmatpush3.msra.mxu0 %v4698_v38 }
  0x61   :  { %5475 = vmatpush3.msra.mxu1 %v4707_v39  ;;  %5459 = vmatprep.subr.mxu0 %v5996_v2 }
  0x62   :  { %5476 = vmatprep.subr.mxu1 %v5996_v2  ;;  %5460 = vmatpush3.msra.mxu0 %v4697_v41  ;;  %v4732_v41 = vld [vmem:[%s7376_s1 + $0x1] ss:$0 sm:$0xff] }
  0x63   :  { %5477 = vmatpush3.msra.mxu1 %v4706_v40  ;;  %5461 = vmatprep.subr.mxu0 %v5996_v2 }
  0x64   :  { %5478 = vmatprep.subr.mxu1 %v5996_v2  ;;  %5462 = vmatpush3.msra.mxu0 %v4696_v43 }
  0x65   :  { %5479 = vmatpush3.msra.mxu1 %v4705_v42  ;;  %5463 = vmatprep.subr.mxu0 %v5996_v2 }
  0x66   :  { %5480 = vmatprep.subr.mxu1 %v5996_v2  ;;  %5464 = vmatpush3.msra.mxu0 %v4695_v45 }
  0x67   :  { %5481 = vmatpush3.msra.mxu1 %v4704_v44  ;;  %5465 = vmatprep.subr.mxu0 %v5996_v2 }
  0x68   :  { %5482 = vmatprep.subr.mxu1 %v5996_v2  ;;  %5466 = vmatpush3.msra.mxu0 %v4694_v47 }
  0x69   :  { %5483 = vmatpush3.msra.mxu1 %v4703_v46  ;;  %5467 = vmatprep.subr.mxu0 %v5996_v2 }
  0x6a   :  { %5484 = vmatprep.subr.mxu1 %v5996_v2  ;;  %5468 = vmatpush3.msra.mxu0 %v4693_v49 }
  0x6b   :  { %5485 = vmatpush3.msra.mxu1 %v4702_v48  ;;  %5470 = vmatmul.mubr.msk.f32.vlgmr.msra.gmra.mxu0 %vm162_vm0, %v6140_v18 }
  0x6c   :  { %5486 = vmatprep.subr.mxu1 %v5996_v2  ;;  %5488 = vmatprep.mubr.msk.f32.mxu1 %vm5997_vm1, %v5996_v2 }
  0x6d   :  { %5487 = vmatpush3.msra.mxu1 %v4701_v50  ;;  %5491 = vmatprep.subr.mxu0 %v5996_v2 }
  0x6e   :  { %5489 = vmatmul.mubr.msk.f32.vlgmr.msra.gmra.mxu1 %vm162_vm0, %v6140_v18  ;;  %5496 = vmatprep.subr.mxu1 %v5996_v2 }
  0x6f   :  { %5493 = vmatprep.mubr.msk.f32.mxu0 %vm5997_vm1, %v5996_v2  ;;  %5498 = vmatprep.mubr.msk.f32.mxu1 %vm5997_vm1, %v5996_v2 }
  0xd2   :  { %v232_v51 = vpop.f32.mrf.mxu0 }
  0xd3   :  { %v233_v6 = vadd.f32 %v4713_v63, %v232_v51 }
  0xd4   :  { %v5281_v52 = vpop.f32.mrf.mxu0  ;;  %v302_v53 = vpop.f32.mrf.mxu1 }
  0xd5   :  { %v303_v7 = vadd.f32 %v4714_v0, %v302_v53 }
  0xd6   :  { %v5300_v54 = vpop.f32.mrf.mxu1 }
  0xe4   :  { %v375_v55 = vpop.f32.mrf.mxu0 }
  0xe5   :  { %v376_v14 = vadd.f32 %v4713_v63, %v375_v55 }
  0xe6   :  { %v5319_v56 = vpop.f32.mrf.mxu0  ;;  %v445_v57 = vpop.f32.mrf.mxu1 }
  0xe7   :  { %v446_v15 = vadd.f32 %v4714_v0, %v445_v57 }
  0xe8   :  { %v5338_v58 = vpop.f32.mrf.mxu1 }
  0xf7   :  { %v527_v61 = vpop.f32.mrf.mxu0  ;;  %v597_v62 = vpop.f32.mrf.mxu1 }
  0xf8   :  { %v528_v1 = vadd.f32 %v4719_v59, %v527_v61  ;;  %v598_v3 = vadd.f32 %v4720_v60, %v597_v62 }
  0xf9   :  { %v5357_v4 = vpop.f32.mrf.mxu0  ;;  %v5376_v5 = vpop.f32.mrf.mxu1 }
  0xfa   :  { %5492 = vmatpush3.xpose.msk.msra.mxu0 %vm1045_vm2, %v528_v1  ;;  %5497 = vmatpush3.xpose.msk.msra.mxu1 %vm1045_vm2, %v598_v3 }
  0xfb   :  { %5501 = vmatprep.subr.mxu0 %v5996_v2  ;;  %5506 = vmatprep.subr.mxu1 %v5996_v2 }
  0xfd   :  { %5494 = vmatmul.mubr.msk.f32.vlgmr.msra.gmra.mxu0 %vm1045_vm2, %v233_v6  ;;  %5499 = vmatmul.mubr.msk.f32.vlgmr.msra.gmra.mxu1 %vm1045_vm2, %v303_v7 }
  0xfe   :  { %5503 = vmatprep.mubr.msk.f32.mxu0 %vm5997_vm1, %v5996_v2  ;;  %5508 = vmatprep.mubr.msk.f32.mxu1 %vm5997_vm1, %v5996_v2 }
 0x109   :  { %v667_v8 = vpop.f32.mrf.mxu0  ;;  %v737_v9 = vpop.f32.mrf.mxu1 }
 0x10a   :  { %v668_v10 = vadd.f32 %v4719_v59, %v667_v8  ;;  %v738_v11 = vadd.f32 %v4720_v60, %v737_v9 }
 0x10b   :  { %v5395_v12 = vpop.f32.mrf.mxu0  ;;  %v5414_v13 = vpop.f32.mrf.mxu1 }
 0x10c   :  { %5502 = vmatpush3.xpose.msk.msra.mxu0 %vm1045_vm2, %v668_v10  ;;  %5507 = vmatpush3.xpose.msk.msra.mxu1 %vm1045_vm2, %v738_v11 }
 0x10d   :  { %5511 = vmatprep.subr.mxu0 %v5996_v2  ;;  %5516 = vmatprep.subr.mxu1 %v5996_v2 }
 0x10f   :  { %5504 = vmatmul.mubr.msk.f32.vlgmr.msra.gmra.mxu0 %vm1045_vm2, %v376_v14  ;;  %5509 = vmatmul.mubr.msk.f32.vlgmr.msra.gmra.mxu1 %vm1045_vm2, %v446_v15 }
 0x110   :  { %5513 = vmatprep.mubr.msk.f32.mxu0 %vm5997_vm1, %v5996_v2  ;;  %5518 = vmatprep.mubr.msk.f32.mxu1 %vm5997_vm1, %v5996_v2 }
 0x11b   :  { %v819_v19 = vpop.f32.mrf.mxu0 }
 0x11c   :  { %v820_v20 = vadd.f32 %v4725_v16, %v819_v19  ;;  %v95_v19 = vld [vmem:[%s7379_s4 + $0x18] sm:$0xff] }
 0x11d   :  { %v5433_v21 = vpop.f32.mrf.mxu0 }
 0x11e   :  { %5512 = vmatpush3.msra.mxu0 %v820_v20  ;;  %v889_v23 = vpop.f32.mrf.mxu1  ;;  %v94_v20 = vld [vmem:[%s7379_s4 + $0x10] sm:$0xff] }
 0x11f   :  { %5521 = vmatprep.subr.mxu0 %v5996_v2  ;;  %v890_v24 = vadd.f32 %v4726_v22, %v889_v23  ;;  %v93_v23 = vld [vmem:[%s7379_s4 + $0x8] sm:$0xff] }
 0x120   :  { %v5452_v25 = vpop.f32.mrf.mxu1 }
 0x121   :  { %5517 = vmatpush3.msra.mxu1 %v890_v24  ;;  %v92_v24 = vld [vmem:[%s7379_s4] sm:$0xff]  ;;  %v99_v25 = vld [vmem:[%s7379_s4 + $0x38] sm:$0xff] }
 0x122   :  { %5526 = vmatprep.subr.mxu1 %v5996_v2 }
 0x12b   :  { %v959_v26 = vpop.f32.mrf.mxu0 }
 0x12c   :  { %v6390_v27 = vadd.f32 %v4725_v16, %v959_v26  ;;  %v98_v26 = vld [vmem:[%s7379_s4 + $0x30] sm:$0xff] }
 0x12d   :  { %v5471_v28 = vpop.f32.mrf.mxu0 }
 0x12e   :  { %v1029_v29 = vpop.f32.mrf.mxu1  ;;  %v96_v28 = vld [vmem:[%s7379_s4 + $0x20] sm:$0xff] }
 0x12f   :  { %v6392_v30 = vadd.f32 %v4726_v22, %v1029_v29 }
 0x130   :  { %v5490_v31 = vpop.f32.mrf.mxu1 }
 0x1bd   :  { %v1118_v33 = vpop.f32.mrf.mxu0  ;;  %v1194_v34 = vpop.f32.mrf.mxu1 }
 0x1be   :  { %v1119_v35 = vadd.f32 %v4731_v32, %v1118_v33  ;;  %v1195_v38 = vadd.f32 %v4731_v32, %v1194_v34 }
 0x1bf   :  { %v5495_v36 = vpop.f32.mrf.mxu0  ;;  %v5500_v37 = vpop.f32.mrf.mxu1 }
 0x1c0   :  { %v1351_v39 = vsel %vm1350_vm3, %v1119_v35, -inf  ;;  %v1354_v40 = vsel %vm1350_vm3, %v1195_v38, -inf  ;;  %v1985_v37 = vlaneseq }
 0x1c1   :  { %1352 = vmax.xlane.f32.xlu0 %v1351_v39 }
 0x1c2   :  { %v6471_v39 = vshrl.u32 %v1985_v37, 7 }
 0x1c5   :  { %1355 = vmax.xlane.f32.xlu0 %v1354_v40 }
 0x1cf   :  { %v1270_v42 = vpop.f32.mrf.mxu0  ;;  %v1346_v43 = vpop.f32.mrf.mxu1 }
 0x1d0   :  { %v1271_v44 = vadd.f32 %v4732_v41, %v1270_v42  ;;  %v1347_v47 = vadd.f32 %v4732_v41, %v1346_v43  ;;  %v1987_v41 = vsub.s32 0, %v6471_v39  ;;  %v6477_v42 = vld [vmem:[%s7382_s7] sm:$0x7f] }
 0x1d1   :  { %v5505_v45 = vpop.f32.mrf.mxu0  ;;  %v5510_v46 = vpop.f32.mrf.mxu1 }
 0x1d2   :  { %v1357_v48 = vsel %vm1350_vm3, %v1271_v44, -inf  ;;  %v1360_v49 = vsel %vm1350_vm3, %v1347_v47, -inf }
 0x1d3   :  { %1358 = vmax.xlane.f32.xlu1 %v1357_v48 }
 0x1d7   :  { %1361 = vmax.xlane.f32.xlu1 %v1360_v49 }
 0x24a   :  { %v1353_v50 = vpop.xlane.xlu0 %1352 }
 0x24b   :  { %v1363_v51 = vsub.f32 %v1119_v35, %v1353_v50 }
 0x24d   :  { %v1367_v52 = vmul.f32 1.442695, %v1363_v51 }
 0x24e   :  { %v1356_v53 = vpop.xlane.xlu0 %1355 }
 0x24f   :  { %5892 = vpow2.f32 %v1367_v52  ;;  %v1364_v54 = vsub.f32 %v1195_v38, %v1356_v53 }
 0x251   :  { %v1369_v55 = vmul.f32 1.442695, %v1364_v54 }
 0x253   :  { %5894 = vpow2.f32 %v1369_v55 }
 0x25c   :  { %v5893_v56 = vpop.eup %5892  ;;  %v1359_v57 = vpop.xlane.xlu1 %1358 }
 0x25d   :  { %v1365_v58 = vsub.f32 %v1271_v44, %v1359_v57  ;;  %v1375_v59 = vsel %vm1350_vm3, %v5893_v56, 0.0  ;;  %v1988_v44 = vrot.slane %v6477_v42, %v1987_v41 }
 0x25e   :  { %1376 = vadd.xlane.f32.xlu0 %v1375_v59 }
 0x25f   :  { %v1371_v60 = vmul.f32 1.442695, %v1365_v58 }
 0x260   :  { %v5895_v61 = vpop.eup %5894  ;;  %v1362_v62 = vpop.xlane.xlu1 %1361 }
 0x261   :  { %5896 = vpow2.f32 %v1371_v60  ;;  %v1366_v63 = vsub.f32 %v1347_v47, %v1362_v62  ;;  %v1378_v0 = vsel %vm1350_vm3, %v5895_v61, 0.0 }
 0x262   :  { %1379 = vadd.xlane.f32.xlu1 %v1378_v0 }
 0x263   :  { %v1373_v1 = vmul.f32 1.442695, %v1366_v63 }
 0x265   :  { %5898 = vpow2.f32 %v1373_v1 }
 0x26e   :  { %v5897_v3 = vpop.eup %5896 }
 0x26f   :  { %v1381_v4 = vsel %vm1350_vm3, %v5897_v3, 0.0 }
 0x270   :  { %1382 = vadd.xlane.f32.xlu0 %v1381_v4 }
 0x272   :  { %v5899_v5 = vpop.eup %5898 }
 0x273   :  { %v1384_v6 = vsel %vm1350_vm3, %v5899_v5, 0.0 }
 0x274   :  { %1385 = vadd.xlane.f32.xlu1 %v1384_v6 }
 0x2e7   :  { %v1377_v7 = vpop.xlane.xlu0 %1376 }
 0x2e8   :  { %5900 = vrcp.f32 %v1377_v7 }
 0x2eb   :  { %v1380_v8 = vpop.xlane.xlu1 %1379 }
 0x2ec   :  { %5902 = vrcp.f32 %v1380_v8  ;;  %v114_v8 = vld [vmem:[%s7380_s5 + $0x70] sm:$0xff] }
 0x2f5   :  { %v5901_v9 = vpop.eup %5900 }
 0x2f6   :  { %v1391_v10 = vmul.f32 %v5901_v9, %v5893_v56  ;;  %v113_v9 = vld [vmem:[%s7380_s5 + $0x68] sm:$0xff] }
 0x2f8   :  { %5514 = vmatmul.mubr.msk.f32.vlgmr.msra.gmra.mxu0 %vm1350_vm3, %v1391_v10  ;;  %v112_v10 = vld [vmem:[%s7380_s5 + $0x60] sm:$0xff] }
 0x2f9   :  { %v5903_v11 = vpop.eup %5902  ;;  %v1383_v12 = vpop.xlane.xlu0 %1382  ;;  %5522 = vmatpush3.msra.mxu0 %v6390_v27  ;;  %5523 = vmatprep.mubr.msk.f32.mxu0 %vm5997_vm1, %v5996_v2  ;;  %v97_v27 = vld [vmem:[%s7379_s4 + $0x28] sm:$0xff] }
 0x2fa   :  { %5904 = vrcp.f32 %v1383_v12  ;;  %v1392_v13 = vmul.f32 %v5903_v11, %v5895_v61  ;;  %5531 = vmatprep.subr.mxu0 %v5996_v2  ;;  %v111_v11 = vld [vmem:[%s7380_s5 + $0x58] sm:$0xff]  ;;  %v110_v12 = vld [vmem:[%s7380_s5 + $0x50] sm:$0xff] }
 0x2fc   :  { %5519 = vmatmul.mubr.msk.f32.vlgmr.msra.gmra.mxu1 %vm1350_vm3, %v1392_v13  ;;  %v109_v13 = vld [vmem:[%s7380_s5 + $0x48] sm:$0xff] }
 0x2fd   :  { %v1386_v14 = vpop.xlane.xlu1 %1385  ;;  %5527 = vmatpush3.msra.mxu1 %v6392_v30  ;;  %5528 = vmatprep.mubr.msk.f32.mxu1 %vm5997_vm1, %v5996_v2 }
 0x2fe   :  { %5906 = vrcp.f32 %v1386_v14  ;;  %5564 = vmatprep.subr.mxu1 %v5996_v2  ;;  %v108_v14 = vld [vmem:[%s7380_s5 + $0x40] sm:$0xff] }
 0x307   :  { %v5905_v15 = vpop.eup %5904 }
 0x308   :  { %v1393_v16 = vmul.f32 %v5905_v15, %v5897_v3  ;;  %v107_v15 = vld [vmem:[%s7380_s5 + $0x38] sm:$0xff] }
 0x30a   :  { %5524 = vmatmul.mubr.msk.f32.vlgmr.msra.gmra.mxu0 %vm1350_vm3, %v1393_v16  ;;  %v106_v16 = vld [vmem:[%s7380_s5 + $0x30] sm:$0xff] }
 0x30b   :  { %v5907_v21 = vpop.eup %5906  ;;  %5532 = vmatpush3.msra.mxu0 %v95_v19  ;;  %5539 = vmatprep.mubr.msk.f32.mxu0 %vm5997_vm1, %v5996_v2 }
 0x30c   :  { %v1394_v22 = vmul.f32 %v5907_v21, %v5899_v5  ;;  %5533 = vmatprep.subr.mxu0 %v5996_v2  ;;  %v103_v21 = vld [vmem:[%s7380_s5 + $0x18] sm:$0xff] }
 0x30d   :  { %5534 = vmatpush3.msra.mxu0 %v94_v20 }
 0x30e   :  { %5529 = vmatmul.mubr.msk.f32.vlgmr.msra.gmra.mxu1 %vm1350_vm3, %v1394_v22  ;;  %5535 = vmatprep.subr.mxu0 %v5996_v2  ;;  %v102_v22 = vld [vmem:[%s7380_s5 + $0x10] sm:$0xff] }
 0x30f   :  { %5536 = vmatpush3.msra.mxu0 %v93_v23  ;;  %5572 = vmatprep.mubr.msk.f32.mxu1 %vm5997_vm1, %v5996_v2 }
 0x310   :  { %5537 = vmatprep.subr.mxu0 %v5996_v2  ;;  %5565 = vmatpush3.msra.mxu1 %v99_v25 }
 0x311   :  { %5538 = vmatpush3.msra.mxu0 %v92_v24  ;;  %5566 = vmatprep.subr.mxu1 %v5996_v2 }
 0x312   :  { %5542 = vmatprep.subr.mxu0 %v5996_v2  ;;  %5567 = vmatpush3.msra.mxu1 %v98_v26 }
 0x313   :  { %5568 = vmatprep.subr.mxu1 %v5996_v2 }
 0x314   :  { %5569 = vmatpush3.msra.mxu1 %v97_v27 }
 0x315   :  { %5570 = vmatprep.subr.mxu1 %v5996_v2 }
 0x316   :  { %5571 = vmatpush3.msra.mxu1 %v96_v28 }
 0x3b8   :  { %v1464_v29 = vpop.f32.mrf.mxu0 }
 0x3b9   :  { %5540 = vmatmul.mubr.msk.f32.vlgmr.msra.gmra.mxu0 %vm1045_vm2, %v1464_v29 }
 0x3ba   :  { %5543 = vmatpush3.msra.mxu0 %v99_v25  ;;  %v5515_v30 = vpop.f32.mrf.mxu0  ;;  %5550 = vmatprep.mubr.msk.f32.mxu0 %vm5997_vm1, %v5996_v2 }
 0x3bb   :  { %5544 = vmatprep.subr.mxu0 %v5996_v2 }
 0x3bc   :  { %5545 = vmatpush3.msra.mxu0 %v98_v26  ;;  %v1537_v31 = vpop.f32.mrf.mxu1 }
 0x3bd   :  { %5546 = vmatprep.subr.mxu0 %v5996_v2 }
 0x3be   :  { %5547 = vmatpush3.msra.mxu0 %v97_v27  ;;  %v5520_v32 = vpop.f32.mrf.mxu1 }
 0x3bf   :  { %5548 = vmatprep.subr.mxu0 %v5996_v2 }
 0x3c0   :  { %5549 = vmatpush3.msra.mxu0 %v96_v28  ;;  %v2022_v28 = vsub.s32 1, %v6471_v39 }
 0x3c1   :  { %5551 = vmatmul.mubr.msk.f32.vlgmr.msra.gmra.mxu0 %vm1045_vm2, %v1537_v31  ;;  %5553 = vmatprep.subr.mxu0 %v5996_v2  ;;  %v2028_v31 = vsub.s32 2, %v6471_v39 }
 0x3c2   :  { %5554 = vmatpush3.msra.mxu0 %v95_v19  ;;  %5561 = vmatprep.mubr.msk.f32.mxu0 %vm5997_vm1, %v5996_v2  ;;  %v105_v19 = vld [vmem:[%s7380_s5 + $0x28] sm:$0xff] }
 0x3c3   :  { %5555 = vmatprep.subr.mxu0 %v5996_v2 }
 0x3c4   :  { %5556 = vmatpush3.msra.mxu0 %v94_v20  ;;  %v104_v20 = vld [vmem:[%s7380_s5 + $0x20] sm:$0xff] }
 0x3c5   :  { %5557 = vmatprep.subr.mxu0 %v5996_v2 }
 0x3c6   :  { %5558 = vmatpush3.msra.mxu0 %v93_v23  ;;  %v101_v23 = vld [vmem:[%s7380_s5 + $0x8] sm:$0xff] }
 0x3c7   :  { %5559 = vmatprep.subr.mxu0 %v5996_v2 }
 0x3c8   :  { %5560 = vmatpush3.msra.mxu0 %v92_v24  ;;  %v100_v24 = vld [vmem:[%s7380_s5] sm:$0xff] }
 0x3ca   :  { %v1610_v33 = vpop.f32.mrf.mxu0 }
 0x3cb   :  { %5562 = vmatmul.mubr.msk.f32.vlgmr.msra.gmra.mxu0 %vm1045_vm2, %v1610_v33  ;;  %v2023_v33 = vrot.slane %v6477_v42, %v2022_v28 }
 0x3cc   :  { %v5525_v34 = vpop.f32.mrf.mxu0  ;;  %2110 = vmatprep.mubr.f32.mxu0 %v5996_v2 }
 0x3ce   :  { %v1683_v35 = vpop.f32.mrf.mxu1 }
 0x3cf   :  { %5573 = vmatmul.mubr.msk.f32.vlgmr.msra.gmra.mxu1 %vm1045_vm2, %v1683_v35 }
 0x3d0   :  { %v5530_v36 = vpop.f32.mrf.mxu1 }
 0x3d1   :  { %v2029_v36 = vrot.slane %v6477_v42, %v2028_v31 }
 0x479   :  { %v1756_v38 = vpop.f32.mrf.mxu0 }
 0x47a   :  { %v1979_v45 = vsel %vm162_vm0, %v1756_v38, 0.0 }
 0x47b   :  { %v5541_v40 = vpop.f32.mrf.mxu0 }
 0x481   :  { %v1829_v43 = vpop.f32.mrf.mxu0 }
 0x482   :  { %v1980_v46 = vsel %vm162_vm0, %v1829_v43, 0.0 }
 0x483   :  { %v1981_v47 = vadd.f32 %v1980_v46, %v1979_v45  ;;  %v5552_v48 = vpop.f32.mrf.mxu0  ;;  %v147_v46 = vld [vmem:[%s7381_s6 + $0xf8] sm:$0xff] }
 0x484   :  { %5043 = vmatprep.subr.mxu1 %v147_v46  ;;  %v146_v48 = vld [vmem:[%s7381_s6 + $0xf0] sm:$0xff] }
 0x485   :  { %v1989_v49 = vadd.f32 %v1988_v44, %v1981_v47  ;;  %v131_v47 = vld [vmem:[%s7381_s6 + $0x78] sm:$0xff] }
 0x486   :  { %5044 = vmatpush3.msra.mxu1 %v131_v47 }
 0x487   :  { %v1991_v50 = vadd.f32 %v1989_v49, %v6111_v17  ;;  %5045 = vmatprep.subr.mxu1 %v146_v48  ;;  %v130_v49 = vld [vmem:[%s7381_s6 + $0x70] sm:$0xff] }
 0x488   :  { %5046 = vmatpush3.msra.mxu1 %v130_v49 }
 0x489   :  { %v1993_v51 = vsel %vm162_vm0, %v1991_v50, 0.0 }
 0x48a   :  { %1994 = vadd.xlane.f32.xlu0 %v1993_v51  ;;  %v129_v51 = vld [vmem:[%s7381_s6 + $0x68] sm:$0xff] }
 0x48b   :  { %v1902_v52 = vpop.f32.mrf.mxu0 }
 0x48c   :  { %v1982_v55 = vsel %vm162_vm0, %v1902_v52, 0.0  ;;  %v144_v52 = vld [vmem:[%s7381_s6 + $0xe0] sm:$0xff] }
 0x48d   :  { %v5563_v53 = vpop.f32.mrf.mxu0 }
 0x48e   :  { %v128_v53 = vld [vmem:[%s7381_s6 + $0x60] sm:$0xff] }
 0x48f   :  { %v1975_v54 = vpop.f32.mrf.mxu1 }
 0x490   :  { %v1983_v56 = vsel %vm162_vm0, %v1975_v54, 0.0  ;;  %v143_v54 = vld [vmem:[%s7381_s6 + $0xd8] sm:$0xff] }
 0x491   :  { %v1984_v57 = vadd.f32 %v1983_v56, %v1982_v55  ;;  %v5574_v58 = vpop.f32.mrf.mxu1  ;;  %v127_v55 = vld [vmem:[%s7381_s6 + $0x58] sm:$0xff]  ;;  %v142_v56 = vld [vmem:[%s7381_s6 + $0xd0] sm:$0xff] }
 0x492   :  { %v141_v58 = vld [vmem:[%s7381_s6 + $0xc8] sm:$0xff] }
 0x493   :  { %v1990_v59 = vadd.f32 %v1988_v44, %v1984_v57  ;;  %v126_v57 = vld [vmem:[%s7381_s6 + $0x50] sm:$0xff] }
 0x495   :  { %v1992_v60 = vadd.f32 %v1990_v59, %v6140_v18  ;;  %v115_v18 = vld [vmem:[%s7380_s5 + $0x78] sm:$0xff]  ;;  %v125_v59 = vld [vmem:[%s7381_s6 + $0x48] sm:$0xff] }
 0x496   :  { %2062 = vmatprep.subr.mxu0 %v115_v18  ;;  %v134_v18 = vld [vmem:[%s7381_s6 + $0x90] sm:$0xff] }
 0x497   :  { %v1996_v61 = vsel %vm162_vm0, %v1992_v60, 0.0  ;;  %2063 = vmatpush1.msra.mxu0 %v114_v8  ;;  %v118_v8 = vld [vmem:[%s7381_s6 + $0x10] sm:$0xff] }
 0x498   :  { %1997 = vadd.xlane.f32.xlu1 %v1996_v61  ;;  %2064 = vmatprep.subr.mxu0 %v113_v9  ;;  %v124_v61 = vld [vmem:[%s7381_s6 + $0x40] sm:$0xff]  ;;  %v133_v9 = vld [vmem:[%s7381_s6 + $0x88] sm:$0xff] }
 0x499   :  { %2065 = vmatpush1.msra.mxu0 %v112_v10  ;;  %v117_v10 = vld [vmem:[%s7381_s6 + $0x8] sm:$0xff] }
 0x49a   :  { %2066 = vmatprep.subr.mxu0 %v111_v11  ;;  %v132_v11 = vld [vmem:[%s7381_s6 + $0x80] sm:$0xff] }
 0x49b   :  { %2067 = vmatpush1.msra.mxu0 %v110_v12  ;;  %v116_v12 = vld [vmem:[%s7381_s6] sm:$0xff] }
 0x49c   :  { %2068 = vmatprep.subr.mxu0 %v109_v13  ;;  %v6658_v13 = vsub.s32 3, %v6471_v39 }
 0x49d   :  { %2069 = vmatpush1.msra.mxu0 %v108_v14  ;;  %v149_v14 = vld [vmem:[%s7382_s7 + $0x8] sm:$0x7f] }
 0x49e   :  { %2070 = vmatprep.subr.mxu0 %v107_v15  ;;  %v2035_v15 = vrot.slane %v6477_v42, %v6658_v13 }
 0x49f   :  { %2071 = vmatpush1.msra.mxu0 %v106_v16  ;;  %v2039_v16 = vrot.slane %v149_v14, %v6658_v13 }
 0x4a0   :  { %2072 = vmatprep.subr.mxu0 %v105_v19 }
 0x4a1   :  { %2073 = vmatpush1.msra.mxu0 %v104_v20 }
 0x4a2   :  { %2074 = vmatprep.subr.mxu0 %v103_v21 }
 0x4a3   :  { %2075 = vmatpush1.msra.mxu0 %v102_v22 }
 0x4a4   :  { %2076 = vmatprep.subr.mxu0 %v101_v23 }
 0x4a5   :  { %2077 = vmatpush1.msra.mxu0 %v100_v24 }
 0x4a6   :  { %5575 = vmatprep.subr.mxu0 %v5996_v2 }
 0x513   :  { %v1995_v62 = vpop.xlane.xlu0 %1994 }
 0x514   :  { %v2000_v17 = vmul.f32 0.015625, %v1995_v62  ;;  %v139_v62 = vld [vmem:[%s7381_s6 + $0xb8] sm:$0xff] }
 0x516   :  { %v2002_v63 = vsub.f32 %v1991_v50, %v2000_v17  ;;  %v145_v50 = vld [vmem:[%s7381_s6 + $0xe8] sm:$0xff]  ;;  %v123_v17 = vld [vmem:[%s7381_s6 + $0x38] sm:$0xff] }
 0x517   :  { %5047 = vmatprep.subr.mxu1 %v145_v50 }
 0x518   :  { %v2004_v0 = vmul.f32 %v2002_v63, %v2002_v63  ;;  %5048 = vmatpush3.msra.mxu1 %v129_v51 }
 0x519   :  { %5049 = vmatprep.subr.mxu1 %v144_v52 }
 0x51a   :  { %v2006_v1 = vsel %vm162_vm0, %v2004_v0, 0.0  ;;  %5050 = vmatpush3.msra.mxu1 %v128_v53  ;;  %v122_v0 = vld [vmem:[%s7381_s6 + $0x30] sm:$0xff] }
 0x51b   :  { %2007 = vadd.xlane.f32.xlu0 %v2006_v1  ;;  %5051 = vmatprep.subr.mxu1 %v143_v54  ;;  %v137_v1 = vld [vmem:[%s7381_s6 + $0xa8] sm:$0xff] }
 0x51c   :  { %5052 = vmatpush3.msra.mxu1 %v127_v55 }
 0x51d   :  { %5053 = vmatprep.subr.mxu1 %v142_v56 }
 0x51e   :  { %5054 = vmatpush3.msra.mxu1 %v126_v57 }
 0x51f   :  { %5055 = vmatprep.subr.mxu1 %v141_v58 }
 0x520   :  { %5056 = vmatpush3.msra.mxu1 %v125_v59 }
 0x521   :  { %v1998_v3 = vpop.xlane.xlu1 %1997 }
 0x522   :  { %v2001_v4 = vmul.f32 0.015625, %v1998_v3  ;;  %v121_v3 = vld [vmem:[%s7381_s6 + $0x28] sm:$0xff] }
 0x524   :  { %v2003_v5 = vsub.f32 %v1992_v60, %v2001_v4  ;;  %v140_v60 = vld [vmem:[%s7381_s6 + $0xc0] sm:$0xff] }
 0x525   :  { %5057 = vmatprep.subr.mxu1 %v140_v60  ;;  %v136_v4 = vld [vmem:[%s7381_s6 + $0xa0] sm:$0xff] }
 0x526   :  { %v2005_v6 = vmul.f32 %v2003_v5, %v2003_v5  ;;  %5058 = vmatpush3.msra.mxu1 %v124_v61 }
 0x527   :  { %5059 = vmatprep.subr.mxu1 %v139_v62 }
 0x528   :  { %v2009_v7 = vsel %vm162_vm0, %v2005_v6, 0.0  ;;  %5060 = vmatpush3.msra.mxu1 %v123_v17  ;;  %v135_v6 = vld [vmem:[%s7381_s6 + $0x98] sm:$0xff] }
 0x529   :  { %2010 = vadd.xlane.f32.xlu1 %v2009_v7  ;;  %v119_v7 = vld [vmem:[%s7381_s6 + $0x18] sm:$0xff] }
 0x5a4   :  { %v2008_v25 = vpop.xlane.xlu0 %2007 }
 0x5a5   :  { %v2012_v26 = vmul.f32 0.015625, %v2008_v25 }
 0x5a7   :  { %v2014_v27 = vadd.f32 1e-12, %v2012_v26 }
 0x5a9   :  { %5908 = vrsqrt.f32 %v2014_v27 }
 0x5b2   :  { %v2011_v29 = vpop.xlane.xlu1 %2010 }
 0x5b3   :  { %v2013_v30 = vmul.f32 0.015625, %v2011_v29 }
 0x5b5   :  { %v2015_v32 = vadd.f32 1e-12, %v2013_v30 }
 0x5b6   :  { %v5909_v34 = vpop.eup %5908 }
 0x5b7   :  { %v2018_v35 = vmul.f32 %v5909_v34, %v2002_v63  ;;  %5910 = vrsqrt.f32 %v2015_v32  ;;  %v138_v63 = vld [vmem:[%s7381_s6 + $0xb0] sm:$0xff] }
 0x5b8   :  { %5061 = vmatprep.subr.mxu1 %v138_v63 }
 0x5b9   :  { %v2024_v37 = vmul.f32 %v2023_v33, %v2018_v35  ;;  %5062 = vmatpush3.msra.mxu1 %v122_v0 }
 0x5ba   :  { %5063 = vmatprep.subr.mxu1 %v137_v1 }
 0x5bb   :  { %v6549_v38 = vadd.f32 %v2029_v36, %v2024_v37  ;;  %5064 = vmatpush3.msra.mxu1 %v121_v3 }
 0x5bc   :  { %5065 = vmatprep.subr.mxu1 %v136_v4 }
 0x5bd   :  { %4749 = vmatmul.mubr.msk.f32.vlgmr.msra.gmra.mxu0 %vm162_vm0, %v6549_v38 }
 0x5be   :  { %2116 = vmatprep.mubr.f32.mxu0 %v5996_v2 }
 0x5c4   :  { %v5911_v40 = vpop.eup %5910 }
 0x5c5   :  { %v2019_v43 = vmul.f32 %v5911_v40, %v2003_v5  ;;  %v120_v5 = vld [vmem:[%s7381_s6 + $0x20] sm:$0xff] }
 0x5c6   :  { %5066 = vmatpush3.msra.mxu1 %v120_v5 }
 0x5c7   :  { %v2025_v44 = vmul.f32 %v2023_v33, %v2019_v43  ;;  %5067 = vmatprep.subr.mxu1 %v135_v6 }
 0x5c8   :  { %5068 = vmatpush3.msra.mxu1 %v119_v7 }
 0x5c9   :  { %v6554_v45 = vadd.f32 %v2029_v36, %v2025_v44  ;;  %5069 = vmatprep.subr.mxu1 %v134_v18 }
 0x5ca   :  { %5070 = vmatpush3.msra.mxu1 %v118_v8 }
 0x5cb   :  { %4750 = vmatmul.mubr.msk.f32.gmra.mxu0 %vm162_vm0, %v6554_v45  ;;  %5071 = vmatprep.subr.mxu1 %v133_v9 }
 0x5cc   :  { %5591 = vmatprep.mubr.msk.f32.mxu0 %vm5997_vm1, %v5996_v2  ;;  %5072 = vmatpush3.msra.mxu1 %v117_v10 }
 0x5cd   :  { %5073 = vmatprep.subr.mxu1 %v132_v11 }
 0x5ce   :  { %5074 = vmatpush3.msra.mxu1 %v116_v12 }
 0x5cf   :  { %5613 = vmatprep.subr.mxu1 %v5996_v2 }
 0x67d   :  { %v2112_v19 = vpop.f32.mrf.mxu0 }
 0x67e   :  { %v6666_v20 = vadd.f32 %v2112_v19, %v2035_v15 }
 0x67f   :  { %v2114_v21 = vpop.f32.mrf.mxu0 }
 0x680   :  { %v6669_v22 = vmul.f32 0.70710677, %v6666_v20  ;;  %v6671_v23 = vadd.f32 %v2114_v21, %v2039_v16 }
 0x682   :  { %v2131_v24 = vand.u32 2147483647, %v6669_v22  ;;  %v6675_v25 = vmul.f32 0.70710677, %v6671_v23  ;;  %vm2211_vm4 = vcmp.ge.f32.partialorder %v6669_v22, 0.0 }
 0x684   :  { %v2135_v26 = vmul.f32 0.3275911, %v2131_v24  ;;  %v2132_v27 = vand.u32 2147483647, %v6675_v25  ;;  %v2187_v36 = vsub.f32 0.0, %v2131_v24  ;;  %vm2212_vm5 = vcmp.ge.f32.partialorder %v6675_v25, 0.0 }
 0x686   :  { %v2139_v29 = vadd.f32 1.0, %v2135_v26  ;;  %v2136_v30 = vmul.f32 0.3275911, %v2132_v27  ;;  %v2188_v46 = vsub.f32 0.0, %v2132_v27  ;;  %v2191_v47 = vmul.f32 %v2187_v36, %v2131_v24 }
 0x688   :  { %5912 = vrcp.f32 %v2139_v29  ;;  %v2140_v32 = vadd.f32 1.0, %v2136_v30  ;;  %v2192_v53 = vmul.f32 %v2188_v46, %v2132_v27  ;;  %v2195_v55 = vmul.f32 1.442695, %v2191_v47 }
 0x68a   :  { %5914 = vrcp.f32 %v2140_v32  ;;  %v2197_v59 = vmul.f32 1.442695, %v2192_v53 }
 0x68b   :  { %v2118_v33 = vpop.f32.mrf.mxu0 }
 0x68c   :  { %v6678_v34 = vadd.f32 %v2118_v33, %v2035_v15 }
 0x68d   :  { %v2120_v35 = vpop.f32.mrf.mxu0 }
 0x68e   :  { %v6681_v37 = vmul.f32 0.70710677, %v6678_v34  ;;  %v6683_v40 = vadd.f32 %v2120_v35, %v2039_v16 }
 0x690   :  { %v2133_v43 = vand.u32 2147483647, %v6681_v37  ;;  %v6687_v44 = vmul.f32 0.70710677, %v6683_v40  ;;  %vm2213_vm6 = vcmp.ge.f32.partialorder %v6681_v37, 0.0  ;;  %v2233_v37 = vsub.s32 4, %v6471_v39 }
 0x692   :  { %v2137_v48 = vmul.f32 0.3275911, %v2133_v43  ;;  %v2134_v49 = vand.u32 2147483647, %v6687_v44  ;;  %v2189_v63 = vsub.f32 0.0, %v2133_v43  ;;  %vm2214_vm7 = vcmp.ge.f32.partialorder %v6687_v44, 0.0 }
 0x693   :  { %v2234_v44 = vrot.slane %v6477_v42, %v2233_v37 }
 0x694   :  { %v2141_v50 = vadd.f32 1.0, %v2137_v48  ;;  %v2138_v51 = vmul.f32 0.3275911, %v2134_v49  ;;  %v2190_v3 = vsub.f32 0.0, %v2134_v49  ;;  %v2193_v6 = vmul.f32 %v2189_v63, %v2133_v43 }
 0x695   :  { %v5913_v52 = vpop.eup %5912  ;;  %v2123_v63 = vmul.f32 0.5, %v6666_v20 }
 0x696   :  { %v2151_v54 = vmul.f32 1.0614054, %v5913_v52  ;;  %5916 = vrcp.f32 %v2141_v50  ;;  %v2142_v56 = vadd.f32 1.0, %v2138_v51  ;;  %v2194_v9 = vmul.f32 %v2190_v3, %v2134_v49 }
 0x697   :  { %v5915_v57 = vpop.eup %5914  ;;  %v2199_v12 = vmul.f32 1.442695, %v2193_v6 }
 0x698   :  { %v2155_v58 = vadd.f32 -1.4531521, %v2151_v54  ;;  %5918 = vrcp.f32 %v2142_v56  ;;  %v2152_v60 = vmul.f32 1.0614054, %v5915_v57  ;;  %v2201_v26 = vmul.f32 1.442695, %v2194_v9 }
 0x699   :  { %5920 = vpow2.f32 %v2195_v55 }
 0x69a   :  { %v2159_v61 = vmul.f32 %v5913_v52, %v2155_v58  ;;  %v2156_v62 = vadd.f32 -1.4531521, %v2152_v60  ;;  %5922 = vpow2.f32 %v2197_v59 }
 0x69b   :  { %5924 = vpow2.f32 %v2199_v12 }
 0x69c   :  { %v2163_v17 = vadd.f32 1.4214138, %v2159_v61  ;;  %v2160_v0 = vmul.f32 %v5915_v57, %v2156_v62  ;;  %5926 = vpow2.f32 %v2201_v26  ;;  %v2124_v61 = vmul.f32 0.5, %v6671_v23 }
 0x69e   :  { %v2167_v1 = vmul.f32 %v5913_v52, %v2163_v17  ;;  %v2164_v4 = vadd.f32 1.4214138, %v2160_v0 }
 0x6a0   :  { %v2171_v5 = vadd.f32 -0.28449672, %v2167_v1  ;;  %v2168_v7 = vmul.f32 %v5915_v57, %v2164_v4 }
 0x6a2   :  { %v2175_v18 = vmul.f32 %v5913_v52, %v2171_v5  ;;  %v2172_v10 = vadd.f32 -0.28449672, %v2168_v7 }
 0x6a3   :  { %v5917_v8 = vpop.eup %5916 }
 0x6a4   :  { %v2179_v11 = vadd.f32 0.2548296, %v2175_v18  ;;  %v2153_v14 = vmul.f32 1.0614054, %v5917_v8  ;;  %v2176_v15 = vmul.f32 %v5915_v57, %v2172_v10 }
 0x6a5   :  { %v5919_v16 = vpop.eup %5918 }
 0x6a6   :  { %v2183_v19 = vmul.f32 %v5913_v52, %v2179_v11  ;;  %v2157_v21 = vadd.f32 -1.4531521, %v2153_v14  ;;  %v5921_v24 = vpop.eup %5920  ;;  %v2180_v27 = vadd.f32 0.2548296, %v2176_v15  ;;  %v2154_v29 = vmul.f32 1.0614054, %v5919_v16 }
 0x6a7   :  { %v5923_v36 = vpop.eup %5922  ;;  %v2126_v14 = vmul.f32 0.5, %v6683_v40 }
 0x6a8   :  { %v2203_v30 = vmul.f32 %v5921_v24, %v2183_v19  ;;  %v2161_v32 = vmul.f32 %v5917_v8, %v2157_v21  ;;  %v2184_v33 = vmul.f32 %v5915_v57, %v2180_v27  ;;  %v2158_v35 = vadd.f32 -1.4531521, %v2154_v29  ;;  %v5925_v3 = vpop.eup %5924 }
 0x6a9   :  { %v5927_v7 = vpop.eup %5926  ;;  %v2125_v19 = vmul.f32 0.5, %v6678_v34 }
 0x6aa   :  { %v2207_v43 = vsub.f32 1.0, %v2203_v30  ;;  %v2165_v46 = vadd.f32 1.4214138, %v2161_v32  ;;  %v2204_v47 = vmul.f32 %v5923_v36, %v2184_v33  ;;  %v2162_v48 = vmul.f32 %v5919_v16, %v2158_v35 }
 0x6ac   :  { %v2215_v49 = vsub.f32 0.0, %v2207_v43  ;;  %v2169_v50 = vmul.f32 %v5917_v8, %v2165_v46  ;;  %v2208_v51 = vsub.f32 1.0, %v2204_v47  ;;  %v2166_v52 = vadd.f32 1.4214138, %v2162_v48 }
 0x6ae   :  { %v2219_v53 = vsel %vm2211_vm4, %v2207_v43, %v2215_v49  ;;  %v2173_v54 = vadd.f32 -0.28449672, %v2169_v50  ;;  %v2216_v55 = vsub.f32 0.0, %v2208_v51  ;;  %v2170_v56 = vmul.f32 %v5919_v16, %v2166_v52 }
 0x6af   :  { %v2223_v58 = vadd.f32 1.0, %v2219_v53 }
 0x6b0   :  { %v2177_v57 = vmul.f32 %v5917_v8, %v2173_v54  ;;  %v2220_v59 = vsel %vm2212_vm5, %v2208_v51, %v2216_v55  ;;  %v2174_v60 = vadd.f32 -0.28449672, %v2170_v56  ;;  %v4757_v55 = vld [vmem:[%s7377_s2 + $0x1b0] sm:$0xff]  ;;  %v4756_v56 = vld [vmem:[%s7377_s2 + $0x1a8] sm:$0xff] }
 0x6b1   :  { %v2224_v62 = vadd.f32 1.0, %v2220_v59  ;;  %v2227_v4 = vmul.f32 %v2223_v58, %v2123_v63  ;;  %v4754_v58 = vld [vmem:[%s7377_s2 + $0x198] sm:$0xff]  ;;  %v4753_v59 = vld [vmem:[%s7377_s2 + $0x190] sm:$0xff] }
 0x6b2   :  { %v2181_v17 = vadd.f32 0.2548296, %v2177_v57  ;;  %v2178_v0 = vmul.f32 %v5919_v16, %v2174_v60  ;;  %v4755_v57 = vld [vmem:[%s7377_s2 + $0x1a0] sm:$0xff]  ;;  %v4752_v60 = vld [vmem:[%s7377_s2 + $0x188] sm:$0xff] }
 0x6b3   :  { %v2228_v22 = vmul.f32 %v2224_v62, %v2124_v61  ;;  %v4751_v61 = vld [vmem:[%s7377_s2 + $0x180] sm:$0xff] }
 0x6b4   :  { %v2185_v1 = vmul.f32 %v5917_v8, %v2181_v17  ;;  %v2182_v5 = vadd.f32 0.2548296, %v2178_v0  ;;  %v2340_v0 = vsub.s32 5, %v6471_v39 }
 0x6b5   :  { %2299 = vmatprep.mubr.f32.mxu1 %v2228_v22 }
 0x6b6   :  { %v2205_v6 = vmul.f32 %v5925_v3, %v2185_v1  ;;  %2300 = vmatmul.mubr.f32.vlgmr.msra.gmra.mxu1 %v2227_v4  ;;  %v2186_v25 = vmul.f32 %v5919_v16, %v2182_v5  ;;  %v2346_v1 = vsub.s32 6, %v6471_v39  ;;  %v2341_v4 = vrot.slane %v6477_v42, %v2340_v0 }
 0x6b8   :  { %v2209_v18 = vsub.f32 1.0, %v2205_v6  ;;  %v2206_v9 = vmul.f32 %v5927_v7, %v2186_v25  ;;  %v2347_v25 = vrot.slane %v6477_v42, %v2346_v1  ;;  %v4764_v42 = vld [vmem:[%s7377_s2 + $0x1e8] sm:$0xff] }
 0x6ba   :  { %v2217_v10 = vsub.f32 0.0, %v2209_v18  ;;  %v2210_v23 = vsub.f32 1.0, %v2206_v9 }
 0x6bc   :  { %v2221_v11 = vsel %vm2213_vm6, %v2209_v18, %v2217_v10  ;;  %v2218_v12 = vsub.f32 0.0, %v2210_v23  ;;  %v4766_v10 = vld [vmem:[%s7377_s2 + $0x1f8] sm:$0xff] }
 0x6bd   :  { %v2225_v8 = vadd.f32 1.0, %v2221_v11  ;;  %v4763_v11 = vld [vmem:[%s7377_s2 + $0x1e0] sm:$0xff] }
 0x6be   :  { %v2222_v20 = vsel %vm2214_vm7, %v2210_v23, %v2218_v12  ;;  %v4765_v23 = vld [vmem:[%s7377_s2 + $0x1f0] sm:$0xff]  ;;  %v4762_v12 = vld [vmem:[%s7377_s2 + $0x1d8] sm:$0xff] }
 0x6bf   :  { %v2226_v15 = vadd.f32 1.0, %v2222_v20  ;;  %v2229_v16 = vmul.f32 %v2225_v8, %v2125_v19  ;;  %v4760_v19 = vld [vmem:[%s7377_s2 + $0x1c8] sm:$0xff] }
 0x6c1   :  { %v2230_v21 = vmul.f32 %v2226_v15, %v2126_v14  ;;  %v4761_v14 = vld [vmem:[%s7377_s2 + $0x1d0] sm:$0xff] }
 0x6c3   :  { %2304 = vmatprep.mubr.f32.mxu1 %v2230_v21 }
 0x6c4   :  { %2305 = vmatmul.mubr.f32.gmra.mxu1 %v2229_v16  ;;  %v4774_v16 = vld [vmem:[%s7377_s2 + $0x238] sm:$0xff] }
 0x6c5   :  { %5629 = vmatprep.mubr.msk.f32.mxu1 %vm5997_vm1, %v5996_v2 }
 0x776   :  { %v5075_v24 = vpop.f32.mrf.mxu1 }
 0x778   :  { %v5076_v26 = vpop.f32.mrf.mxu1 }
 0x779   :  { %v5077_v27 = vadd.f32 %v5076_v26, %v5075_v24  ;;  %v4759_v24 = vld [vmem:[%s7377_s2 + $0x1c0] sm:$0xff]  ;;  %v4772_v26 = vld [vmem:[%s7377_s2 + $0x228] sm:$0xff] }
 0x77b   :  { %v2302_v40 = vadd.f32 %v5077_v27, %v2234_v44  ;;  %v4771_v27 = vld [vmem:[%s7377_s2 + $0x220] sm:$0xff] }
 0x77d   :  { %v2310_v29 = vadd.f32 %v2302_v40, %v6549_v38  ;;  %v4770_v40 = vld [vmem:[%s7377_s2 + $0x218] sm:$0xff] }
 0x77f   :  { %v2312_v34 = vsel %vm162_vm0, %v2310_v29, 0.0 }
 0x780   :  { %2313 = vadd.xlane.f32.xlu0 %v2312_v34  ;;  %v4768_v34 = vld [vmem:[%s7377_s2 + $0x208] sm:$0xff] }
 0x784   :  { %v5078_v30 = vpop.f32.mrf.mxu1 }
 0x786   :  { %v5079_v32 = vpop.f32.mrf.mxu1 }
 0x787   :  { %v5080_v33 = vadd.f32 %v5079_v32, %v5078_v30  ;;  %v4767_v30 = vld [vmem:[%s7377_s2 + $0x200] sm:$0xff]  ;;  %v4782_v32 = vld [vmem:[%s7377_s2 + $0x278] sm:$0xff] }
 0x789   :  { %v2307_v35 = vadd.f32 %v5080_v33, %v2234_v44  ;;  %v4773_v44 = vld [vmem:[%s7377_s2 + $0x230] sm:$0xff] }
 0x78a   :  { %v4781_v33 = vld [vmem:[%s7377_s2 + $0x270] sm:$0xff] }
 0x78b   :  { %v2311_v36 = vadd.f32 %v2307_v35, %v6554_v45  ;;  %v4758_v45 = vld [vmem:[%s7377_s2 + $0x1b8] sm:$0xff]  ;;  %v4780_v35 = vld [vmem:[%s7377_s2 + $0x268] sm:$0xff] }
 0x78c   :  { %5576 = vmatpush3.msra.mxu0 %v4758_v45  ;;  %5614 = vmatpush3.msra.mxu1 %v4758_v45  ;;  %v4783_v45 = vld [vmem:[%s7377_s2 + $0x280] sm:$0xff] }
 0x78d   :  { %v2315_v43 = vsel %vm162_vm0, %v2311_v36, 0.0  ;;  %5577 = vmatprep.subr.mxu0 %v5996_v2  ;;  %5615 = vmatprep.subr.mxu1 %v5996_v2 }
 0x78e   :  { %2316 = vadd.xlane.f32.xlu1 %v2315_v43  ;;  %5578 = vmatpush3.msra.mxu0 %v4757_v55  ;;  %v4778_v43 = vld [vmem:[%s7377_s2 + $0x258] sm:$0xff] }
 0x78f   :  { %5616 = vmatpush3.msra.mxu1 %v4757_v55  ;;  %5579 = vmatprep.subr.mxu0 %v5996_v2  ;;  %v4798_v55 = vld [vmem:[%s7377_s2 + $0x2f8] sm:$0xff] }
 0x790   :  { %5617 = vmatprep.subr.mxu1 %v5996_v2  ;;  %5580 = vmatpush3.msra.mxu0 %v4756_v56 }
 0x791   :  { %5618 = vmatpush3.msra.mxu1 %v4756_v56  ;;  %5581 = vmatprep.subr.mxu0 %v5996_v2  ;;  %v4797_v56 = vld [vmem:[%s7377_s2 + $0x2f0] sm:$0xff] }
 0x792   :  { %5619 = vmatprep.subr.mxu1 %v5996_v2  ;;  %5582 = vmatpush3.msra.mxu0 %v4755_v57 }
 0x793   :  { %5620 = vmatpush3.msra.mxu1 %v4755_v57  ;;  %5583 = vmatprep.subr.mxu0 %v5996_v2  ;;  %v4796_v57 = vld [vmem:[%s7377_s2 + $0x2e8] sm:$0xff] }
 0x794   :  { %5621 = vmatprep.subr.mxu1 %v5996_v2  ;;  %5584 = vmatpush3.msra.mxu0 %v4754_v58 }
 0x795   :  { %5622 = vmatpush3.msra.mxu1 %v4754_v58  ;;  %5585 = vmatprep.subr.mxu0 %v5996_v2  ;;  %v4795_v58 = vld [vmem:[%s7377_s2 + $0x2e0] sm:$0xff] }
 0x796   :  { %5623 = vmatprep.subr.mxu1 %v5996_v2  ;;  %5586 = vmatpush3.msra.mxu0 %v4753_v59 }
 0x797   :  { %5624 = vmatpush3.msra.mxu1 %v4753_v59  ;;  %5587 = vmatprep.subr.mxu0 %v5996_v2  ;;  %v4794_v59 = vld [vmem:[%s7377_s2 + $0x2d8] sm:$0xff] }
 0x798   :  { %5625 = vmatprep.subr.mxu1 %v5996_v2  ;;  %5588 = vmatpush3.msra.mxu0 %v4752_v60 }
 0x799   :  { %5626 = vmatpush3.msra.mxu1 %v4752_v60  ;;  %5589 = vmatprep.subr.mxu0 %v5996_v2  ;;  %v4793_v60 = vld [vmem:[%s7377_s2 + $0x2d0] sm:$0xff] }
 0x79a   :  { %5627 = vmatprep.subr.mxu1 %v5996_v2  ;;  %5590 = vmatpush3.msra.mxu0 %v4751_v61 }
 0x79b   :  { %5628 = vmatpush3.msra.mxu1 %v4751_v61  ;;  %5594 = vmatprep.subr.mxu0 %v5996_v2  ;;  %v4792_v61 = vld [vmem:[%s7377_s2 + $0x2c8] sm:$0xff] }
 0x79c   :  { %5651 = vmatprep.subr.mxu1 %v5996_v2 }
 0x809   :  { %v2314_v46 = vpop.xlane.xlu0 %2313 }
 0x80a   :  { %v2318_v47 = vmul.f32 0.015625, %v2314_v46  ;;  %v4777_v46 = vld [vmem:[%s7377_s2 + $0x250] sm:$0xff] }
 0x80c   :  { %v2320_v48 = vsub.f32 %v2310_v29, %v2318_v47  ;;  %v4769_v29 = vld [vmem:[%s7377_s2 + $0x210] sm:$0xff]  ;;  %v4776_v47 = vld [vmem:[%s7377_s2 + $0x248] sm:$0xff] }
 0x80e   :  { %v2322_v49 = vmul.f32 %v2320_v48, %v2320_v48 }
 0x810   :  { %v2324_v50 = vsel %vm162_vm0, %v2322_v49, 0.0  ;;  %v4775_v49 = vld [vmem:[%s7377_s2 + $0x240] sm:$0xff] }
 0x811   :  { %2325 = vadd.xlane.f32.xlu0 %v2324_v50  ;;  %v4789_v50 = vld [vmem:[%s7377_s2 + $0x2b0] sm:$0xff] }
 0x817   :  { %v2317_v38 = vpop.xlane.xlu1 %2316 }
 0x818   :  { %v2319_v51 = vmul.f32 0.015625, %v2317_v38  ;;  %v4788_v38 = vld [vmem:[%s7377_s2 + $0x2a8] sm:$0xff] }
 0x81a   :  { %v6709_v52 = vsub.f32 %v2311_v36, %v2319_v51  ;;  %v4779_v36 = vld [vmem:[%s7377_s2 + $0x260] sm:$0xff] }
 0x81b   :  { %v4787_v51 = vld [vmem:[%s7377_s2 + $0x2a0] sm:$0xff] }
 0x81c   :  { %v2323_v53 = vmul.f32 %v6709_v52, %v6709_v52 }
 0x81e   :  { %v2327_v54 = vsel %vm162_vm0, %v2323_v53, 0.0  ;;  %v4785_v53 = vld [vmem:[%s7377_s2 + $0x290] sm:$0xff] }
 0x81f   :  { %2328 = vadd.xlane.f32.xlu1 %v2327_v54  ;;  %v4784_v54 = vld [vmem:[%s7377_s2 + $0x288] sm:$0xff] }
 0x89a   :  { %v2326_v62 = vpop.xlane.xlu0 %2325 }
 0x89b   :  { %v2330_v17 = vmul.f32 0.015625, %v2326_v62  ;;  %v4791_v62 = vld [vmem:[%s7377_s2 + $0x2c0] sm:$0xff] }
 0x89d   :  { %v2332_v63 = vadd.f32 1e-12, %v2330_v17 }
 0x89f   :  { %5928 = vrsqrt.f32 %v2332_v63 }
 0x8a8   :  { %v2329_v22 = vpop.xlane.xlu1 %2328 }
 0x8a9   :  { %v2331_v3 = vmul.f32 0.015625, %v2329_v22 }
 0x8ab   :  { %v2333_v5 = vadd.f32 1e-12, %v2331_v3 }
 0x8ac   :  { %v5929_v6 = vpop.eup %5928 }
 0x8ad   :  { %v2336_v7 = vmul.f32 %v5929_v6, %v2320_v48  ;;  %5930 = vrsqrt.f32 %v2333_v5  ;;  %v4790_v48 = vld [vmem:[%s7377_s2 + $0x2b8] sm:$0xff]  ;;  %v4869_v6 = vld [vmem:[%s7378_s3 + $0x8] ss:$0 sm:$0xff] }
 0x8af   :  { %v2342_v18 = vmul.f32 %v2341_v4, %v2336_v7  ;;  %v4863_v7 = vld [vmem:[%s7378_s3 + $0x6] ss:$0 sm:$0xff] }
 0x8b1   :  { %v6762_v9 = vadd.f32 %v2347_v25, %v2342_v18 }
 0x8b3   :  { %2350 = vst.msk [vmem:[#allocation2] sm:$0xff] %vm162_vm0, %v6762_v9  ;;  %5592 = vmatmul.mubr.msk.f32.vlgmr.msra.gmra.mxu0 %vm162_vm0, %v6762_v9 }
 0x8b4   :  { %5595 = vmatpush3.msra.mxu0 %v4766_v10  ;;  %5610 = vmatprep.mubr.msk.f32.mxu0 %vm5997_vm1, %v5996_v2 }
 0x8b5   :  { %5596 = vmatprep.subr.mxu0 %v5996_v2 }
 0x8b6   :  { %5597 = vmatpush3.msra.mxu0 %v4765_v23 }
 0x8b7   :  { %5598 = vmatprep.subr.mxu0 %v5996_v2 }
 0x8b8   :  { %5599 = vmatpush3.msra.mxu0 %v4764_v42 }
 0x8b9   :  { %5600 = vmatprep.subr.mxu0 %v5996_v2 }
 0x8ba   :  { %v5931_v20 = vpop.eup %5930  ;;  %5601 = vmatpush3.msra.mxu0 %v4763_v11 }
 0x8bb   :  { %v2337_v8 = vmul.f32 %v5931_v20, %v6709_v52  ;;  %5602 = vmatprep.subr.mxu0 %v5996_v2  ;;  %v4786_v52 = vld [vmem:[%s7377_s2 + $0x298] sm:$0xff]  ;;  %v4870_v20 = vld [vmem:[%s7378_s3 + $0x9] ss:$0 sm:$0xff] }
 0x8bc   :  { %5603 = vmatpush3.msra.mxu0 %v4762_v12 }
 0x8bd   :  { %v2343_v15 = vmul.f32 %v2341_v4, %v2337_v8  ;;  %5604 = vmatprep.subr.mxu0 %v5996_v2 }
 0x8be   :  { %5605 = vmatpush3.msra.mxu0 %v4761_v14 }
 0x8bf   :  { %v6797_v21 = vadd.f32 %v2347_v25, %v2343_v15  ;;  %5606 = vmatprep.subr.mxu0 %v5996_v2  ;;  %v4864_v15 = vld [vmem:[%s7378_s3 + $0x7] ss:$0 sm:$0xff] }
 0x8c0   :  { %5607 = vmatpush3.msra.mxu0 %v4760_v19 }
 0x8c1   :  { %2351 = vst.msk [vmem:[#allocation2 + $0x8] sm:$0xff] %vm162_vm0, %v6797_v21  ;;  %5608 = vmatprep.subr.mxu0 %v5996_v2  ;;  %5630 = vmatmul.mubr.msk.f32.vlgmr.msra.gmra.mxu1 %vm162_vm0, %v6797_v21 }
 0x8c2   :  { %5652 = vmatpush3.msra.mxu1 %v4774_v16  ;;  %5609 = vmatpush3.msra.mxu0 %v4759_v24 }
 0x8c3   :  { %5653 = vmatprep.subr.mxu1 %v5996_v2  ;;  %5611 = vmatmul.mubr.msk.f32.vlgmr.msra.gmra.mxu0 %vm162_vm0, %v6762_v9 }
 0x8c4   :  { %5632 = vmatprep.subr.mxu0 %v5996_v2  ;;  %5654 = vmatpush3.msra.mxu1 %v4773_v44 }
 0x8c5   :  { %5633 = vmatpush3.msra.mxu0 %v4766_v10  ;;  %5655 = vmatprep.subr.mxu1 %v5996_v2 }
 0x8c6   :  { %5634 = vmatprep.subr.mxu0 %v5996_v2  ;;  %5656 = vmatpush3.msra.mxu1 %v4772_v26 }
 0x8c7   :  { %5635 = vmatpush3.msra.mxu0 %v4765_v23  ;;  %5657 = vmatprep.subr.mxu1 %v5996_v2 }
 0x8c8   :  { %5636 = vmatprep.subr.mxu0 %v5996_v2  ;;  %5658 = vmatpush3.msra.mxu1 %v4771_v27 }
 0x8c9   :  { %5637 = vmatpush3.msra.mxu0 %v4764_v42  ;;  %5659 = vmatprep.subr.mxu1 %v5996_v2 }
 0x8ca   :  { %5638 = vmatprep.subr.mxu0 %v5996_v2  ;;  %5660 = vmatpush3.msra.mxu1 %v4770_v40 }
 0x8cb   :  { %5639 = vmatpush3.msra.mxu0 %v4763_v11  ;;  %5661 = vmatprep.subr.mxu1 %v5996_v2 }
 0x8cc   :  { %5640 = vmatprep.subr.mxu0 %v5996_v2  ;;  %5662 = vmatpush3.msra.mxu1 %v4769_v29 }
 0x8cd   :  { %5641 = vmatpush3.msra.mxu0 %v4762_v12  ;;  %5663 = vmatprep.subr.mxu1 %v5996_v2 }
 0x8ce   :  { %5642 = vmatprep.subr.mxu0 %v5996_v2  ;;  %5664 = vmatpush3.msra.mxu1 %v4768_v34 }
 0x8cf   :  { %5643 = vmatpush3.msra.mxu0 %v4761_v14  ;;  %5665 = vmatprep.subr.mxu1 %v5996_v2 }
 0x8d0   :  { %5644 = vmatprep.subr.mxu0 %v5996_v2  ;;  %5666 = vmatpush3.msra.mxu1 %v4767_v30 }
 0x8d1   :  { %5667 = vmatprep.mubr.msk.f32.mxu1 %vm5997_vm1, %v5996_v2  ;;  %5645 = vmatpush3.msra.mxu0 %v4760_v19 }
 0x8d2   :  { %5668 = vmatmul.mubr.msk.f32.vlgmr.msra.gmra.mxu1 %vm162_vm0, %v6762_v9  ;;  %5689 = vmatprep.subr.mxu1 %v5996_v2 }
 0x8d3   :  { %5646 = vmatprep.subr.mxu0 %v5996_v2  ;;  %5690 = vmatpush3.msra.mxu1 %v4774_v16 }
 0x8d4   :  { %5647 = vmatpush3.msra.mxu0 %v4759_v24  ;;  %5648 = vmatprep.mubr.msk.f32.mxu0 %vm5997_vm1, %v5996_v2 }
 0x8d5   :  { %5691 = vmatprep.subr.mxu1 %v5996_v2  ;;  %5649 = vmatmul.mubr.msk.f32.vlgmr.msra.gmra.mxu0 %vm162_vm0, %v6797_v21 }
 0x8d6   :  { %5670 = vmatprep.subr.mxu0 %v5996_v2  ;;  %5692 = vmatpush3.msra.mxu1 %v4773_v44 }
 0x8d7   :  { %5671 = vmatpush3.msra.mxu0 %v4782_v32  ;;  %5693 = vmatprep.subr.mxu1 %v5996_v2 }
 0x8d8   :  { %5672 = vmatprep.subr.mxu0 %v5996_v2  ;;  %5694 = vmatpush3.msra.mxu1 %v4772_v26 }
 0x8d9   :  { %5673 = vmatpush3.msra.mxu0 %v4781_v33  ;;  %5695 = vmatprep.subr.mxu1 %v5996_v2 }
 0x8da   :  { %5674 = vmatprep.subr.mxu0 %v5996_v2  ;;  %5696 = vmatpush3.msra.mxu1 %v4771_v27  ;;  %v4875_v27 = vld [vmem:[%s7378_s3 + $0xa] ss:$0 sm:$0xff] }
 0x8db   :  { %5675 = vmatpush3.msra.mxu0 %v4780_v35  ;;  %5697 = vmatprep.subr.mxu1 %v5996_v2 }
 0x8dc   :  { %5676 = vmatprep.subr.mxu0 %v5996_v2  ;;  %5698 = vmatpush3.msra.mxu1 %v4770_v40 }
 0x8dd   :  { %5677 = vmatpush3.msra.mxu0 %v4779_v36  ;;  %5699 = vmatprep.subr.mxu1 %v5996_v2 }
 0x8de   :  { %5678 = vmatprep.subr.mxu0 %v5996_v2  ;;  %5700 = vmatpush3.msra.mxu1 %v4769_v29 }
 0x8df   :  { %5679 = vmatpush3.msra.mxu0 %v4778_v43  ;;  %5701 = vmatprep.subr.mxu1 %v5996_v2 }
 0x8e0   :  { %5680 = vmatprep.subr.mxu0 %v5996_v2  ;;  %5702 = vmatpush3.msra.mxu1 %v4768_v34 }
 0x8e1   :  { %5681 = vmatpush3.msra.mxu0 %v4777_v46  ;;  %5703 = vmatprep.subr.mxu1 %v5996_v2 }
 0x8e2   :  { %5682 = vmatprep.subr.mxu0 %v5996_v2  ;;  %5704 = vmatpush3.msra.mxu1 %v4767_v30 }
 0x8e3   :  { %5705 = vmatprep.mubr.msk.f32.mxu1 %vm5997_vm1, %v5996_v2  ;;  %5683 = vmatpush3.msra.mxu0 %v4776_v47 }
 0x8e4   :  { %5706 = vmatmul.mubr.msk.f32.vlgmr.msra.gmra.mxu1 %vm162_vm0, %v6797_v21  ;;  %5727 = vmatprep.subr.mxu1 %v5996_v2 }
 0x8e5   :  { %5684 = vmatprep.subr.mxu0 %v5996_v2  ;;  %5728 = vmatpush3.msra.mxu1 %v4790_v48 }
 0x8e6   :  { %5685 = vmatpush3.msra.mxu0 %v4775_v49  ;;  %5686 = vmatprep.mubr.msk.f32.mxu0 %vm5997_vm1, %v5996_v2 }
 0x8e7   :  { %5729 = vmatprep.subr.mxu1 %v5996_v2  ;;  %5687 = vmatmul.mubr.msk.f32.vlgmr.msra.gmra.mxu0 %vm162_vm0, %v6762_v9 }
 0x8e8   :  { %5708 = vmatprep.subr.mxu0 %v5996_v2  ;;  %5730 = vmatpush3.msra.mxu1 %v4789_v50 }
 0x8e9   :  { %5709 = vmatpush3.msra.mxu0 %v4782_v32  ;;  %5731 = vmatprep.subr.mxu1 %v5996_v2 }
 0x8ea   :  { %5710 = vmatprep.subr.mxu0 %v5996_v2  ;;  %5732 = vmatpush3.msra.mxu1 %v4788_v38 }
 0x8eb   :  { %5711 = vmatpush3.msra.mxu0 %v4781_v33  ;;  %5733 = vmatprep.subr.mxu1 %v5996_v2 }
 0x8ec   :  { %5712 = vmatprep.subr.mxu0 %v5996_v2  ;;  %5734 = vmatpush3.msra.mxu1 %v4787_v51 }
 0x8ed   :  { %5713 = vmatpush3.msra.mxu0 %v4780_v35  ;;  %5735 = vmatprep.subr.mxu1 %v5996_v2 }
 0x8ee   :  { %5714 = vmatprep.subr.mxu0 %v5996_v2  ;;  %5736 = vmatpush3.msra.mxu1 %v4786_v52 }
 0x8ef   :  { %5715 = vmatpush3.msra.mxu0 %v4779_v36  ;;  %5737 = vmatprep.subr.mxu1 %v5996_v2 }
 0x8f0   :  { %5716 = vmatprep.subr.mxu0 %v5996_v2  ;;  %5738 = vmatpush3.msra.mxu1 %v4785_v53 }
 0x8f1   :  { %5717 = vmatpush3.msra.mxu0 %v4778_v43  ;;  %5739 = vmatprep.subr.mxu1 %v5996_v2  ;;  %v4876_v43 = vld [vmem:[%s7378_s3 + $0xb] ss:$0 sm:$0xff] }
 0x8f2   :  { %5718 = vmatprep.subr.mxu0 %v5996_v2  ;;  %5740 = vmatpush3.msra.mxu1 %v4784_v54 }
 0x8f3   :  { %5719 = vmatpush3.msra.mxu0 %v4777_v46  ;;  %5741 = vmatprep.subr.mxu1 %v5996_v2 }
 0x8f4   :  { %5720 = vmatprep.subr.mxu0 %v5996_v2  ;;  %5742 = vmatpush3.msra.mxu1 %v4783_v45 }
 0x8f5   :  { %5743 = vmatprep.mubr.msk.f32.mxu1 %vm5997_vm1, %v5996_v2  ;;  %5721 = vmatpush3.msra.mxu0 %v4776_v47 }
 0x8f6   :  { %5744 = vmatmul.mubr.msk.f32.vlgmr.msra.gmra.mxu1 %vm162_vm0, %v6762_v9  ;;  %5765 = vmatprep.subr.mxu1 %v5996_v2 }
 0x8f7   :  { %5722 = vmatprep.subr.mxu0 %v5996_v2  ;;  %5766 = vmatpush3.msra.mxu1 %v4790_v48 }
 0x8f8   :  { %5723 = vmatpush3.msra.mxu0 %v4775_v49  ;;  %5724 = vmatprep.mubr.msk.f32.mxu0 %vm5997_vm1, %v5996_v2 }
 0x8f9   :  { %5767 = vmatprep.subr.mxu1 %v5996_v2  ;;  %5725 = vmatmul.mubr.msk.f32.vlgmr.msra.gmra.mxu0 %vm162_vm0, %v6797_v21 }
 0x8fa   :  { %5746 = vmatprep.subr.mxu0 %v5996_v2  ;;  %5768 = vmatpush3.msra.mxu1 %v4789_v50 }
 0x8fb   :  { %5747 = vmatpush3.msra.mxu0 %v4798_v55  ;;  %5769 = vmatprep.subr.mxu1 %v5996_v2 }
 0x8fc   :  { %5748 = vmatprep.subr.mxu0 %v5996_v2  ;;  %5770 = vmatpush3.msra.mxu1 %v4788_v38 }
 0x8fd   :  { %5749 = vmatpush3.msra.mxu0 %v4797_v56  ;;  %5771 = vmatprep.subr.mxu1 %v5996_v2 }
 0x8fe   :  { %5750 = vmatprep.subr.mxu0 %v5996_v2  ;;  %5772 = vmatpush3.msra.mxu1 %v4787_v51 }
 0x8ff   :  { %5751 = vmatpush3.msra.mxu0 %v4796_v57  ;;  %5773 = vmatprep.subr.mxu1 %v5996_v2 }
 0x900   :  { %5752 = vmatprep.subr.mxu0 %v5996_v2  ;;  %5774 = vmatpush3.msra.mxu1 %v4786_v52 }
 0x901   :  { %5753 = vmatpush3.msra.mxu0 %v4795_v58  ;;  %5775 = vmatprep.subr.mxu1 %v5996_v2 }
 0x902   :  { %5754 = vmatprep.subr.mxu0 %v5996_v2  ;;  %5776 = vmatpush3.msra.mxu1 %v4785_v53 }
 0x903   :  { %5755 = vmatpush3.msra.mxu0 %v4794_v59  ;;  %5777 = vmatprep.subr.mxu1 %v5996_v2 }
 0x904   :  { %5756 = vmatprep.subr.mxu0 %v5996_v2  ;;  %5778 = vmatpush3.msra.mxu1 %v4784_v54  ;;  %v5972_v54 = vld [vmem:[%s7376_s1] ss:$0 sm:$0xff] }
 0x905   :  { %5757 = vmatpush3.msra.mxu0 %v4793_v60  ;;  %5779 = vmatprep.subr.mxu1 %v5996_v2 }
 0x906   :  { %5758 = vmatprep.subr.mxu0 %v5996_v2  ;;  %5780 = vmatpush3.msra.mxu1 %v4783_v45 }
 0x907   :  { %5781 = vmatprep.mubr.msk.f32.mxu1 %vm5997_vm1, %v5996_v2  ;;  %5759 = vmatpush3.msra.mxu0 %v4792_v61 }
 0x908   :  { %5782 = vmatmul.mubr.msk.f32.vlgmr.msra.gmra.mxu1 %vm162_vm0, %v6797_v21  ;;  %5760 = vmatprep.subr.mxu0 %v5996_v2 }
 0x909   :  { %5761 = vmatpush3.msra.mxu0 %v4791_v62  ;;  %5762 = vmatprep.mubr.msk.f32.mxu0 %vm5997_vm1, %v5996_v2 }
 0x90a   :  { %5763 = vmatmul.mubr.msk.f32.vlgmr.msra.gmra.mxu0 %vm162_vm0, %v6762_v9  ;;  %5784 = vmatprep.subr.mxu0 %v5996_v2 }
 0x90b   :  { %5785 = vmatpush3.msra.mxu0 %v4798_v55  ;;  %5800 = vmatprep.mubr.msk.f32.mxu0 %vm5997_vm1, %v5996_v2 }
 0x90c   :  { %5786 = vmatprep.subr.mxu0 %v5996_v2  ;;  %5803 = vmatprep.subr.mxu1 %v5996_v2 }
 0x90d   :  { %5787 = vmatpush3.msra.mxu0 %v4797_v56  ;;  %5805 = vmatprep.mubr.msk.f32.mxu1 %vm5997_vm1, %v5996_v2 }
 0x90e   :  { %5788 = vmatprep.subr.mxu0 %v5996_v2 }
 0x90f   :  { %5789 = vmatpush3.msra.mxu0 %v4796_v57 }
 0x910   :  { %5790 = vmatprep.subr.mxu0 %v5996_v2 }
 0x911   :  { %5791 = vmatpush3.msra.mxu0 %v4795_v58 }
 0x912   :  { %5792 = vmatprep.subr.mxu0 %v5996_v2 }
 0x913   :  { %5793 = vmatpush3.msra.mxu0 %v4794_v59 }
 0x914   :  { %5794 = vmatprep.subr.mxu0 %v5996_v2 }
 0x915   :  { %5795 = vmatpush3.msra.mxu0 %v4793_v60 }
 0x916   :  { %5796 = vmatprep.subr.mxu0 %v5996_v2 }
 0x917   :  { %5797 = vmatpush3.msra.mxu0 %v4792_v61 }
 0x918   :  { %5798 = vmatprep.subr.mxu0 %v5996_v2 }
 0x919   :  { %5799 = vmatpush3.msra.mxu0 %v4791_v62  ;;  %v5973_v62 = vld [vmem:[%s7376_s1 + $0x1] ss:$0 sm:$0xff] }
 0x91a   :  { %5801 = vmatmul.mubr.msk.f32.vlgmr.msra.gmra.mxu0 %vm162_vm0, %v6797_v21  ;;  %5823 = vmatprep.subr.mxu0 %v5996_v2 }
 0x91b   :  { %5825 = vmatprep.mubr.msk.f32.mxu0 %vm5997_vm1, %v5996_v2 }
 0x973   :  { %v2555_v17 = vpop.f32.mrf.mxu0 }
 0x974   :  { %v2556_v42 = vadd.f32 %v4863_v7, %v2555_v17 }
 0x975   :  { %v5593_v63 = vpop.f32.mrf.mxu0 }
 0x981   :  { %v2698_v22 = vpop.f32.mrf.mxu1 }
 0x982   :  { %v2699_v26 = vadd.f32 %v4863_v7, %v2698_v22 }
 0x983   :  { %v2625_v3 = vpop.f32.mrf.mxu0  ;;  %v5631_v4 = vpop.f32.mrf.mxu1 }
 0x984   :  { %v2626_v24 = vadd.f32 %v4864_v15, %v2625_v3 }
 0x985   :  { %v5612_v5 = vpop.f32.mrf.mxu0 }
 0x992   :  { %v2850_v25 = vpop.f32.mrf.mxu1 }
 0x993   :  { %v2851_v18 = vadd.f32 %v4869_v6, %v2850_v25 }
 0x994   :  { %v5669_v10 = vpop.f32.mrf.mxu1 }
 0x995   :  { %v2768_v23 = vpop.f32.mrf.mxu0  ;;  %5804 = vmatpush3.xpose.msk.msra.mxu1 %vm1045_vm2, %v2851_v18 }
 0x996   :  { %5808 = vmatprep.subr.mxu1 %v5996_v2  ;;  %v2769_v35 = vadd.f32 %v4864_v15, %v2768_v23 }
 0x997   :  { %v5650_v11 = vpop.f32.mrf.mxu0 }
 0x998   :  { %5806 = vmatmul.mubr.msk.f32.vlgmr.msra.gmra.mxu1 %vm1045_vm2, %v2556_v42 }
 0x999   :  { %5810 = vmatprep.mubr.msk.f32.mxu1 %vm5997_vm1, %v5996_v2 }
 0x9a4   :  { %v2990_v12 = vpop.f32.mrf.mxu1 }
 0x9a5   :  { %v2991_v44 = vadd.f32 %v4869_v6, %v2990_v12 }
 0x9a6   :  { %v5707_v8 = vpop.f32.mrf.mxu1 }
 0x9a7   :  { %v2920_v14 = vpop.f32.mrf.mxu0 }
 0x9a8   :  { %v2921_v19 = vadd.f32 %v4870_v20, %v2920_v14 }
 0x9a9   :  { %v5688_v16 = vpop.f32.mrf.mxu0 }
 0x9aa   :  { %5809 = vmatpush3.xpose.msk.msra.mxu1 %vm1045_vm2, %v2921_v19 }
 0x9ab   :  { %5813 = vmatprep.subr.mxu1 %v5996_v2 }
 0x9ad   :  { %5811 = vmatmul.mubr.msk.f32.vlgmr.msra.gmra.mxu1 %vm1045_vm2, %v2626_v24 }
 0x9ae   :  { %5814 = vmatpush3.xpose.msk.msra.mxu1 %vm1045_vm2, %v2991_v44  ;;  %5815 = vmatprep.mubr.msk.f32.mxu1 %vm5997_vm1, %v5996_v2 }
 0x9af   :  { %5818 = vmatprep.subr.mxu1 %v5996_v2 }
 0x9b1   :  { %5816 = vmatmul.mubr.msk.f32.vlgmr.msra.gmra.mxu1 %vm1045_vm2, %v2699_v26 }
 0x9b2   :  { %5820 = vmatprep.mubr.msk.f32.mxu1 %vm5997_vm1, %v5996_v2 }
 0x9b6   :  { %v3142_v40 = vpop.f32.mrf.mxu1 }
 0x9b7   :  { %v3143_v29 = vadd.f32 %v4875_v27, %v3142_v40 }
 0x9b8   :  { %v5745_v34 = vpop.f32.mrf.mxu1 }
 0x9b9   :  { %v3060_v30 = vpop.f32.mrf.mxu0  ;;  %5824 = vmatpush3.msra.mxu0 %v3143_v29 }
 0x9ba   :  { %v3061_v32 = vadd.f32 %v4870_v20, %v3060_v30  ;;  %5833 = vmatprep.subr.mxu0 %v5996_v2 }
 0x9bb   :  { %v5726_v33 = vpop.f32.mrf.mxu0 }
 0x9bc   :  { %5819 = vmatpush3.xpose.msk.msra.mxu1 %vm1045_vm2, %v3061_v32 }
 0x9bd   :  { %5828 = vmatprep.subr.mxu1 %v5996_v2 }
 0x9bf   :  { %5821 = vmatmul.mubr.msk.f32.vlgmr.msra.gmra.mxu1 %vm1045_vm2, %v2769_v35 }
 0x9c0   :  { %5830 = vmatprep.mubr.msk.f32.mxu1 %vm5997_vm1, %v5996_v2 }
 0x9c8   :  { %v3282_v36 = vpop.f32.mrf.mxu1 }
 0x9c9   :  { %v7058_v46 = vadd.f32 %v4875_v27, %v3282_v36 }
 0x9ca   :  { %v5783_v47 = vpop.f32.mrf.mxu1  ;;  %v3212_v48 = vpop.f32.mrf.mxu0 }
 0x9cb   :  { %v3213_v49 = vadd.f32 %v4876_v43, %v3212_v48 }
 0x9cc   :  { %v5764_v50 = vpop.f32.mrf.mxu0 }
 0x9cd   :  { %5829 = vmatpush3.msra.mxu1 %v3213_v49  ;;  %v4808_v49 = vld [vmem:[%s7379_s4 + $0x58] sm:$0xff]  ;;  %v4807_v50 = vld [vmem:[%s7379_s4 + $0x50] sm:$0xff] }
 0x9ce   :  { %5838 = vmatprep.subr.mxu1 %v5996_v2 }
 0x9da   :  { %v3352_v38 = vpop.f32.mrf.mxu0 }
 0x9db   :  { %v7061_v51 = vadd.f32 %v4876_v43, %v3352_v38  ;;  %v4806_v38 = vld [vmem:[%s7379_s4 + $0x48] sm:$0xff] }
 0x9dc   :  { %v5802_v52 = vpop.f32.mrf.mxu0 }
 0xa58   :  { %v3428_v53 = vpop.f32.mrf.mxu1 }
 0xa59   :  { %v3429_v45 = vadd.f32 %v5972_v54, %v3428_v53  ;;  %v4805_v53 = vld [vmem:[%s7379_s4 + $0x40] sm:$0xff] }
 0xa5a   :  { %v5807_v55 = vpop.f32.mrf.mxu1 }
 0xa5b   :  { %v3660_v56 = vsel %vm1350_vm3, %v3429_v45, -inf  ;;  %v4810_v55 = vld [vmem:[%s7379_s4 + $0x68] sm:$0xff] }
 0xa5c   :  { %3661 = vmax.xlane.f32.xlu0 %v3660_v56  ;;  %v4809_v56 = vld [vmem:[%s7379_s4 + $0x60] sm:$0xff] }
 0xa6d   :  { %v3504_v57 = vpop.f32.mrf.mxu1 }
 0xa6e   :  { %v3505_v58 = vadd.f32 %v5972_v54, %v3504_v57  ;;  %v4812_v54 = vld [vmem:[%s7379_s4 + $0x78] sm:$0xff] }
 0xa6f   :  { %v5812_v59 = vpop.f32.mrf.mxu1 }
 0xa70   :  { %v3663_v60 = vsel %vm1350_vm3, %v3505_v58, -inf }
 0xa71   :  { %3664 = vmax.xlane.f32.xlu1 %v3663_v60  ;;  %v3580_v61 = vpop.f32.mrf.mxu1 }
 0xa72   :  { %v3581_v17 = vadd.f32 %v5973_v62, %v3580_v61 }
 0xa73   :  { %v5817_v63 = vpop.f32.mrf.mxu1 }
 0xa74   :  { %v3666_v22 = vsel %vm1350_vm3, %v3581_v17, -inf }
 0xa75   :  { %3667 = vmax.xlane.f32.xlu0 %v3666_v22 }
 0xa7f   :  { %v3656_v3 = vpop.f32.mrf.mxu1 }
 0xa80   :  { %v3657_v4 = vadd.f32 %v5973_v62, %v3656_v3 }
 0xa81   :  { %v5822_v5 = vpop.f32.mrf.mxu1 }
 0xa82   :  { %v3669_v6 = vsel %vm1350_vm3, %v3657_v4, -inf }
 0xa83   :  { %3670 = vmax.xlane.f32.xlu1 %v3669_v6 }
 0xae5   :  { %v3662_v25 = vpop.xlane.xlu0 %3661 }
 0xae6   :  { %v3672_v7 = vsub.f32 %v3429_v45, %v3662_v25  ;;  %v4811_v45 = vld [vmem:[%s7379_s4 + $0x70] sm:$0xff] }
 0xae8   :  { %v3676_v18 = vmul.f32 1.442695, %v3672_v7 }
 0xaea   :  { %5932 = vpow2.f32 %v3676_v18 }
 0xaf7   :  { %v5933_v10 = vpop.eup %5932 }
 0xaf8   :  { %v3684_v23 = vsel %vm1350_vm3, %v5933_v10, 0.0 }
 0xaf9   :  { %3685 = vadd.xlane.f32.xlu0 %v3684_v23 }
 0xafa   :  { %v3665_v42 = vpop.xlane.xlu1 %3664 }
 0xafb   :  { %v3673_v11 = vsub.f32 %v3505_v58, %v3665_v42 }
 0xafd   :  { %v3678_v12 = vmul.f32 1.442695, %v3673_v11 }
 0xafe   :  { %v3668_v20 = vpop.xlane.xlu0 %3667 }
 0xaff   :  { %5934 = vpow2.f32 %v3678_v12  ;;  %v3674_v8 = vsub.f32 %v3581_v17, %v3668_v20 }
 0xb01   :  { %v3680_v14 = vmul.f32 1.442695, %v3674_v8 }
 0xb03   :  { %5936 = vpow2.f32 %v3680_v14 }
 0xb0c   :  { %v5935_v15 = vpop.eup %5934  ;;  %v3671_v19 = vpop.xlane.xlu1 %3670 }
 0xb0d   :  { %v3675_v16 = vsub.f32 %v3657_v4, %v3671_v19  ;;  %v3687_v24 = vsel %vm1350_vm3, %v5935_v15, 0.0  ;;  %v7143_v4 = vld [vmem:[%s7382_s7 + $0x10] sm:$0x7f] }
 0xb0e   :  { %3688 = vadd.xlane.f32.xlu1 %v3687_v24  ;;  %v4297_v6 = vrot.slane %v7143_v4, %v1987_v41 }
 0xb0f   :  { %v3682_v44 = vmul.f32 1.442695, %v3675_v16 }
 0xb10   :  { %v5937_v26 = vpop.eup %5936 }
 0xb11   :  { %5938 = vpow2.f32 %v3682_v44  ;;  %v3690_v27 = vsel %vm1350_vm3, %v5937_v26, 0.0 }
 0xb12   :  { %3691 = vadd.xlane.f32.xlu0 %v3690_v27 }
 0xb1e   :  { %v5939_v40 = vpop.eup %5938 }
 0xb1f   :  { %v3693_v29 = vsel %vm1350_vm3, %v5939_v40, 0.0 }
 0xb20   :  { %3694 = vadd.xlane.f32.xlu1 %v3693_v29 }
 0xb82   :  { %v3686_v34 = vpop.xlane.xlu0 %3685 }
 0xb83   :  { %5940 = vrcp.f32 %v3686_v34 }
 0xb90   :  { %v5941_v30 = vpop.eup %5940 }
 0xb91   :  { %v3700_v32 = vmul.f32 %v5941_v30, %v5933_v10 }
 0xb93   :  { %5826 = vmatmul.mubr.msk.f32.vlgmr.msra.gmra.mxu0 %vm1350_vm3, %v3700_v32 }
 0xb94   :  { %5834 = vmatpush3.msra.mxu0 %v7058_v46  ;;  %5835 = vmatprep.mubr.msk.f32.mxu0 %vm5997_vm1, %v5996_v2 }
 0xb95   :  { %5843 = vmatprep.subr.mxu0 %v5996_v2 }
 0xb97   :  { %v3689_v33 = vpop.xlane.xlu1 %3688 }
 0xb98   :  { %5942 = vrcp.f32 %v3689_v33 }
 0xb9b   :  { %v3692_v35 = vpop.xlane.xlu0 %3691 }
 0xb9c   :  { %5944 = vrcp.f32 %v3692_v35 }
 0xba5   :  { %v5943_v36 = vpop.eup %5942 }
 0xba6   :  { %v3701_v43 = vmul.f32 %v5943_v36, %v5935_v15  ;;  %v4827_v36 = vld [vmem:[%s7380_s5 + $0xf0] sm:$0xff] }
 0xba8   :  { %5831 = vmatmul.mubr.msk.f32.vlgmr.msra.gmra.mxu1 %vm1350_vm3, %v3701_v43  ;;  %v4826_v43 = vld [vmem:[%s7380_s5 + $0xe8] sm:$0xff] }
 0xba9   :  { %v5945_v47 = vpop.eup %5944  ;;  %v3695_v48 = vpop.xlane.xlu1 %3694  ;;  %5839 = vmatpush3.msra.mxu1 %v7061_v51  ;;  %5840 = vmatprep.mubr.msk.f32.mxu1 %vm5997_vm1, %v5996_v2 }
 0xbaa   :  { %5946 = vrcp.f32 %v3695_v48  ;;  %v3702_v46 = vmul.f32 %v5945_v47, %v5937_v26  ;;  %5854 = vmatprep.subr.mxu1 %v5996_v2  ;;  %v4825_v47 = vld [vmem:[%s7380_s5 + $0xe0] sm:$0xff]  ;;  %v4824_v48 = vld [vmem:[%s7380_s5 + $0xd8] sm:$0xff] }
 0xbac   :  { %5836 = vmatmul.mubr.msk.f32.vlgmr.msra.gmra.mxu0 %vm1350_vm3, %v3702_v46  ;;  %v4823_v46 = vld [vmem:[%s7380_s5 + $0xd0] sm:$0xff] }
 0xbad   :  { %5844 = vmatpush3.msra.mxu0 %v4808_v49  ;;  %5851 = vmatprep.mubr.msk.f32.mxu0 %vm5997_vm1, %v5996_v2 }
 0xbae   :  { %5845 = vmatprep.subr.mxu0 %v5996_v2 }
 0xbaf   :  { %5846 = vmatpush3.msra.mxu0 %v4807_v50 }
 0xbb0   :  { %5847 = vmatprep.subr.mxu0 %v5996_v2 }
 0xbb1   :  { %5848 = vmatpush3.msra.mxu0 %v4806_v38 }
 0xbb2   :  { %5849 = vmatprep.subr.mxu0 %v5996_v2 }
 0xbb3   :  { %5850 = vmatpush3.msra.mxu0 %v4805_v53 }
 0xbb4   :  { %5865 = vmatprep.subr.mxu0 %v5996_v2 }
 0xbb7   :  { %v5947_v51 = vpop.eup %5946 }
 0xbb8   :  { %v3703_v52 = vmul.f32 %v5947_v51, %v5939_v40  ;;  %v4819_v51 = vld [vmem:[%s7380_s5 + $0xb0] sm:$0xff] }
 0xbba   :  { %5841 = vmatmul.mubr.msk.f32.vlgmr.msra.gmra.mxu1 %vm1350_vm3, %v3703_v52  ;;  %v4818_v52 = vld [vmem:[%s7380_s5 + $0xa8] sm:$0xff] }
 0xbbb   :  { %5862 = vmatprep.mubr.msk.f32.mxu1 %vm5997_vm1, %v5996_v2  ;;  %5855 = vmatpush3.msra.mxu1 %v4812_v54 }
 0xbbc   :  { %5856 = vmatprep.subr.mxu1 %v5996_v2 }
 0xbbd   :  { %5857 = vmatpush3.msra.mxu1 %v4811_v45 }
 0xbbe   :  { %5858 = vmatprep.subr.mxu1 %v5996_v2 }
 0xbbf   :  { %5859 = vmatpush3.msra.mxu1 %v4810_v55 }
 0xbc0   :  { %5860 = vmatprep.subr.mxu1 %v5996_v2 }
 0xbc1   :  { %5861 = vmatpush3.msra.mxu1 %v4809_v56 }
 0xbc2   :  { %5876 = vmatprep.subr.mxu1 %v5996_v2 }
 0xc53   :  { %v3773_v57 = vpop.f32.mrf.mxu0 }
 0xc54   :  { %5852 = vmatmul.mubr.msk.f32.vlgmr.msra.gmra.mxu0 %vm1045_vm2, %v3773_v57 }
 0xc55   :  { %v5827_v58 = vpop.f32.mrf.mxu0  ;;  %5866 = vmatpush3.msra.mxu0 %v4808_v49  ;;  %5873 = vmatprep.mubr.msk.f32.mxu0 %vm5997_vm1, %v5996_v2  ;;  %v4822_v49 = vld [vmem:[%s7380_s5 + $0xc8] sm:$0xff] }
 0xc56   :  { %5867 = vmatprep.subr.mxu0 %v5996_v2 }
 0xc57   :  { %5868 = vmatpush3.msra.mxu0 %v4807_v50  ;;  %v4821_v50 = vld [vmem:[%s7380_s5 + $0xc0] sm:$0xff] }
 0xc58   :  { %5869 = vmatprep.subr.mxu0 %v5996_v2 }
 0xc59   :  { %5870 = vmatpush3.msra.mxu0 %v4806_v38  ;;  %v4820_v38 = vld [vmem:[%s7380_s5 + $0xb8] sm:$0xff] }
 0xc5a   :  { %5871 = vmatprep.subr.mxu0 %v5996_v2 }
 0xc5b   :  { %5872 = vmatpush3.msra.mxu0 %v4805_v53  ;;  %v4817_v53 = vld [vmem:[%s7380_s5 + $0xa0] sm:$0xff] }
 0xc68   :  { %v3846_v59 = vpop.f32.mrf.mxu1 }
 0xc69   :  { %5863 = vmatmul.mubr.msk.f32.vlgmr.msra.gmra.mxu1 %vm1045_vm2, %v3846_v59 }
 0xc6a   :  { %v5832_v60 = vpop.f32.mrf.mxu1  ;;  %5877 = vmatpush3.msra.mxu1 %v4812_v54  ;;  %5884 = vmatprep.mubr.msk.f32.mxu1 %vm5997_vm1, %v5996_v2  ;;  %v4816_v54 = vld [vmem:[%s7380_s5 + $0x98] sm:$0xff] }
 0xc6b   :  { %5878 = vmatprep.subr.mxu1 %v5996_v2  ;;  %v4331_v60 = vrot.slane %v7143_v4, %v2022_v28 }
 0xc6c   :  { %v3919_v61 = vpop.f32.mrf.mxu0  ;;  %5879 = vmatpush3.msra.mxu1 %v4811_v45  ;;  %v4815_v45 = vld [vmem:[%s7380_s5 + $0x90] sm:$0xff] }
 0xc6d   :  { %5874 = vmatmul.mubr.msk.f32.vlgmr.msra.gmra.mxu0 %vm1045_vm2, %v3919_v61  ;;  %5880 = vmatprep.subr.mxu1 %v5996_v2 }
 0xc6e   :  { %v5837_v62 = vpop.f32.mrf.mxu0  ;;  %5881 = vmatpush3.msra.mxu1 %v4810_v55  ;;  %4418 = vmatprep.mubr.f32.mxu0 %v5996_v2  ;;  %v4814_v55 = vld [vmem:[%s7380_s5 + $0x88] sm:$0xff] }
 0xc6f   :  { %5882 = vmatprep.subr.mxu1 %v5996_v2 }
 0xc70   :  { %5883 = vmatpush3.msra.mxu1 %v4809_v56  ;;  %v4813_v56 = vld [vmem:[%s7380_s5 + $0x80] sm:$0xff] }
 0xc7a   :  { %v3992_v17 = vpop.f32.mrf.mxu1 }
 0xc7b   :  { %5885 = vmatmul.mubr.msk.f32.vlgmr.msra.gmra.mxu1 %vm1045_vm2, %v3992_v17 }
 0xc7c   :  { %v5842_v63 = vpop.f32.mrf.mxu1 }
 0xd14   :  { %v4065_v22 = vpop.f32.mrf.mxu0 }
 0xd15   :  { %v4288_v25 = vsel %vm162_vm0, %v4065_v22, 0.0  ;;  %v4337_v22 = vrot.slane %v7143_v4, %v2028_v31  ;;  %v4860_v31 = vld [vmem:[%s7381_s6 + $0x1f8] sm:$0xff] }
 0xd16   :  { %v5853_v3 = vpop.f32.mrf.mxu0  ;;  %5225 = vmatprep.subr.mxu1 %v4860_v31 }
 0xd29   :  { %v4138_v5 = vpop.f32.mrf.mxu1 }
 0xd2a   :  { %v4289_v7 = vsel %vm162_vm0, %v4138_v5, 0.0 }
 0xd2b   :  { %v4290_v18 = vadd.f32 %v4289_v7, %v4288_v25  ;;  %v5864_v10 = vpop.f32.mrf.mxu1 }
 0xd2c   :  { %v4844_v10 = vld [vmem:[%s7381_s6 + $0x178] sm:$0xff] }
 0xd2d   :  { %v4298_v23 = vadd.f32 %v4297_v6, %v4290_v18  ;;  %v4211_v42 = vpop.f32.mrf.mxu0  ;;  %5226 = vmatpush3.msra.mxu1 %v4844_v10 }
 0xd2e   :  { %v4291_v14 = vsel %vm162_vm0, %v4211_v42, 0.0  ;;  %v4858_v42 = vld [vmem:[%s7381_s6 + $0x1e8] sm:$0xff] }
 0xd2f   :  { %v5875_v11 = vpop.f32.mrf.mxu0  ;;  %v4300_v12 = vadd.f32 %v4298_v23, %v6762_v9  ;;  %v4843_v23 = vld [vmem:[%s7381_s6 + $0x170] sm:$0xff] }
 0xd30   :  { %v4842_v11 = vld [vmem:[%s7381_s6 + $0x168] sm:$0xff] }
 0xd31   :  { %v4302_v20 = vsel %vm162_vm0, %v4300_v12, 0.0 }
 0xd32   :  { %4303 = vadd.xlane.f32.xlu0 %v4302_v20  ;;  %v4841_v20 = vld [vmem:[%s7381_s6 + $0x160] sm:$0xff] }
 0xd3b   :  { %v4284_v8 = vpop.f32.mrf.mxu1 }
 0xd3c   :  { %v4292_v15 = vsel %vm162_vm0, %v4284_v8, 0.0  ;;  %v4856_v8 = vld [vmem:[%s7381_s6 + $0x1d8] sm:$0xff] }
 0xd3d   :  { %v4293_v41 = vadd.f32 %v4292_v15, %v4291_v14  ;;  %v5886_v19 = vpop.f32.mrf.mxu1  ;;  %v4840_v14 = vld [vmem:[%s7381_s6 + $0x158] sm:$0xff]  ;;  %v4855_v15 = vld [vmem:[%s7381_s6 + $0x1d0] sm:$0xff] }
 0xd3e   :  { %v4854_v19 = vld [vmem:[%s7381_s6 + $0x1c8] sm:$0xff] }
 0xd3f   :  { %v4299_v16 = vadd.f32 %v4297_v6, %v4293_v41  ;;  %v4839_v41 = vld [vmem:[%s7381_s6 + $0x150] sm:$0xff] }
 0xd41   :  { %v4301_v24 = vadd.f32 %v4299_v16, %v6797_v21  ;;  %v4828_v21 = vld [vmem:[%s7380_s5 + $0xf8] sm:$0xff]  ;;  %v4838_v16 = vld [vmem:[%s7381_s6 + $0x148] sm:$0xff] }
 0xd42   :  { %4370 = vmatprep.subr.mxu0 %v4828_v21  ;;  %v4847_v21 = vld [vmem:[%s7381_s6 + $0x190] sm:$0xff] }
 0xd43   :  { %v4305_v44 = vsel %vm162_vm0, %v4301_v24, 0.0  ;;  %4371 = vmatpush1.msra.mxu0 %v4827_v36  ;;  %v4831_v36 = vld [vmem:[%s7381_s6 + $0x110] sm:$0xff] }
 0xd44   :  { %4306 = vadd.xlane.f32.xlu1 %v4305_v44  ;;  %4372 = vmatprep.subr.mxu0 %v4826_v43  ;;  %v4837_v44 = vld [vmem:[%s7381_s6 + $0x140] sm:$0xff]  ;;  %v4846_v43 = vld [vmem:[%s7381_s6 + $0x188] sm:$0xff] }
 0xd45   :  { %4373 = vmatpush1.msra.mxu0 %v4825_v47  ;;  %v4830_v47 = vld [vmem:[%s7381_s6 + $0x108] sm:$0xff] }
 0xd46   :  { %4374 = vmatprep.subr.mxu0 %v4824_v48  ;;  %v4845_v48 = vld [vmem:[%s7381_s6 + $0x180] sm:$0xff] }
 0xd47   :  { %4375 = vmatpush1.msra.mxu0 %v4823_v46  ;;  %v4829_v46 = vld [vmem:[%s7381_s6 + $0x100] sm:$0xff] }
 0xd48   :  { %4376 = vmatprep.subr.mxu0 %v4822_v49  ;;  %v4862_v49 = vld [vmem:[%s7382_s7 + $0x18] sm:$0x7f] }
 0xd49   :  { %4377 = vmatpush1.msra.mxu0 %v4821_v50  ;;  %v4343_v50 = vrot.slane %v7143_v4, %v6658_v13 }
 0xd4a   :  { %4378 = vmatprep.subr.mxu0 %v4820_v38  ;;  %v4347_v38 = vrot.slane %v4862_v49, %v6658_v13 }
 0xd4b   :  { %4379 = vmatpush1.msra.mxu0 %v4819_v51 }
 0xd4c   :  { %4380 = vmatprep.subr.mxu0 %v4818_v52 }
 0xd4d   :  { %4381 = vmatpush1.msra.mxu0 %v4817_v53 }
 0xd4e   :  { %4382 = vmatprep.subr.mxu0 %v4816_v54 }
 0xd4f   :  { %4383 = vmatpush1.msra.mxu0 %v4815_v45 }
 0xd50   :  { %4384 = vmatprep.subr.mxu0 %v4814_v55 }
 0xd51   :  { %4385 = vmatpush1.msra.mxu0 %v4813_v56 }
 0xdbb   :  { %v4304_v26 = vpop.xlane.xlu0 %4303 }
 0xdbc   :  { %v4308_v27 = vmul.f32 0.015625, %v4304_v26  ;;  %v4852_v26 = vld [vmem:[%s7381_s6 + $0x1b8] sm:$0xff] }
 0xdbe   :  { %v4310_v40 = vsub.f32 %v4300_v12, %v4308_v27  ;;  %v4857_v12 = vld [vmem:[%s7381_s6 + $0x1e0] sm:$0xff]  ;;  %v4836_v27 = vld [vmem:[%s7381_s6 + $0x138] sm:$0xff] }
 0xdc0   :  { %v4312_v9 = vmul.f32 %v4310_v40, %v4310_v40 }
 0xdc2   :  { %v4314_v29 = vsel %vm162_vm0, %v4312_v9, 0.0  ;;  %v4835_v9 = vld [vmem:[%s7381_s6 + $0x130] sm:$0xff] }
 0xdc3   :  { %4315 = vadd.xlane.f32.xlu0 %v4314_v29  ;;  %v4850_v29 = vld [vmem:[%s7381_s6 + $0x1a8] sm:$0xff] }
 0xdcd   :  { %v4307_v34 = vpop.xlane.xlu1 %4306 }
 0xdce   :  { %v4309_v30 = vmul.f32 0.015625, %v4307_v34  ;;  %v4834_v34 = vld [vmem:[%s7381_s6 + $0x128] sm:$0xff] }
 0xdd0   :  { %v4311_v32 = vsub.f32 %v4301_v24, %v4309_v30  ;;  %v4853_v24 = vld [vmem:[%s7381_s6 + $0x1c0] sm:$0xff] }
 0xdd1   :  { %v4849_v30 = vld [vmem:[%s7381_s6 + $0x1a0] sm:$0xff] }
 0xdd2   :  { %v4313_v33 = vmul.f32 %v4311_v32, %v4311_v32 }
 0xdd4   :  { %v4317_v35 = vsel %vm162_vm0, %v4313_v33, 0.0  ;;  %v4848_v33 = vld [vmem:[%s7381_s6 + $0x198] sm:$0xff] }
 0xdd5   :  { %4318 = vadd.xlane.f32.xlu1 %v4317_v35  ;;  %v4832_v35 = vld [vmem:[%s7381_s6 + $0x118] sm:$0xff] }
 0xe4c   :  { %v4316_v57 = vpop.xlane.xlu0 %4315 }
 0xe4d   :  { %v4320_v58 = vmul.f32 0.015625, %v4316_v57 }
 0xe4f   :  { %v4322_v59 = vadd.f32 1e-12, %v4320_v58 }
 0xe51   :  { %5948 = vrsqrt.f32 %v4322_v59 }
 0xe5e   :  { %v5949_v61 = vpop.eup %5948  ;;  %v4319_v62 = vpop.xlane.xlu1 %4318 }
 0xe5f   :  { %v4326_v17 = vmul.f32 %v5949_v61, %v4310_v40  ;;  %v4321_v63 = vmul.f32 0.015625, %v4319_v62  ;;  %v4851_v40 = vld [vmem:[%s7381_s6 + $0x1b0] sm:$0xff] }
 0xe61   :  { %v4323_v3 = vadd.f32 1e-12, %v4321_v63  ;;  %v4332_v5 = vmul.f32 %v4331_v60, %v4326_v17 }
 0xe63   :  { %5950 = vrsqrt.f32 %v4323_v3  ;;  %v7212_v6 = vadd.f32 %v4337_v22, %v4332_v5 }
 0xe65   :  { %4897 = vmatmul.mubr.msk.f32.vlgmr.msra.gmra.mxu0 %vm162_vm0, %v7212_v6 }
 0xe66   :  { %4424 = vmatprep.mubr.f32.mxu0 %v5996_v2  ;;  %v4859_v2 = vld [vmem:[%s7381_s6 + $0x1f0] sm:$0xff] }
 0xe67   :  { %5227 = vmatprep.subr.mxu1 %v4859_v2 }
 0xe68   :  { %5228 = vmatpush3.msra.mxu1 %v4843_v23 }
 0xe69   :  { %5229 = vmatprep.subr.mxu1 %v4858_v42 }
 0xe6a   :  { %5230 = vmatpush3.msra.mxu1 %v4842_v11 }
 0xe6b   :  { %5231 = vmatprep.subr.mxu1 %v4857_v12 }
 0xe6c   :  { %5232 = vmatpush3.msra.mxu1 %v4841_v20 }
 0xe6d   :  { %5233 = vmatprep.subr.mxu1 %v4856_v8 }
 0xe6e   :  { %5234 = vmatpush3.msra.mxu1 %v4840_v14 }
 0xe6f   :  { %5235 = vmatprep.subr.mxu1 %v4855_v15 }
 0xe70   :  { %v5951_v25 = vpop.eup %5950  ;;  %5236 = vmatpush3.msra.mxu1 %v4839_v41 }
 0xe71   :  { %v4327_v28 = vmul.f32 %v5951_v25, %v4311_v32  ;;  %5237 = vmatprep.subr.mxu1 %v4854_v19  ;;  %v4833_v32 = vld [vmem:[%s7381_s6 + $0x120] sm:$0xff]  ;;  %s5998_s6 = smov [#allocation2]  }
 0xe72   :  { %5238 = vmatpush3.msra.mxu1 %v4838_v16  ;;  %s4666_s7 = sshll.u32 %s5998_s6, 4  ;;  %s4667_s7 = int_to_ptr.vmem [resolvable:$true] %s4666_s7 }
 0xe73   :  { %v4333_v7 = vmul.f32 %v4331_v60, %v4327_v28  ;;  %5239 = vmatprep.subr.mxu1 %v4853_v24  ;;  %s5974_s29 = scalar_lea.vmem %s4667_s7, 512  ;;  %p5979_p1 = scmp.lt.s32.totalorder %s4667_s7, %s4667_s7 }
 0xe74   :  { %5240 = vmatpush3.msra.mxu1 %v4837_v44  ;;  %p5975_p0 = scmp.ne.s32.totalorder %s4667_s7, %s5974_s29  ;;  %p5980_p2 = scmp.lt.s32.totalorder %s5974_s29, %s5974_s29 }
 0xe75   :  { %v7217_v18 = vadd.f32 %v4337_v22, %v4333_v7  ;;  %5241 = vmatprep.subr.mxu1 %v4852_v26 }
 0xe76   :  { %5242 = vmatpush3.msra.mxu1 %v4836_v27  ;;  %p5981_p3 = por %p5980_p2, %p5979_p1 }
 0xe77   :  { %4898 = vmatmul.mubr.msk.f32.gmra.mxu0 %vm162_vm0, %v7217_v18  ;;  %5243 = vmatprep.subr.mxu1 %v4851_v40 }
 0xe78   :  { %5244 = vmatpush3.msra.mxu1 %v4835_v9  ;;  %p5982_p4 = pnand %p5981_p3, %p5975_p0 }
 0xe79   :  { %5245 = vmatprep.subr.mxu1 %v4850_v29 }
 0xe7a   :  { %5246 = vmatpush3.msra.mxu1 %v4834_v34 }
 0xe7b   :  { %5247 = vmatprep.subr.mxu1 %v4849_v30 }
 0xe7c   :  { %5248 = vmatpush3.msra.mxu1 %v4833_v32 }
 0xe7d   :  { %5249 = vmatprep.subr.mxu1 %v4848_v33 }
 0xe7e   :  { %5250 = vmatpush3.msra.mxu1 %v4832_v35 }
 0xe7f   :  { %5251 = vmatprep.subr.mxu1 %v4847_v21 }
 0xe80   :  { %5252 = vmatpush3.msra.mxu1 %v4831_v36 }
 0xe81   :  { %5253 = vmatprep.subr.mxu1 %v4846_v43 }
 0xe82   :  { %5254 = vmatpush3.msra.mxu1 %v4830_v47 }
 0xe83   :  { %5255 = vmatprep.subr.mxu1 %v4845_v48 }
 0xe84   :  { %5256 = vmatpush3.msra.mxu1 %v4829_v46 }
 0xf25   :  { %v4420_v51 = vpop.f32.mrf.mxu0 }
 0xf26   :  { %v7323_v52 = vadd.f32 %v4420_v51, %v4343_v50 }
 0xf27   :  { %v4422_v53 = vpop.f32.mrf.mxu0 }
 0xf28   :  { %v7326_v54 = vmul.f32 0.70710677, %v7323_v52  ;;  %v7328_v45 = vadd.f32 %v4422_v53, %v4347_v38 }
 0xf2a   :  { %v4439_v55 = vand.u32 2147483647, %v7326_v54  ;;  %v7332_v56 = vmul.f32 0.70710677, %v7328_v45  ;;  %vm4519_vm8 = vcmp.ge.f32.partialorder %v7326_v54, 0.0 }
 0xf2c   :  { %v4443_v57 = vmul.f32 0.3275911, %v4439_v55  ;;  %v4440_v58 = vand.u32 2147483647, %v7332_v56  ;;  %v4495_v61 = vsub.f32 0.0, %v4439_v55  ;;  %vm4520_vm9 = vcmp.ge.f32.partialorder %v7332_v56, 0.0 }
 0xf2e   :  { %v4447_v59 = vadd.f32 1.0, %v4443_v57  ;;  %v4444_v60 = vmul.f32 0.3275911, %v4440_v58  ;;  %v4496_v17 = vsub.f32 0.0, %v4440_v58  ;;  %v4499_v22 = vmul.f32 %v4495_v61, %v4439_v55 }
 0xf30   :  { %5952 = vrcp.f32 %v4447_v59  ;;  %v4448_v13 = vadd.f32 1.0, %v4444_v60  ;;  %v4500_v28 = vmul.f32 %v4496_v17, %v4440_v58  ;;  %v4503_v2 = vmul.f32 1.442695, %v4499_v22 }
 0xf32   :  { %5954 = vrcp.f32 %v4448_v13  ;;  %v4505_v8 = vmul.f32 1.442695, %v4500_v28 }
 0xf33   :  { %5956 = vpow2.f32 %v4503_v2 }
 0xf37   :  { %v4426_v62 = vpop.f32.mrf.mxu0 }
 0xf38   :  { %v7335_v63 = vadd.f32 %v4426_v62, %v4343_v50 }
 0xf39   :  { %v4428_v3 = vpop.f32.mrf.mxu0 }
 0xf3a   :  { %v7338_v5 = vmul.f32 0.70710677, %v7335_v63  ;;  %v7340_v25 = vadd.f32 %v4428_v3, %v4347_v38 }
 0xf3c   :  { %v4441_v7 = vand.u32 2147483647, %v7338_v5  ;;  %v7344_v31 = vmul.f32 0.70710677, %v7340_v25  ;;  %vm4521_vm10 = vcmp.ge.f32.partialorder %v7338_v5, 0.0  ;;  %v4542_v5 = vrot.slane %v7143_v4, %v2233_v37 }
 0xf3d   :  { %v5953_v10 = vpop.eup %5952 }
 0xf3e   :  { %v4459_v23 = vmul.f32 1.0614054, %v5953_v10  ;;  %v4445_v42 = vmul.f32 0.3275911, %v4441_v7  ;;  %v4442_v11 = vand.u32 2147483647, %v7344_v31 }
 0xf3f   :  { %v5955_v12 = vpop.eup %5954  ;;  %v4497_v29 = vsub.f32 0.0, %v4441_v7  ;;  %vm4522_vm11 = vcmp.ge.f32.partialorder %v7344_v31, 0.0 }
 0xf40   :  { %v4463_v20 = vadd.f32 -1.4531521, %v4459_v23  ;;  %v4449_v14 = vadd.f32 1.0, %v4445_v42  ;;  %v4446_v15 = vmul.f32 0.3275911, %v4442_v11  ;;  %v4498_v32 = vsub.f32 0.0, %v4442_v11  ;;  %v5957_v43 = vpop.eup %5956 }
 0xf41   :  { %v4460_v41 = vmul.f32 1.0614054, %v5955_v12  ;;  %v4501_v21 = vmul.f32 %v4497_v29, %v4441_v7 }
 0xf42   :  { %v4467_v19 = vmul.f32 %v5953_v10, %v4463_v20  ;;  %5958 = vrcp.f32 %v4449_v14  ;;  %v4450_v16 = vadd.f32 1.0, %v4446_v15  ;;  %v4502_v46 = vmul.f32 %v4498_v32, %v4442_v11 }
 0xf43   :  { %v4464_v24 = vadd.f32 -1.4531521, %v4460_v41  ;;  %5960 = vpow2.f32 %v4505_v8  ;;  %v4507_v38 = vmul.f32 1.442695, %v4501_v21  ;;  %v4432_v20 = vmul.f32 0.5, %v7328_v45 }
 0xf44   :  { %v4471_v44 = vadd.f32 1.4214138, %v4467_v19  ;;  %5962 = vrcp.f32 %v4450_v16  ;;  %v4509_v60 = vmul.f32 1.442695, %v4502_v46  ;;  %v4431_v15 = vmul.f32 0.5, %v7323_v52 }
 0xf45   :  { %v4468_v26 = vmul.f32 %v5955_v12, %v4464_v24  ;;  %5964 = vpow2.f32 %v4507_v38 }
 0xf46   :  { %v4475_v27 = vmul.f32 %v5953_v10, %v4471_v44  ;;  %5966 = vpow2.f32 %v4509_v60 }
 0xf47   :  { %v4472_v40 = vadd.f32 1.4214138, %v4468_v26 }
 0xf48   :  { %v4479_v9 = vadd.f32 -0.28449672, %v4475_v27 }
 0xf49   :  { %v4476_v34 = vmul.f32 %v5955_v12, %v4472_v40 }
 0xf4a   :  { %v4483_v30 = vmul.f32 %v5953_v10, %v4479_v9 }
 0xf4b   :  { %v4480_v33 = vadd.f32 -0.28449672, %v4476_v34 }
 0xf4c   :  { %v4487_v35 = vadd.f32 0.2548296, %v4483_v30 }
 0xf4d   :  { %v4484_v36 = vmul.f32 %v5955_v12, %v4480_v33 }
 0xf4e   :  { %v4491_v47 = vmul.f32 %v5953_v10, %v4487_v35 }
 0xf4f   :  { %v5959_v48 = vpop.eup %5958  ;;  %v4488_v49 = vadd.f32 0.2548296, %v4484_v36 }
 0xf50   :  { %v4511_v50 = vmul.f32 %v5957_v43, %v4491_v47  ;;  %v4461_v51 = vmul.f32 1.0614054, %v5959_v48  ;;  %v5961_v53 = vpop.eup %5960  ;;  %v4434_v43 = vmul.f32 0.5, %v7340_v25 }
 0xf51   :  { %v4492_v55 = vmul.f32 %v5955_v12, %v4488_v49  ;;  %v5963_v57 = vpop.eup %5962 }
 0xf52   :  { %v4515_v58 = vsub.f32 1.0, %v4511_v50  ;;  %v4465_v59 = vadd.f32 -1.4531521, %v4461_v51  ;;  %v4462_v61 = vmul.f32 1.0614054, %v5963_v57  ;;  %v5965_v27 = vpop.eup %5964 }
 0xf53   :  { %v4512_v13 = vmul.f32 %v5961_v53, %v4492_v55  ;;  %v5967_v34 = vpop.eup %5966 }
 0xf54   :  { %v4523_v62 = vsub.f32 0.0, %v4515_v58  ;;  %v4469_v17 = vmul.f32 %v5959_v48, %v4465_v59  ;;  %v4466_v3 = vadd.f32 -1.4531521, %v4462_v61 }
 0xf55   :  { %v4516_v22 = vsub.f32 1.0, %v4512_v13 }
 0xf56   :  { %v4527_v28 = vsel %vm4519_vm8, %v4515_v58, %v4523_v62  ;;  %v4473_v7 = vadd.f32 1.4214138, %v4469_v17  ;;  %v4470_v2 = vmul.f32 %v5963_v57, %v4466_v3 }
 0xf57   :  { %v4524_v10 = vsub.f32 0.0, %v4516_v22  ;;  %v4531_v42 = vadd.f32 1.0, %v4527_v28 }
 0xf58   :  { %v4477_v23 = vmul.f32 %v5959_v48, %v4473_v7  ;;  %v4474_v12 = vadd.f32 1.4214138, %v4470_v2 }
 0xf59   :  { %v4528_v11 = vsel %vm4520_vm9, %v4516_v22, %v4524_v10  ;;  %v4535_v16 = vmul.f32 %v4531_v42, %v4431_v15 }
 0xf5a   :  { %v4532_v8 = vadd.f32 1.0, %v4528_v11  ;;  %v4481_v14 = vadd.f32 -0.28449672, %v4477_v23  ;;  %v4478_v54 = vmul.f32 %v5963_v57, %v4474_v12  ;;  %v4649_v23 = vrot.slane %v7143_v4, %v2340_v0 }
 0xf5c   :  { %v4536_v41 = vmul.f32 %v4532_v8, %v4432_v20  ;;  %v4485_v19 = vmul.f32 %v5959_v48, %v4481_v14  ;;  %v4482_v24 = vadd.f32 -0.28449672, %v4478_v54  ;;  %v4655_v8 = vrot.slane %v7143_v4, %v2346_v1 }
 0xf5e   :  { %4607 = vmatprep.mubr.f32.mxu1 %v4536_v41  ;;  %v4489_v44 = vadd.f32 0.2548296, %v4485_v19  ;;  %v4486_v26 = vmul.f32 %v5963_v57, %v4482_v24 }
 0xf5f   :  { %4608 = vmatmul.mubr.f32.vlgmr.msra.gmra.mxu1 %v4535_v16 }
 0xf60   :  { %v4493_v56 = vmul.f32 %v5959_v48, %v4489_v44  ;;  %v4490_v40 = vadd.f32 0.2548296, %v4486_v26  ;;  %v4433_v48 = vmul.f32 0.5, %v7335_v63 }
 0xf62   :  { %v4513_v9 = vmul.f32 %v5965_v27, %v4493_v56  ;;  %v4494_v29 = vmul.f32 %v5963_v57, %v4490_v40 }
 0xf64   :  { %v4517_v45 = vsub.f32 1.0, %v4513_v9  ;;  %v4514_v30 = vmul.f32 %v5967_v34, %v4494_v29 }
 0xf66   :  { %v4525_v32 = vsub.f32 0.0, %v4517_v45  ;;  %v4518_v52 = vsub.f32 1.0, %v4514_v30 }
 0xf68   :  { %v4529_v33 = vsel %vm4521_vm10, %v4517_v45, %v4525_v32  ;;  %v4526_v35 = vsub.f32 0.0, %v4518_v52 }
 0xf69   :  { %v4533_v36 = vadd.f32 1.0, %v4529_v33 }
 0xf6a   :  { %v4530_v21 = vsel %vm4522_vm11, %v4518_v52, %v4526_v35 }
 0xf6b   :  { %v4534_v47 = vadd.f32 1.0, %v4530_v21  ;;  %v4537_v49 = vmul.f32 %v4533_v36, %v4433_v48 }
 0xf6d   :  { %v4538_v46 = vmul.f32 %v4534_v47, %v4434_v43 }
 0xf6f   :  { %4612 = vmatprep.mubr.f32.mxu1 %v4538_v46 }
 0xf70   :  { %4613 = vmatmul.mubr.f32.gmra.mxu1 %v4537_v49 }
0x101f   :  { %v5257_v50 = vpop.f32.mrf.mxu1 }
0x1021   :  { %v5258_v38 = vpop.f32.mrf.mxu1 }
0x1022   :  { %v5259_v51 = vadd.f32 %v5258_v38, %v5257_v50 }
0x1024   :  { %v4610_v53 = vadd.f32 %v5259_v51, %v4542_v5 }
0x1026   :  { %v4618_v31 = vadd.f32 %v4610_v53, %v7212_v6 }
0x1028   :  { %v4620_v55 = vsel %vm162_vm0, %v4618_v31, 0.0 }
0x1029   :  { %4621 = vadd.xlane.f32.xlu0 %v4620_v55 }
0x1030   :  { %v5260_v25 = vpop.f32.mrf.mxu1 }
0x1032   :  { %v5261_v57 = vpop.f32.mrf.mxu1 }
0x1033   :  { %v5262_v63 = vadd.f32 %v5261_v57, %v5260_v25 }
0x1035   :  { %v4615_v58 = vadd.f32 %v5262_v63, %v4542_v5 }
0x1037   :  { %v4619_v59 = vadd.f32 %v4615_v58, %v7217_v18 }
0x1039   :  { %v4623_v60 = vsel %vm162_vm0, %v4619_v59, 0.0 }
0x103a   :  { %4624 = vadd.xlane.f32.xlu1 %v4623_v60 }
0x10b2   :  { %v4622_v13 = vpop.xlane.xlu0 %4621 }
0x10b3   :  { %v4626_v61 = vmul.f32 0.015625, %v4622_v13 }
0x10b5   :  { %v4628_v37 = vsub.f32 %v4618_v31, %v4626_v61 }
0x10b7   :  { %v4630_v62 = vmul.f32 %v4628_v37, %v4628_v37 }
0x10b9   :  { %v4632_v17 = vsel %vm162_vm0, %v4630_v62, 0.0 }
0x10ba   :  { %4633 = vadd.xlane.f32.xlu0 %v4632_v17 }
0x10c3   :  { %v4625_v6 = vpop.xlane.xlu1 %4624 }
0x10c4   :  { %v4627_v22 = vmul.f32 0.015625, %v4625_v6 }
0x10c6   :  { %v4629_v3 = vsub.f32 %v4619_v59, %v4627_v22 }
0x10c8   :  { %v4631_v28 = vmul.f32 %v4629_v3, %v4629_v3 }
0x10ca   :  { %v4635_v7 = vsel %vm162_vm0, %v4631_v28, 0.0 }
0x10cb   :  { %4636 = vadd.xlane.f32.xlu1 %v4635_v7 }
0x1143   :  { %v4634_v10 = vpop.xlane.xlu0 %4633 }
0x1144   :  { %v4638_v2 = vmul.f32 0.015625, %v4634_v10 }
0x1146   :  { %v4640_v18 = vadd.f32 1e-12, %v4638_v2 }
0x1148   :  { %5968 = vrsqrt.f32 %v4640_v18 }
0x1154   :  { %v4637_v11 = vpop.xlane.xlu1 %4636 }
0x1155   :  { %v5969_v42 = vpop.eup %5968  ;;  %v4639_v20 = vmul.f32 0.015625, %v4637_v11 }
0x1156   :  { %v4644_v12 = vmul.f32 %v5969_v42, %v4628_v37 }
0x1157   :  { %v4641_v15 = vadd.f32 1e-12, %v4639_v20 }
0x1158   :  { %v4650_v14 = vmul.f32 %v4649_v23, %v4644_v12 }
0x1159   :  { %5970 = vrsqrt.f32 %v4641_v15 }
0x115a   :  { %v4656_v54 = vadd.f32 %v4655_v8, %v4650_v14 }
0x115c   :  { %4659 = vst.msk [vmem:[#allocation2 + $0x10] sm:$0xff] %vm162_vm0, %v4656_v54 }
0x1166   :  { %v5971_v41 = vpop.eup %5970 }
0x1167   :  { %v4645_v19 = vmul.f32 %v5971_v41, %v4629_v3 }
0x1169   :  { %v4651_v16 = vmul.f32 %v4649_v23, %v4645_v19 }
0x116b   :  { %v4657_v0 = vadd.f32 %v4655_v8, %v4651_v16 }
0x116d   :  { %4660 = vst.msk [vmem:[#allocation2 + $0x18] sm:$0xff] %vm162_vm0, %v4657_v0 }
0x116e   :  { %5985 = shalt.err (!%p5982_p4)
}
0x116f   :  { %s5999_s30 = smov 128   ;;  %s6000_s9 = smov 8  }
0x1170   :  { %4672 = dma.vmem_to_hbm [thread:$0]  %s4667_s7, 512, %s7383_s8, [#allocation3], %s5999_s30, %s5999_s30, %s6000_s9  }
0x1171   :  { %5994 = dma.done.wait [#allocation3], 512  }
0x1172   :  { %5995 = vsyncadd [#allocation3], 4294966784 }
0x1173   :  { %4676 = vsyncpa [#allocation3], 1 }

</bundles_post_ra>
